<compile_context>
chip_gen: v7x
topology: tpu7x:2x2x1
jax: 0.10.0
libtpu: 0.0.40
codegen_flags: <defaults>
</compile_context>

<pallas_src>
import functools
import numpy as np
import jax
import jax.numpy as jnp
from jax.experimental import pallas as pl
from jax.experimental.pallas import tpu as pltpu


def _silu(v):
    return v * jax.nn.sigmoid(v)


# ---------------------------------------------------------------------------
# Kernel factory: one fused GNN forward (all layers + out_mlp).
# The body is shape-agnostic: node rows may be N (grid over batch) or B*N (folded).
# ---------------------------------------------------------------------------
def make_fused_gnn_kernel(cfg):
    H = cfg["hidden_size"]
    L = cfg["num_layers"]
    O = cfg["output_size"]
    has_res0 = cfg["has_res0"]
    w32_off = cfg["w32_off"]   # name -> (row, nrows)   (bf16, width H)
    w64_off = cfg["w64_off"]   # name -> (row, nrows)   (bf16, width 2H)
    b32_off = cfg["b32_off"]   # name -> row            (f32, width H)
    b64_off = cfg["b64_off"]   # name -> row            (f32, width 2H)

    f32 = jnp.float32
    bf16 = jnp.bfloat16

    def kernel(x_ref, e_ref, g_ref, s_ref, inv_ref,
               w32_ref, w64_ref, b32_ref, b64_ref, o_ref):
        def w32(name):
            r, n = w32_off[name]
            return w32_ref[r:r + n, :]

        def w64(name):
            r, n = w64_off[name]
            return w64_ref[r:r + n, :]

        def b32(name):
            r = b32_off[name]
            return b32_ref[r:r + 1, :]

        def b64(name):
            r = b64_off[name]
            return b64_ref[r:r + 1, :]

        def mm(a, w):
            # bf16 MXU operands, f32 accumulation; elementwise math stays f32
            return jnp.dot(a.astype(bf16), w, preferred_element_type=f32)

        x = x_ref[...]            # [Nn, Fin]    f32
        e = e_ref[...]            # [Ne, Fe_pad] f32
        send_oh = g_ref[0]        # [Ne, Nn]     bf16 one-hot
        recv_oh = g_ref[1]        # [Ne, Nn]     bf16 one-hot
        scat = s_ref[...]         # [Nn, Ne]     bf16 unscaled recv^T
        invc = inv_ref[...]       # [Nn, H]      f32 (1/deg, pre-broadcast)

        # ----------------- layer 0 (only_edge_attr=True) -----------------
        m = _silu(mm(e, w32("l0_w1")) + b32("l0_b1"))
        m = _silu(mm(m, w32("l0_w2")) + b32("l0_b2"))                 # [Ne, H]
        aggv = jnp.dot(scat, m.astype(bf16), preferred_element_type=f32) * invc
        if has_res0:
            res = mm(x, w32("l0_wres")) + b32("l0_bres")
        else:
            res = x  # requires Fin == H
        xn = res + aggv
        u = _silu(mm(xn, w64("l0_wu1")) + b64("l0_bu1"))
        u = mm(u, w32("l0_wu2")) + b32("l0_bu2")
        x_cur = xn + u                                                 # [Nn, H]
        e_cur = m                                                      # [Ne, H]

        # ----------------- layers 1 .. L-1 (unrolled) -----------------
        for li in range(1, L):
            xb = x_cur.astype(bf16)
            # gather first (single-pass bf16 one-hot matmuls), then ONE fused
            # [Ne,3H]x[3H,H] message matmul instead of 3 separate projections.
            xs = jnp.dot(send_oh, xb, preferred_element_type=f32)     # exact copies
            xr = jnp.dot(recv_oh, xb, preferred_element_type=f32)
            cat = jnp.concatenate([xs.astype(bf16), xr.astype(bf16),
                                   e_cur.astype(bf16)], axis=-1)      # [Ne, 3H]
            m = _silu(jnp.dot(cat, w32(f"l{li}_w1"),
                              preferred_element_type=f32) + b32(f"l{li}_b1"))
            m = _silu(mm(m, w32(f"l{li}_w2")) + b32(f"l{li}_b2"))     # [Ne, H]
            aggv = jnp.dot(scat, m.astype(bf16), preferred_element_type=f32) * invc
            xn = x_cur + aggv
            u = _silu(mm(xn, w64(f"l{li}_wu1")) + b64(f"l{li}_bu1"))
            u = mm(u, w32(f"l{li}_wu2")) + b32(f"l{li}_bu2")
            x_cur = xn + u
            e_cur = m
        # the final layer's edge output is dead -> never written to HBM

        # ----------------- out_mlp -----------------
        # TODO(synk): nn.Dropout layers are eval-mode identities here (no RNG masking).
        h = _silu(mm(x_cur, w32("o_w1")) + b32("o_b1"))
        h = _silu(mm(h, w32("o_w2")) + b32("o_b2"))
        h = mm(h, w32("o_w3")) + b32("o_b3")                          # [Nn, H]
        o_ref[...] = h[:, :O]

    return kernel


# ---------------------------------------------------------------------------
# Host-side packing (done once): 4 slabs + static offset tables
# ---------------------------------------------------------------------------
def pack_gnn_params(layer_params, out_params, hidden_size, output_size, fe_pad):
    H, O = hidden_size, output_size
    L = len(layer_params)
    bf16, f32 = jnp.bfloat16, jnp.float32
    has_res0 = "wres" in layer_params[0]

    w32_parts, w32_off = [], {}
    w64_parts, w64_off = [], {}
    b32_parts, b32_off = [], {}
    b64_parts, b64_off = [], {}

    def add_w(parts, off, name, w, width):
        rows, cols = w.shape
        if cols < width:
            w = jnp.pad(w, ((0, 0), (0, width - cols)))
        off[name] = (sum(p.shape[0] for p in parts), rows)
        parts.append(w.astype(bf16))

    def add_b(parts, off, name, b, width):
        b = b.reshape(1, -1)
        if b.shape[1] < width:
            b = jnp.pad(b, ((0, 0), (0, width - b.shape[1])))
        off[name] = sum(p.shape[0] for p in parts)
        parts.append(b.astype(f32))

    # layer-0 first message weight: pad the edge-feature (K) dim to fe_pad
    w1_0 = layer_params[0]["w1"]
    w1_0 = jnp.pad(w1_0, ((0, fe_pad - w1_0.shape[0]), (0, 0)))
    add_w(w32_parts, w32_off, "l0_w1", w1_0, H)
    add_w(w32_parts, w32_off, "l0_w2", layer_params[0]["w2"], H)
    add_w(w32_parts, w32_off, "l0_wu2", layer_params[0]["wu2"], H)
    for li in range(1, L):
        add_w(w32_parts, w32_off, f"l{li}_w1", layer_params[li]["w1"], H)   # [3H, H]
        add_w(w32_parts, w32_off, f"l{li}_w2", layer_params[li]["w2"], H)
        add_w(w32_parts, w32_off, f"l{li}_wu2", layer_params[li]["wu2"], H)
    add_w(w32_parts, w32_off, "o_w1", out_params["w1"], H)
    add_w(w32_parts, w32_off, "o_w2", out_params["w2"], H)
    add_w(w32_parts, w32_off, "o_w3", out_params["w3"], H)                  # cols O->H
    if has_res0:
        add_w(w32_parts, w32_off, "l0_wres", layer_params[0]["wres"], H)    # 8 rows last

    for li in range(L):
        add_w(w64_parts, w64_off, f"l{li}_wu1", layer_params[li]["wu1"], 2 * H)

    add_b(b32_parts, b32_off, "l0_b1", layer_params[0]["b1"], H)
    add_b(b32_parts, b32_off, "l0_b2", layer_params[0]["b2"], H)
    add_b(b32_parts, b32_off, "l0_bu2", layer_params[0]["bu2"], H)
    if has_res0:
        add_b(b32_parts, b32_off, "l0_bres", layer_params[0]["bres"], H)
    for li in range(1, L):
        add_b(b32_parts, b32_off, f"l{li}_b1", layer_params[li]["b1"], H)
        add_b(b32_parts, b32_off, f"l{li}_b2", layer_params[li]["b2"], H)
        add_b(b32_parts, b32_off, f"l{li}_bu2", layer_params[li]["bu2"], H)
    add_b(b32_parts, b32_off, "o_b1", out_params["b1"], H)
    add_b(b32_parts, b32_off, "o_b2", out_params["b2"], H)
    add_b(b32_parts, b32_off, "o_b3", out_params["b3"], H)
    for li in range(L):
        add_b(b64_parts, b64_off, f"l{li}_bu1", layer_params[li]["bu1"], 2 * H)

    def finish(parts, dtype, row_mult):
        slab = jnp.concatenate(parts, axis=0).astype(dtype)
        pad = (-slab.shape[0]) % row_mult
        if pad:
            slab = jnp.pad(slab, ((0, pad), (0, 0)))
        return slab

    slabs = (finish(w32_parts, bf16, 16), finish(w64_parts, bf16, 16),
             finish(b32_parts, f32, 8), finish(b64_parts, f32, 8))
    cfg = dict(hidden_size=H, num_layers=L, output_size=O, has_res0=has_res0,
               fe_pad=fe_pad, w32_off=w32_off, w64_off=w64_off,
               b32_off=b32_off, b64_off=b64_off)
    return slabs, cfg


def build_graph(send, recv, num_objects, batch_fold, hidden_size):
    """bf16 one-hot gather / unscaled scatter matrices + f32 1/deg.
    batch_fold > 1 builds the block-diagonal structure for the folded mode."""
    N, E, B = num_objects, send.shape[0], batch_fold
    Nt, Et = B * N, B * E
    send_f = np.concatenate([np.asarray(send) + b * N for b in range(B)])
    recv_f = np.concatenate([np.asarray(recv) + b * N for b in range(B)])
    g = np.zeros((2, Et, Nt), np.float32)
    g[0, np.arange(Et), send_f] = 1.0
    g[1, np.arange(Et), recv_f] = 1.0
    counts = g[1].sum(axis=0)
    inv = (1.0 / np.maximum(counts, 1.0)).astype(np.float32)
    inv_b = np.broadcast_to(inv[:, None], (Nt, hidden_size)).copy()
    return (jnp.asarray(g, jnp.bfloat16),              # [2, Et, Nt]
            jnp.asarray(g[1].T.copy(), jnp.bfloat16),  # [Nt, Et]
            jnp.asarray(inv_b, jnp.float32))           # [Nt, H]


# ---------------------------------------------------------------------------
# pallas_call wrappers (two modes sharing one kernel body)
# ---------------------------------------------------------------------------
def _const_spec(a):
    nd = a.ndim
    return pl.BlockSpec(a.shape, lambda b, _nd=nd: (0,) * _nd)


def gnn_forward_fold(x, edge_attr, graph, slabs, *, cfg):
    """Single grid step; batch folded into the row dim (best on 1-TensorCore chips)."""
    B, N, Fin = x.shape
    _, E, Fe = edge_attr.shape
    O, fe_pad = cfg["output_size"], cfg["fe_pad"]
    Nt, Et = B * N, B * E
    x2 = x.reshape(Nt, Fin)
    e2 = jnp.pad(edge_attr, ((0, 0), (0, 0), (0, fe_pad - Fe))).reshape(Et, fe_pad)
    g, scat, invc = graph
    inputs = [x2, e2, g, scat, invc] + list(slabs)
    out = pl.pallas_call(
        make_fused_gnn_kernel(cfg),
        out_shape=jax.ShapeDtypeStruct((Nt, O), jnp.float32),
        grid=(1,),
        in_specs=[_const_spec(a) for a in inputs],
        out_specs=pl.BlockSpec((Nt, O), lambda b: (0, 0)),
        compiler_params=pltpu.CompilerParams(dimension_semantics=("arbitrary",)),
    )(*inputs)
    return out.reshape(B, N, O)


def gnn_forward_batchgrid(x, edge_attr, graph, slabs, *, cfg):
    """grid=(B,) 'parallel' variant: batch elements shard across TensorCores (v7x)."""
    B, N, Fin = x.shape
    _, E, Fe = edge_attr.shape
    O, fe_pad = cfg["output_size"], cfg["fe_pad"]
    e_p = jnp.pad(edge_attr, ((0, 0), (0, 0), (0, fe_pad - Fe)))
    g, scat, invc = graph          # built with batch_fold=1
    inputs = [x, e_p, g, scat, invc] + list(slabs)
    in_specs = [pl.BlockSpec((None, N, Fin), lambda b: (b, 0, 0)),
                pl.BlockSpec((None, E, fe_pad), lambda b: (b, 0, 0))]
    in_specs += [_const_spec(a) for a in inputs[2:]]
    return pl.pallas_call(
        make_fused_gnn_kernel(cfg),
        out_shape=jax.ShapeDtypeStruct((B, N, O), jnp.float32),
        grid=(B,),
        in_specs=in_specs,
        out_specs=pl.BlockSpec((None, N, O), lambda b: (b, 0, 0)),
        compiler_params=pltpu.CompilerParams(dimension_semantics=("parallel",)),
    )(*inputs)


# ---------------------------------------------------------------------------
# Pure-JAX reference (parametrized matmul + optional bf16 aggregation emulation)
# ---------------------------------------------------------------------------
def gnn_forward_ref(x, edge_attr, layer_params, out_params, send, recv, N,
                    input_size, hidden_size, matmul, agg_cast=None):
    for li, p in enumerate(layer_params):
        only_edge_attr = (li == 0)
        has_res = (li == 0 and input_size != hidden_size)
        e = edge_attr
        if not only_edge_attr:
            e = jnp.concatenate([x[:, send, :], x[:, recv, :], e], axis=-1)
        m = _silu(matmul(e, p["w1"]) + p["b1"])
        m = _silu(matmul(m, p["w2"]) + p["b2"])
        m_s = m if agg_cast is None else m.astype(agg_cast).astype(jnp.float32)
        counts = jnp.zeros((N,), jnp.float32).at[recv].add(1.0)
        summed = jnp.zeros((x.shape[0], N, m.shape[-1]), jnp.float32).at[:, recv, :].add(m_s)
        mean = summed / jnp.clip(counts, 1.0)[None, :, None]
        res = (matmul(x, p["wres"]) + p["bres"]) if has_res else x
        xn = res + mean
        u = matmul(_silu(matmul(xn, p["wu1"]) + p["bu1"]), p["wu2"]) + p["bu2"]
        x, edge_attr = xn + u, m
    h = _silu(matmul(x, out_params["w1"]) + out_params["b1"])
    h = _silu(matmul(h, out_params["w2"]) + out_params["b2"])
    return matmul(h, out_params["w3"]) + out_params["b3"]


# ---------------------------------------------------------------------------
# Parameter init (deterministic, PyTorch-Linear-style uniform)
# ---------------------------------------------------------------------------
def linear_params(key, fan_in, fan_out):
    kw, kb = jax.random.split(key)
    bound = 1.0 / float(np.sqrt(fan_in))
    w = jax.random.uniform(kw, (fan_in, fan_out), jnp.float32, -bound, bound)
    b = jax.random.uniform(kb, (1, fan_out), jnp.float32, -bound, bound)
    return w, b


if __name__ == "__main__":
    # ---- GNN hyperparameters (small) ----
    input_size, hidden_size, output_size = 8, 32, 4
    dropout_prob = 0.1
    num_dims, window_size, num_layers = 2, 1, 4
    params_cfg = {"localizer_type": "baseline", "use_z": False}

    num_relative_features = 2 * num_dims * window_size               # 4
    num_edge_features = num_relative_features + 9 * window_size + 4  # 17
    fe_pad = 32                                                       # lane-friendly K

    B, N = 2, 8
    # fully connected directed graph without self loops
    send_l, recv_l = [], []
    for s in range(N):
        for r in range(N):
            if s != r:
                send_l.append(s)
                recv_l.append(r)
    send = np.asarray(send_l, np.int32)
    recv = np.asarray(recv_l, np.int32)
    E = send.shape[0]

    # ---- parameters ----
    key = jax.random.PRNGKey(0)
    layer_params = []
    for li in range(num_layers):
        key, k1, k2, k3, k4, k5 = jax.random.split(key, 6)
        fe = num_edge_features if li == 0 else 3 * hidden_size
        fin = input_size if li == 0 else hidden_size
        p = {}
        p["w1"], p["b1"] = linear_params(k1, fe, hidden_size)
        p["w2"], p["b2"] = linear_params(k2, hidden_size, hidden_size)
        if fin != hidden_size:
            p["wres"], p["bres"] = linear_params(k3, fin, hidden_size)
        p["wu1"], p["bu1"] = linear_params(k4, hidden_size, 2 * hidden_size)
        p["wu2"], p["bu2"] = linear_params(k5, 2 * hidden_size, hidden_size)
        layer_params.append(p)

    key, k1, k2, k3 = jax.random.split(key, 4)
    out_params = {}
    out_params["w1"], out_params["b1"] = linear_params(k1, hidden_size, hidden_size)
    out_params["w2"], out_params["b2"] = linear_params(k2, hidden_size, hidden_size)
    out_params["w3"], out_params["b3"] = linear_params(k3, hidden_size, output_size)

    # ---- inputs ----
    key, kx, ke = jax.random.split(key, 3)
    x = jax.random.normal(kx, (B, N, input_size), jnp.float32)
    edge_attr = jax.random.normal(ke, (B, E, num_edge_features), jnp.float32)

    # ---- pack once, run both kernel modes ----
    slabs, cfg = pack_gnn_params(layer_params, out_params, hidden_size, output_size, fe_pad)
    graph_fold = build_graph(send, recv, N, B, hidden_size)   # block-diagonal (folded)
    graph_one = build_graph(send, recv, N, 1, hidden_size)    # per-batch (grid mode)

    run_fold = jax.jit(functools.partial(gnn_forward_fold, cfg=cfg))
    run_grid = jax.jit(functools.partial(gnn_forward_batchgrid, cfg=cfg))

    pred_fold = jax.block_until_ready(run_fold(x, edge_attr, graph_fold, slabs))
    pred_grid = jax.block_until_ready(run_grid(x, edge_attr, graph_one, slabs))
    assert pred_fold.shape == (B, N, output_size)
    assert pred_grid.shape == (B, N, output_size)

    # ---- reference checks ----
    def mm_f32(a, b):
        return jnp.dot(a, b, preferred_element_type=jnp.float32)

    def mm_mx(a, b):   # emulates the kernel's bf16-operand / f32-accumulate matmuls
        return jnp.dot(a.astype(jnp.bfloat16), b.astype(jnp.bfloat16),
                       preferred_element_type=jnp.float32)

    ref_mx = jax.block_until_ready(gnn_forward_ref(
        x, edge_attr, layer_params, out_params, jnp.asarray(send), jnp.asarray(recv),
        N, input_size, hidden_size, mm_mx, agg_cast=jnp.bfloat16))
    ref_f32 = jax.block_until_ready(gnn_forward_ref(
        x, edge_attr, layer_params, out_params, jnp.asarray(send), jnp.asarray(recv),
        N, input_size, hidden_size, mm_f32, agg_cast=None))

    for pred_k in (pred_fold, pred_grid):
        # tight check vs a reference using the same mixed precision (logic correctness)
        np.testing.assert_allclose(np.asarray(pred_k), np.asarray(ref_mx),
                                   rtol=5e-3, atol=5e-3)
        # loose check vs the full-f32 reference (bounds bf16 quantization drift)
        np.testing.assert_allclose(np.asarray(pred_k), np.asarray(ref_f32),
                                   rtol=8e-2, atol=8e-2)

    # production selection: fold on single-TC chips (v5e/v6e), grid=(B,) on v7x (2 TCs)
    try:
        kind = jax.devices()[0].device_kind.lower()
    except Exception:
        kind = ""
    pred = pred_grid if "v7" in kind else pred_fold
    assert pred.shape == (B, N, output_size)

    print("KERNEL_OK")
</pallas_src>

<mosaic_0001>
module attributes {stable_mosaic.version = 11 : i64} {
  func.func @kernel(%arg0: i32, %arg1: memref<16x8xf32, #tpu.memory_space<vmem>>, %arg2: memref<112x32xf32, #tpu.memory_space<vmem>>, %arg3: memref<2x112x16xbf16, #tpu.memory_space<vmem>>, %arg4: memref<16x112xbf16, #tpu.memory_space<vmem>>, %arg5: memref<16x32xf32, #tpu.memory_space<vmem>>, %arg6: memref<816x32xbf16, #tpu.memory_space<vmem>>, %arg7: memref<128x64xbf16, #tpu.memory_space<vmem>>, %arg8: memref<16x32xf32, #tpu.memory_space<vmem>>, %arg9: memref<8x64xf32, #tpu.memory_space<vmem>>, %arg10: memref<16x4xf32, #tpu.memory_space<vmem>>) attributes {dimension_semantics = [#tpu.dimension_semantics<arbitrary>], iteration_bounds = array<i64: 1>, scalar_prefetch = 0 : i64, scratch_operands = 0 : i64, tpu.core_type = #tpu.core_type<tc>, window_params = [{pipeline_mode = #tpu.pipeline_mode<synchronous>, transform_indices = @transform_0, window_bounds = array<i64: 16, 8>}, {pipeline_mode = #tpu.pipeline_mode<synchronous>, transform_indices = @transform_1, window_bounds = array<i64: 112, 32>}, {pipeline_mode = #tpu.pipeline_mode<synchronous>, transform_indices = @transform_2, window_bounds = array<i64: 2, 112, 16>}, {pipeline_mode = #tpu.pipeline_mode<synchronous>, transform_indices = @transform_3, window_bounds = array<i64: 16, 112>}, {pipeline_mode = #tpu.pipeline_mode<synchronous>, transform_indices = @transform_4, window_bounds = array<i64: 16, 32>}, {pipeline_mode = #tpu.pipeline_mode<synchronous>, transform_indices = @transform_5, window_bounds = array<i64: 816, 32>}, {pipeline_mode = #tpu.pipeline_mode<synchronous>, transform_indices = @transform_6, window_bounds = array<i64: 128, 64>}, {pipeline_mode = #tpu.pipeline_mode<synchronous>, transform_indices = @transform_7, window_bounds = array<i64: 16, 32>}, {pipeline_mode = #tpu.pipeline_mode<synchronous>, transform_indices = @transform_8, window_bounds = array<i64: 8, 64>}, {pipeline_mode = #tpu.pipeline_mode<synchronous>, transform_indices = @transform_9, window_bounds = array<i64: 16, 4>}]} {
    %c0 = arith.constant 0 : index
    %c0_0 = arith.constant 0 : index
    %0 = vector.load %arg1[%c0, %c0_0] : memref<16x8xf32, #tpu.memory_space<vmem>>, vector<16x8xf32>
    %c0_1 = arith.constant 0 : index
    %c0_2 = arith.constant 0 : index
    %1 = vector.load %arg2[%c0_1, %c0_2] : memref<112x32xf32, #tpu.memory_space<vmem>>, vector<112x32xf32>
    %c0_3 = arith.constant 0 : index
    %c0_4 = arith.constant 0 : index
    %c0_5 = arith.constant 0 : index
    %2 = vector.load %arg3[%c0_3, %c0_4, %c0_5] : memref<2x112x16xbf16, #tpu.memory_space<vmem>>, vector<1x112x16xbf16>
    %3 = vector.shape_cast %2 : vector<1x112x16xbf16> to vector<112x16xbf16>
    %c1 = arith.constant 1 : index
    %c0_6 = arith.constant 0 : index
    %c0_7 = arith.constant 0 : index
    %4 = vector.load %arg3[%c1, %c0_6, %c0_7] : memref<2x112x16xbf16, #tpu.memory_space<vmem>>, vector<1x112x16xbf16>
    %5 = vector.shape_cast %4 : vector<1x112x16xbf16> to vector<112x16xbf16>
    %c0_8 = arith.constant 0 : index
    %c0_9 = arith.constant 0 : index
    %6 = vector.load %arg4[%c0_8, %c0_9] : memref<16x112xbf16, #tpu.memory_space<vmem>>, vector<16x112xbf16>
    %c0_10 = arith.constant 0 : index
    %c0_11 = arith.constant 0 : index
    %7 = vector.load %arg5[%c0_10, %c0_11] : memref<16x32xf32, #tpu.memory_space<vmem>>, vector<16x32xf32>
    %c0_12 = arith.constant 0 : index
    %c0_13 = arith.constant 0 : index
    %8 = vector.load %arg6[%c0_12, %c0_13] : memref<816x32xbf16, #tpu.memory_space<vmem>>, vector<32x32xbf16>
    %9 = arith.truncf %1 : vector<112x32xf32> to vector<112x32xbf16>
    %cst = arith.constant dense<0.000000e+00> : vector<112x32xf32>
    %10 = tpu.matmul %9, %8, %cst {dimension_numbers = #tpu.dot_dimension_numbers<[1], [0], [0], [1], [0, 0, 1, 1], [], []>} : vector<112x32xbf16>, vector<32x32xbf16>, vector<112x32xf32> -> vector<112x32xf32>
    %c0_14 = arith.constant 0 : index
    %c0_15 = arith.constant 0 : index
    %11 = vector.load %arg8[%c0_14, %c0_15] : memref<16x32xf32, #tpu.memory_space<vmem>>, vector<1x32xf32>
    %12 = vector.broadcast %11 : vector<1x32xf32> to vector<112x32xf32>
    %13 = arith.addf %10, %12 : vector<112x32xf32>
    %14 = arith.negf %13 : vector<112x32xf32>
    %15 = math.exp %14 : vector<112x32xf32>
    %cst_16 = arith.constant 1.000000e+00 : f32
    %16 = vector.broadcast %cst_16 : f32 to vector<112x32xf32>
    %17 = arith.addf %16, %15 : vector<112x32xf32>
    %18 = arith.divf %16, %17 : vector<112x32xf32>
    %19 = arith.mulf %13, %18 : vector<112x32xf32>
    %c32 = arith.constant 32 : index
    %c0_17 = arith.constant 0 : index
    %20 = vector.load %arg6[%c32, %c0_17] : memref<816x32xbf16, #tpu.memory_space<vmem>>, vector<32x32xbf16>
    %21 = arith.truncf %19 : vector<112x32xf32> to vector<112x32xbf16>
    %cst_18 = arith.constant dense<0.000000e+00> : vector<112x32xf32>
    %22 = tpu.matmul %21, %20, %cst_18 {dimension_numbers = #tpu.dot_dimension_numbers<[1], [0], [0], [1], [0, 0, 1, 1], [], []>} : vector<112x32xbf16>, vector<32x32xbf16>, vector<112x32xf32> -> vector<112x32xf32>
    %c1_19 = arith.constant 1 : index
    %c0_20 = arith.constant 0 : index
    %23 = vector.load %arg8[%c1_19, %c0_20] : memref<16x32xf32, #tpu.memory_space<vmem>>, vector<1x32xf32>
    %24 = vector.broadcast %23 : vector<1x32xf32> to vector<112x32xf32>
    %25 = arith.addf %22, %24 : vector<112x32xf32>
    %26 = arith.negf %25 : vector<112x32xf32>
    %27 = math.exp %26 : vector<112x32xf32>
    %cst_21 = arith.constant 1.000000e+00 : f32
    %28 = vector.broadcast %cst_21 : f32 to vector<112x32xf32>
    %29 = arith.addf %28, %27 : vector<112x32xf32>
    %30 = arith.divf %28, %29 : vector<112x32xf32>
    %31 = arith.mulf %25, %30 : vector<112x32xf32>
    %32 = arith.truncf %31 : vector<112x32xf32> to vector<112x32xbf16>
    %cst_22 = arith.constant dense<0.000000e+00> : vector<16x32xf32>
    %33 = tpu.matmul %6, %32, %cst_22 {dimension_numbers = #tpu.dot_dimension_numbers<[1], [0], [0], [1], [0, 0, 1, 1], [], []>} : vector<16x112xbf16>, vector<112x32xbf16>, vector<16x32xf32> -> vector<16x32xf32>
    %34 = arith.mulf %33, %7 : vector<16x32xf32>
    %c800 = arith.constant 800 : index
    %c0_23 = arith.constant 0 : index
    %35 = vector.load %arg6[%c800, %c0_23] : memref<816x32xbf16, #tpu.memory_space<vmem>>, vector<8x32xbf16>
    %36 = arith.truncf %0 : vector<16x8xf32> to vector<16x8xbf16>
    %cst_24 = arith.constant dense<0.000000e+00> : vector<16x32xf32>
    %37 = tpu.matmul %36, %35, %cst_24 {dimension_numbers = #tpu.dot_dimension_numbers<[1], [0], [0], [1], [0, 0, 1, 1], [], []>} : vector<16x8xbf16>, vector<8x32xbf16>, vector<16x32xf32> -> vector<16x32xf32>
    %c3 = arith.constant 3 : index
    %c0_25 = arith.constant 0 : index
    %38 = vector.load %arg8[%c3, %c0_25] : memref<16x32xf32, #tpu.memory_space<vmem>>, vector<1x32xf32>
    %39 = vector.broadcast %38 : vector<1x32xf32> to vector<16x32xf32>
    %40 = arith.addf %37, %39 : vector<16x32xf32>
    %41 = arith.addf %40, %34 : vector<16x32xf32>
    %c0_26 = arith.constant 0 : index
    %c0_27 = arith.constant 0 : index
    %42 = vector.load %arg7[%c0_26, %c0_27] : memref<128x64xbf16, #tpu.memory_space<vmem>>, vector<32x64xbf16>
    %43 = arith.truncf %41 : vector<16x32xf32> to vector<16x32xbf16>
    %cst_28 = arith.constant dense<0.000000e+00> : vector<16x64xf32>
    %44 = tpu.matmul %43, %42, %cst_28 {dimension_numbers = #tpu.dot_dimension_numbers<[1], [0], [0], [1], [0, 0, 1, 1], [], []>} : vector<16x32xbf16>, vector<32x64xbf16>, vector<16x64xf32> -> vector<16x64xf32>
    %c0_29 = arith.constant 0 : index
    %c0_30 = arith.constant 0 : index
    %45 = vector.load %arg9[%c0_29, %c0_30] : memref<8x64xf32, #tpu.memory_space<vmem>>, vector<1x64xf32>
    %46 = vector.broadcast %45 : vector<1x64xf32> to vector<16x64xf32>
    %47 = arith.addf %44, %46 : vector<16x64xf32>
    %48 = arith.negf %47 : vector<16x64xf32>
    %49 = math.exp %48 : vector<16x64xf32>
    %cst_31 = arith.constant 1.000000e+00 : f32
    %50 = vector.broadcast %cst_31 : f32 to vector<16x64xf32>
    %51 = arith.addf %50, %49 : vector<16x64xf32>
    %52 = arith.divf %50, %51 : vector<16x64xf32>
    %53 = arith.mulf %47, %52 : vector<16x64xf32>
    %c64 = arith.constant 64 : index
    %c0_32 = arith.constant 0 : index
    %54 = vector.load %arg6[%c64, %c0_32] : memref<816x32xbf16, #tpu.memory_space<vmem>>, vector<64x32xbf16>
    %55 = arith.truncf %53 : vector<16x64xf32> to vector<16x64xbf16>
    %cst_33 = arith.constant dense<0.000000e+00> : vector<16x32xf32>
    %56 = tpu.matmul %55, %54, %cst_33 {dimension_numbers = #tpu.dot_dimension_numbers<[1], [0], [0], [1], [0, 0, 1, 1], [], []>} : vector<16x64xbf16>, vector<64x32xbf16>, vector<16x32xf32> -> vector<16x32xf32>
    %c2 = arith.constant 2 : index
    %c0_34 = arith.constant 0 : index
    %57 = vector.load %arg8[%c2, %c0_34] : memref<16x32xf32, #tpu.memory_space<vmem>>, vector<1x32xf32>
    %58 = vector.broadcast %57 : vector<1x32xf32> to vector<16x32xf32>
    %59 = arith.addf %56, %58 : vector<16x32xf32>
    %60 = arith.addf %41, %59 : vector<16x32xf32>
    %61 = arith.truncf %60 : vector<16x32xf32> to vector<16x32xbf16>
    %cst_35 = arith.constant dense<0.000000e+00> : vector<112x32xf32>
    %62 = tpu.matmul %3, %61, %cst_35 {dimension_numbers = #tpu.dot_dimension_numbers<[1], [0], [0], [1], [0, 0, 1, 1], [], []>} : vector<112x16xbf16>, vector<16x32xbf16>, vector<112x32xf32> -> vector<112x32xf32>
    %cst_36 = arith.constant dense<0.000000e+00> : vector<112x32xf32>
    %63 = tpu.matmul %5, %61, %cst_36 {dimension_numbers = #tpu.dot_dimension_numbers<[1], [0], [0], [1], [0, 0, 1, 1], [], []>} : vector<112x16xbf16>, vector<16x32xbf16>, vector<112x32xf32> -> vector<112x32xf32>
    %64 = arith.truncf %62 : vector<112x32xf32> to vector<112x32xbf16>
    %65 = arith.truncf %63 : vector<112x32xf32> to vector<112x32xbf16>
    %66 = arith.truncf %31 : vector<112x32xf32> to vector<112x32xbf16>
    %67 = tpu.concatenate %64, %65, %66 in 1 : vector<112x32xbf16>, vector<112x32xbf16>, vector<112x32xbf16> -> vector<112x96xbf16>
    %c128 = arith.constant 128 : index
    %c0_37 = arith.constant 0 : index
    %68 = vector.load %arg6[%c128, %c0_37] : memref<816x32xbf16, #tpu.memory_space<vmem>>, vector<96x32xbf16>
    %cst_38 = arith.constant dense<0.000000e+00> : vector<112x32xf32>
    %69 = tpu.matmul %67, %68, %cst_38 {dimension_numbers = #tpu.dot_dimension_numbers<[1], [0], [0], [1], [0, 0, 1, 1], [], []>} : vector<112x96xbf16>, vector<96x32xbf16>, vector<112x32xf32> -> vector<112x32xf32>
    %c4 = arith.constant 4 : index
    %c0_39 = arith.constant 0 : index
    %70 = vector.load %arg8[%c4, %c0_39] : memref<16x32xf32, #tpu.memory_space<vmem>>, vector<1x32xf32>
    %71 = vector.broadcast %70 : vector<1x32xf32> to vector<112x32xf32>
    %72 = arith.addf %69, %71 : vector<112x32xf32>
    %73 = arith.negf %72 : vector<112x32xf32>
    %74 = math.exp %73 : vector<112x32xf32>
    %cst_40 = arith.constant 1.000000e+00 : f32
    %75 = vector.broadcast %cst_40 : f32 to vector<112x32xf32>
    %76 = arith.addf %75, %74 : vector<112x32xf32>
    %77 = arith.divf %75, %76 : vector<112x32xf32>
    %78 = arith.mulf %72, %77 : vector<112x32xf32>
    %c224 = arith.constant 224 : index
    %c0_41 = arith.constant 0 : index
    %79 = vector.load %arg6[%c224, %c0_41] : memref<816x32xbf16, #tpu.memory_space<vmem>>, vector<32x32xbf16>
    %80 = arith.truncf %78 : vector<112x32xf32> to vector<112x32xbf16>
    %cst_42 = arith.constant dense<0.000000e+00> : vector<112x32xf32>
    %81 = tpu.matmul %80, %79, %cst_42 {dimension_numbers = #tpu.dot_dimension_numbers<[1], [0], [0], [1], [0, 0, 1, 1], [], []>} : vector<112x32xbf16>, vector<32x32xbf16>, vector<112x32xf32> -> vector<112x32xf32>
    %c5 = arith.constant 5 : index
    %c0_43 = arith.constant 0 : index
    %82 = vector.load %arg8[%c5, %c0_43] : memref<16x32xf32, #tpu.memory_space<vmem>>, vector<1x32xf32>
    %83 = vector.broadcast %82 : vector<1x32xf32> to vector<112x32xf32>
    %84 = arith.addf %81, %83 : vector<112x32xf32>
    %85 = arith.negf %84 : vector<112x32xf32>
    %86 = math.exp %85 : vector<112x32xf32>
    %cst_44 = arith.constant 1.000000e+00 : f32
    %87 = vector.broadcast %cst_44 : f32 to vector<112x32xf32>
    %88 = arith.addf %87, %86 : vector<112x32xf32>
    %89 = arith.divf %87, %88 : vector<112x32xf32>
    %90 = arith.mulf %84, %89 : vector<112x32xf32>
    %91 = arith.truncf %90 : vector<112x32xf32> to vector<112x32xbf16>
    %cst_45 = arith.constant dense<0.000000e+00> : vector<16x32xf32>
    %92 = tpu.matmul %6, %91, %cst_45 {dimension_numbers = #tpu.dot_dimension_numbers<[1], [0], [0], [1], [0, 0, 1, 1], [], []>} : vector<16x112xbf16>, vector<112x32xbf16>, vector<16x32xf32> -> vector<16x32xf32>
    %93 = arith.mulf %92, %7 : vector<16x32xf32>
    %94 = arith.addf %60, %93 : vector<16x32xf32>
    %c32_46 = arith.constant 32 : index
    %c0_47 = arith.constant 0 : index
    %95 = vector.load %arg7[%c32_46, %c0_47] : memref<128x64xbf16, #tpu.memory_space<vmem>>, vector<32x64xbf16>
    %96 = arith.truncf %94 : vector<16x32xf32> to vector<16x32xbf16>
    %cst_48 = arith.constant dense<0.000000e+00> : vector<16x64xf32>
    %97 = tpu.matmul %96, %95, %cst_48 {dimension_numbers = #tpu.dot_dimension_numbers<[1], [0], [0], [1], [0, 0, 1, 1], [], []>} : vector<16x32xbf16>, vector<32x64xbf16>, vector<16x64xf32> -> vector<16x64xf32>
    %c1_49 = arith.constant 1 : index
    %c0_50 = arith.constant 0 : index
    %98 = vector.load %arg9[%c1_49, %c0_50] : memref<8x64xf32, #tpu.memory_space<vmem>>, vector<1x64xf32>
    %99 = vector.broadcast %98 : vector<1x64xf32> to vector<16x64xf32>
    %100 = arith.addf %97, %99 : vector<16x64xf32>
    %101 = arith.negf %100 : vector<16x64xf32>
    %102 = math.exp %101 : vector<16x64xf32>
    %cst_51 = arith.constant 1.000000e+00 : f32
    %103 = vector.broadcast %cst_51 : f32 to vector<16x64xf32>
    %104 = arith.addf %103, %102 : vector<16x64xf32>
    %105 = arith.divf %103, %104 : vector<16x64xf32>
    %106 = arith.mulf %100, %105 : vector<16x64xf32>
    %c256 = arith.constant 256 : index
    %c0_52 = arith.constant 0 : index
    %107 = vector.load %arg6[%c256, %c0_52] : memref<816x32xbf16, #tpu.memory_space<vmem>>, vector<64x32xbf16>
    %108 = arith.truncf %106 : vector<16x64xf32> to vector<16x64xbf16>
    %cst_53 = arith.constant dense<0.000000e+00> : vector<16x32xf32>
    %109 = tpu.matmul %108, %107, %cst_53 {dimension_numbers = #tpu.dot_dimension_numbers<[1], [0], [0], [1], [0, 0, 1, 1], [], []>} : vector<16x64xbf16>, vector<64x32xbf16>, vector<16x32xf32> -> vector<16x32xf32>
    %c6 = arith.constant 6 : index
    %c0_54 = arith.constant 0 : index
    %110 = vector.load %arg8[%c6, %c0_54] : memref<16x32xf32, #tpu.memory_space<vmem>>, vector<1x32xf32>
    %111 = vector.broadcast %110 : vector<1x32xf32> to vector<16x32xf32>
    %112 = arith.addf %109, %111 : vector<16x32xf32>
    %113 = arith.addf %94, %112 : vector<16x32xf32>
    %114 = arith.truncf %113 : vector<16x32xf32> to vector<16x32xbf16>
    %cst_55 = arith.constant dense<0.000000e+00> : vector<112x32xf32>
    %115 = tpu.matmul %3, %114, %cst_55 {dimension_numbers = #tpu.dot_dimension_numbers<[1], [0], [0], [1], [0, 0, 1, 1], [], []>} : vector<112x16xbf16>, vector<16x32xbf16>, vector<112x32xf32> -> vector<112x32xf32>
    %cst_56 = arith.constant dense<0.000000e+00> : vector<112x32xf32>
    %116 = tpu.matmul %5, %114, %cst_56 {dimension_numbers = #tpu.dot_dimension_numbers<[1], [0], [0], [1], [0, 0, 1, 1], [], []>} : vector<112x16xbf16>, vector<16x32xbf16>, vector<112x32xf32> -> vector<112x32xf32>
    %117 = arith.truncf %115 : vector<112x32xf32> to vector<112x32xbf16>
    %118 = arith.truncf %116 : vector<112x32xf32> to vector<112x32xbf16>
    %119 = arith.truncf %90 : vector<112x32xf32> to vector<112x32xbf16>
    %120 = tpu.concatenate %117, %118, %119 in 1 : vector<112x32xbf16>, vector<112x32xbf16>, vector<112x32xbf16> -> vector<112x96xbf16>
    %c320 = arith.constant 320 : index
    %c0_57 = arith.constant 0 : index
    %121 = vector.load %arg6[%c320, %c0_57] : memref<816x32xbf16, #tpu.memory_space<vmem>>, vector<96x32xbf16>
    %cst_58 = arith.constant dense<0.000000e+00> : vector<112x32xf32>
    %122 = tpu.matmul %120, %121, %cst_58 {dimension_numbers = #tpu.dot_dimension_numbers<[1], [0], [0], [1], [0, 0, 1, 1], [], []>} : vector<112x96xbf16>, vector<96x32xbf16>, vector<112x32xf32> -> vector<112x32xf32>
    %c7 = arith.constant 7 : index
    %c0_59 = arith.constant 0 : index
    %123 = vector.load %arg8[%c7, %c0_59] : memref<16x32xf32, #tpu.memory_space<vmem>>, vector<1x32xf32>
    %124 = vector.broadcast %123 : vector<1x32xf32> to vector<112x32xf32>
    %125 = arith.addf %122, %124 : vector<112x32xf32>
    %126 = arith.negf %125 : vector<112x32xf32>
    %127 = math.exp %126 : vector<112x32xf32>
    %cst_60 = arith.constant 1.000000e+00 : f32
    %128 = vector.broadcast %cst_60 : f32 to vector<112x32xf32>
    %129 = arith.addf %128, %127 : vector<112x32xf32>
    %130 = arith.divf %128, %129 : vector<112x32xf32>
    %131 = arith.mulf %125, %130 : vector<112x32xf32>
    %c416 = arith.constant 416 : index
    %c0_61 = arith.constant 0 : index
    %132 = vector.load %arg6[%c416, %c0_61] : memref<816x32xbf16, #tpu.memory_space<vmem>>, vector<32x32xbf16>
    %133 = arith.truncf %131 : vector<112x32xf32> to vector<112x32xbf16>
    %cst_62 = arith.constant dense<0.000000e+00> : vector<112x32xf32>
    %134 = tpu.matmul %133, %132, %cst_62 {dimension_numbers = #tpu.dot_dimension_numbers<[1], [0], [0], [1], [0, 0, 1, 1], [], []>} : vector<112x32xbf16>, vector<32x32xbf16>, vector<112x32xf32> -> vector<112x32xf32>
    %c8 = arith.constant 8 : index
    %c0_63 = arith.constant 0 : index
    %135 = vector.load %arg8[%c8, %c0_63] : memref<16x32xf32, #tpu.memory_space<vmem>>, vector<1x32xf32>
    %136 = vector.broadcast %135 : vector<1x32xf32> to vector<112x32xf32>
    %137 = arith.addf %134, %136 : vector<112x32xf32>
    %138 = arith.negf %137 : vector<112x32xf32>
    %139 = math.exp %138 : vector<112x32xf32>
    %cst_64 = arith.constant 1.000000e+00 : f32
    %140 = vector.broadcast %cst_64 : f32 to vector<112x32xf32>
    %141 = arith.addf %140, %139 : vector<112x32xf32>
    %142 = arith.divf %140, %141 : vector<112x32xf32>
    %143 = arith.mulf %137, %142 : vector<112x32xf32>
    %144 = arith.truncf %143 : vector<112x32xf32> to vector<112x32xbf16>
    %cst_65 = arith.constant dense<0.000000e+00> : vector<16x32xf32>
    %145 = tpu.matmul %6, %144, %cst_65 {dimension_numbers = #tpu.dot_dimension_numbers<[1], [0], [0], [1], [0, 0, 1, 1], [], []>} : vector<16x112xbf16>, vector<112x32xbf16>, vector<16x32xf32> -> vector<16x32xf32>
    %146 = arith.mulf %145, %7 : vector<16x32xf32>
    %147 = arith.addf %113, %146 : vector<16x32xf32>
    %c64_66 = arith.constant 64 : index
    %c0_67 = arith.constant 0 : index
    %148 = vector.load %arg7[%c64_66, %c0_67] : memref<128x64xbf16, #tpu.memory_space<vmem>>, vector<32x64xbf16>
    %149 = arith.truncf %147 : vector<16x32xf32> to vector<16x32xbf16>
    %cst_68 = arith.constant dense<0.000000e+00> : vector<16x64xf32>
    %150 = tpu.matmul %149, %148, %cst_68 {dimension_numbers = #tpu.dot_dimension_numbers<[1], [0], [0], [1], [0, 0, 1, 1], [], []>} : vector<16x32xbf16>, vector<32x64xbf16>, vector<16x64xf32> -> vector<16x64xf32>
    %c2_69 = arith.constant 2 : index
    %c0_70 = arith.constant 0 : index
    %151 = vector.load %arg9[%c2_69, %c0_70] : memref<8x64xf32, #tpu.memory_space<vmem>>, vector<1x64xf32>
    %152 = vector.broadcast %151 : vector<1x64xf32> to vector<16x64xf32>
    %153 = arith.addf %150, %152 : vector<16x64xf32>
    %154 = arith.negf %153 : vector<16x64xf32>
    %155 = math.exp %154 : vector<16x64xf32>
    %cst_71 = arith.constant 1.000000e+00 : f32
    %156 = vector.broadcast %cst_71 : f32 to vector<16x64xf32>
    %157 = arith.addf %156, %155 : vector<16x64xf32>
    %158 = arith.divf %156, %157 : vector<16x64xf32>
    %159 = arith.mulf %153, %158 : vector<16x64xf32>
    %c448 = arith.constant 448 : index
    %c0_72 = arith.constant 0 : index
    %160 = vector.load %arg6[%c448, %c0_72] : memref<816x32xbf16, #tpu.memory_space<vmem>>, vector<64x32xbf16>
    %161 = arith.truncf %159 : vector<16x64xf32> to vector<16x64xbf16>
    %cst_73 = arith.constant dense<0.000000e+00> : vector<16x32xf32>
    %162 = tpu.matmul %161, %160, %cst_73 {dimension_numbers = #tpu.dot_dimension_numbers<[1], [0], [0], [1], [0, 0, 1, 1], [], []>} : vector<16x64xbf16>, vector<64x32xbf16>, vector<16x32xf32> -> vector<16x32xf32>
    %c9 = arith.constant 9 : index
    %c0_74 = arith.constant 0 : index
    %163 = vector.load %arg8[%c9, %c0_74] : memref<16x32xf32, #tpu.memory_space<vmem>>, vector<1x32xf32>
    %164 = vector.broadcast %163 : vector<1x32xf32> to vector<16x32xf32>
    %165 = arith.addf %162, %164 : vector<16x32xf32>
    %166 = arith.addf %147, %165 : vector<16x32xf32>
    %167 = arith.truncf %166 : vector<16x32xf32> to vector<16x32xbf16>
    %cst_75 = arith.constant dense<0.000000e+00> : vector<112x32xf32>
    %168 = tpu.matmul %3, %167, %cst_75 {dimension_numbers = #tpu.dot_dimension_numbers<[1], [0], [0], [1], [0, 0, 1, 1], [], []>} : vector<112x16xbf16>, vector<16x32xbf16>, vector<112x32xf32> -> vector<112x32xf32>
    %cst_76 = arith.constant dense<0.000000e+00> : vector<112x32xf32>
    %169 = tpu.matmul %5, %167, %cst_76 {dimension_numbers = #tpu.dot_dimension_numbers<[1], [0], [0], [1], [0, 0, 1, 1], [], []>} : vector<112x16xbf16>, vector<16x32xbf16>, vector<112x32xf32> -> vector<112x32xf32>
    %170 = arith.truncf %168 : vector<112x32xf32> to vector<112x32xbf16>
    %171 = arith.truncf %169 : vector<112x32xf32> to vector<112x32xbf16>
    %172 = arith.truncf %143 : vector<112x32xf32> to vector<112x32xbf16>
    %173 = tpu.concatenate %170, %171, %172 in 1 : vector<112x32xbf16>, vector<112x32xbf16>, vector<112x32xbf16> -> vector<112x96xbf16>
    %c512 = arith.constant 512 : index
    %c0_77 = arith.constant 0 : index
    %174 = vector.load %arg6[%c512, %c0_77] : memref<816x32xbf16, #tpu.memory_space<vmem>>, vector<96x32xbf16>
    %cst_78 = arith.constant dense<0.000000e+00> : vector<112x32xf32>
    %175 = tpu.matmul %173, %174, %cst_78 {dimension_numbers = #tpu.dot_dimension_numbers<[1], [0], [0], [1], [0, 0, 1, 1], [], []>} : vector<112x96xbf16>, vector<96x32xbf16>, vector<112x32xf32> -> vector<112x32xf32>
    %c10 = arith.constant 10 : index
    %c0_79 = arith.constant 0 : index
    %176 = vector.load %arg8[%c10, %c0_79] : memref<16x32xf32, #tpu.memory_space<vmem>>, vector<1x32xf32>
    %177 = vector.broadcast %176 : vector<1x32xf32> to vector<112x32xf32>
    %178 = arith.addf %175, %177 : vector<112x32xf32>
    %179 = arith.negf %178 : vector<112x32xf32>
    %180 = math.exp %179 : vector<112x32xf32>
    %cst_80 = arith.constant 1.000000e+00 : f32
    %181 = vector.broadcast %cst_80 : f32 to vector<112x32xf32>
    %182 = arith.addf %181, %180 : vector<112x32xf32>
    %183 = arith.divf %181, %182 : vector<112x32xf32>
    %184 = arith.mulf %178, %183 : vector<112x32xf32>
    %c608 = arith.constant 608 : index
    %c0_81 = arith.constant 0 : index
    %185 = vector.load %arg6[%c608, %c0_81] : memref<816x32xbf16, #tpu.memory_space<vmem>>, vector<32x32xbf16>
    %186 = arith.truncf %184 : vector<112x32xf32> to vector<112x32xbf16>
    %cst_82 = arith.constant dense<0.000000e+00> : vector<112x32xf32>
    %187 = tpu.matmul %186, %185, %cst_82 {dimension_numbers = #tpu.dot_dimension_numbers<[1], [0], [0], [1], [0, 0, 1, 1], [], []>} : vector<112x32xbf16>, vector<32x32xbf16>, vector<112x32xf32> -> vector<112x32xf32>
    %c11 = arith.constant 11 : index
    %c0_83 = arith.constant 0 : index
    %188 = vector.load %arg8[%c11, %c0_83] : memref<16x32xf32, #tpu.memory_space<vmem>>, vector<1x32xf32>
    %189 = vector.broadcast %188 : vector<1x32xf32> to vector<112x32xf32>
    %190 = arith.addf %187, %189 : vector<112x32xf32>
    %191 = arith.negf %190 : vector<112x32xf32>
    %192 = math.exp %191 : vector<112x32xf32>
    %cst_84 = arith.constant 1.000000e+00 : f32
    %193 = vector.broadcast %cst_84 : f32 to vector<112x32xf32>
    %194 = arith.addf %193, %192 : vector<112x32xf32>
    %195 = arith.divf %193, %194 : vector<112x32xf32>
    %196 = arith.mulf %190, %195 : vector<112x32xf32>
    %197 = arith.truncf %196 : vector<112x32xf32> to vector<112x32xbf16>
    %cst_85 = arith.constant dense<0.000000e+00> : vector<16x32xf32>
    %198 = tpu.matmul %6, %197, %cst_85 {dimension_numbers = #tpu.dot_dimension_numbers<[1], [0], [0], [1], [0, 0, 1, 1], [], []>} : vector<16x112xbf16>, vector<112x32xbf16>, vector<16x32xf32> -> vector<16x32xf32>
    %199 = arith.mulf %198, %7 : vector<16x32xf32>
    %200 = arith.addf %166, %199 : vector<16x32xf32>
    %c96 = arith.constant 96 : index
    %c0_86 = arith.constant 0 : index
    %201 = vector.load %arg7[%c96, %c0_86] : memref<128x64xbf16, #tpu.memory_space<vmem>>, vector<32x64xbf16>
    %202 = arith.truncf %200 : vector<16x32xf32> to vector<16x32xbf16>
    %cst_87 = arith.constant dense<0.000000e+00> : vector<16x64xf32>
    %203 = tpu.matmul %202, %201, %cst_87 {dimension_numbers = #tpu.dot_dimension_numbers<[1], [0], [0], [1], [0, 0, 1, 1], [], []>} : vector<16x32xbf16>, vector<32x64xbf16>, vector<16x64xf32> -> vector<16x64xf32>
    %c3_88 = arith.constant 3 : index
    %c0_89 = arith.constant 0 : index
    %204 = vector.load %arg9[%c3_88, %c0_89] : memref<8x64xf32, #tpu.memory_space<vmem>>, vector<1x64xf32>
    %205 = vector.broadcast %204 : vector<1x64xf32> to vector<16x64xf32>
    %206 = arith.addf %203, %205 : vector<16x64xf32>
    %207 = arith.negf %206 : vector<16x64xf32>
    %208 = math.exp %207 : vector<16x64xf32>
    %cst_90 = arith.constant 1.000000e+00 : f32
    %209 = vector.broadcast %cst_90 : f32 to vector<16x64xf32>
    %210 = arith.addf %209, %208 : vector<16x64xf32>
    %211 = arith.divf %209, %210 : vector<16x64xf32>
    %212 = arith.mulf %206, %211 : vector<16x64xf32>
    %c640 = arith.constant 640 : index
    %c0_91 = arith.constant 0 : index
    %213 = vector.load %arg6[%c640, %c0_91] : memref<816x32xbf16, #tpu.memory_space<vmem>>, vector<64x32xbf16>
    %214 = arith.truncf %212 : vector<16x64xf32> to vector<16x64xbf16>
    %cst_92 = arith.constant dense<0.000000e+00> : vector<16x32xf32>
    %215 = tpu.matmul %214, %213, %cst_92 {dimension_numbers = #tpu.dot_dimension_numbers<[1], [0], [0], [1], [0, 0, 1, 1], [], []>} : vector<16x64xbf16>, vector<64x32xbf16>, vector<16x32xf32> -> vector<16x32xf32>
    %c12 = arith.constant 12 : index
    %c0_93 = arith.constant 0 : index
    %216 = vector.load %arg8[%c12, %c0_93] : memref<16x32xf32, #tpu.memory_space<vmem>>, vector<1x32xf32>
    %217 = vector.broadcast %216 : vector<1x32xf32> to vector<16x32xf32>
    %218 = arith.addf %215, %217 : vector<16x32xf32>
    %219 = arith.addf %200, %218 : vector<16x32xf32>
    %c704 = arith.constant 704 : index
    %c0_94 = arith.constant 0 : index
    %220 = vector.load %arg6[%c704, %c0_94] : memref<816x32xbf16, #tpu.memory_space<vmem>>, vector<32x32xbf16>
    %221 = arith.truncf %219 : vector<16x32xf32> to vector<16x32xbf16>
    %cst_95 = arith.constant dense<0.000000e+00> : vector<16x32xf32>
    %222 = tpu.matmul %221, %220, %cst_95 {dimension_numbers = #tpu.dot_dimension_numbers<[1], [0], [0], [1], [0, 0, 1, 1], [], []>} : vector<16x32xbf16>, vector<32x32xbf16>, vector<16x32xf32> -> vector<16x32xf32>
    %c13 = arith.constant 13 : index
    %c0_96 = arith.constant 0 : index
    %223 = vector.load %arg8[%c13, %c0_96] : memref<16x32xf32, #tpu.memory_space<vmem>>, vector<1x32xf32>
    %224 = vector.broadcast %223 : vector<1x32xf32> to vector<16x32xf32>
    %225 = arith.addf %222, %224 : vector<16x32xf32>
    %226 = arith.negf %225 : vector<16x32xf32>
    %227 = math.exp %226 : vector<16x32xf32>
    %cst_97 = arith.constant 1.000000e+00 : f32
    %228 = vector.broadcast %cst_97 : f32 to vector<16x32xf32>
    %229 = arith.addf %228, %227 : vector<16x32xf32>
    %230 = arith.divf %228, %229 : vector<16x32xf32>
    %231 = arith.mulf %225, %230 : vector<16x32xf32>
    %c736 = arith.constant 736 : index
    %c0_98 = arith.constant 0 : index
    %232 = vector.load %arg6[%c736, %c0_98] : memref<816x32xbf16, #tpu.memory_space<vmem>>, vector<32x32xbf16>
    %233 = arith.truncf %231 : vector<16x32xf32> to vector<16x32xbf16>
    %cst_99 = arith.constant dense<0.000000e+00> : vector<16x32xf32>
    %234 = tpu.matmul %233, %232, %cst_99 {dimension_numbers = #tpu.dot_dimension_numbers<[1], [0], [0], [1], [0, 0, 1, 1], [], []>} : vector<16x32xbf16>, vector<32x32xbf16>, vector<16x32xf32> -> vector<16x32xf32>
    %c14 = arith.constant 14 : index
    %c0_100 = arith.constant 0 : index
    %235 = vector.load %arg8[%c14, %c0_100] : memref<16x32xf32, #tpu.memory_space<vmem>>, vector<1x32xf32>
    %236 = vector.broadcast %235 : vector<1x32xf32> to vector<16x32xf32>
    %237 = arith.addf %234, %236 : vector<16x32xf32>
    %238 = arith.negf %237 : vector<16x32xf32>
    %239 = math.exp %238 : vector<16x32xf32>
    %cst_101 = arith.constant 1.000000e+00 : f32
    %240 = vector.broadcast %cst_101 : f32 to vector<16x32xf32>
    %241 = arith.addf %240, %239 : vector<16x32xf32>
    %242 = arith.divf %240, %241 : vector<16x32xf32>
    %243 = arith.mulf %237, %242 : vector<16x32xf32>
    %c768 = arith.constant 768 : index
    %c0_102 = arith.constant 0 : index
    %244 = vector.load %arg6[%c768, %c0_102] : memref<816x32xbf16, #tpu.memory_space<vmem>>, vector<32x32xbf16>
    %245 = arith.truncf %243 : vector<16x32xf32> to vector<16x32xbf16>
    %cst_103 = arith.constant dense<0.000000e+00> : vector<16x32xf32>
    %246 = tpu.matmul %245, %244, %cst_103 {dimension_numbers = #tpu.dot_dimension_numbers<[1], [0], [0], [1], [0, 0, 1, 1], [], []>} : vector<16x32xbf16>, vector<32x32xbf16>, vector<16x32xf32> -> vector<16x32xf32>
    %c15 = arith.constant 15 : index
    %c0_104 = arith.constant 0 : index
    %247 = vector.load %arg8[%c15, %c0_104] : memref<16x32xf32, #tpu.memory_space<vmem>>, vector<1x32xf32>
    %248 = vector.broadcast %247 : vector<1x32xf32> to vector<16x32xf32>
    %249 = arith.addf %246, %248 : vector<16x32xf32>
    %250 = vector.extract_strided_slice %249 {offsets = [0, 0], sizes = [16, 4], strides = [1, 1]} : vector<16x32xf32> to vector<16x4xf32>
    %c0_105 = arith.constant 0 : index
    %c0_106 = arith.constant 0 : index
    %251 = vector.load %arg10[%c0_105, %c0_106] : memref<16x4xf32, #tpu.memory_space<vmem>>, vector<16x4xf32>
    tpu.vector_store %arg10[%c0_105, %c0_106], %250 {strides = array<i32>} : memref<16x4xf32, #tpu.memory_space<vmem>>, vector<16x4xf32>,
    return
  }
  func.func @transform_0(%arg0: i32) -> (i32, i32) {
    %c0_i32 = arith.constant 0 : i32
    %c0_i32_0 = arith.constant 0 : i32
    %c0_i32_1 = arith.constant 0 : i32
    return %c0_i32, %c0_i32_0 : i32, i32
  }
  func.func @transform_1(%arg0: i32) -> (i32, i32) {
    %c0_i32 = arith.constant 0 : i32
    %c0_i32_0 = arith.constant 0 : i32
    %c0_i32_1 = arith.constant 0 : i32
    return %c0_i32, %c0_i32_0 : i32, i32
  }
  func.func @transform_2(%arg0: i32) -> (i32, i32, i32) {
    %c0_i32 = arith.constant 0 : i32
    %c0_i32_0 = arith.constant 0 : i32
    %c0_i32_1 = arith.constant 0 : i32
    %c0_i32_2 = arith.constant 0 : i32
    return %c0_i32, %c0_i32_0, %c0_i32_1 : i32, i32, i32
  }
  func.func @transform_3(%arg0: i32) -> (i32, i32) {
    %c0_i32 = arith.constant 0 : i32
    %c0_i32_0 = arith.constant 0 : i32
    %c0_i32_1 = arith.constant 0 : i32
    return %c0_i32, %c0_i32_0 : i32, i32
  }
  func.func @transform_4(%arg0: i32) -> (i32, i32) {
    %c0_i32 = arith.constant 0 : i32
    %c0_i32_0 = arith.constant 0 : i32
    %c0_i32_1 = arith.constant 0 : i32
    return %c0_i32, %c0_i32_0 : i32, i32
  }
  func.func @transform_5(%arg0: i32) -> (i32, i32) {
    %c0_i32 = arith.constant 0 : i32
    %c0_i32_0 = arith.constant 0 : i32
    %c0_i32_1 = arith.constant 0 : i32
    return %c0_i32, %c0_i32_0 : i32, i32
  }
  func.func @transform_6(%arg0: i32) -> (i32, i32) {
    %c0_i32 = arith.constant 0 : i32
    %c0_i32_0 = arith.constant 0 : i32
    %c0_i32_1 = arith.constant 0 : i32
    return %c0_i32, %c0_i32_0 : i32, i32
  }
  func.func @transform_7(%arg0: i32) -> (i32, i32) {
    %c0_i32 = arith.constant 0 : i32
    %c0_i32_0 = arith.constant 0 : i32
    %c0_i32_1 = arith.constant 0 : i32
    return %c0_i32, %c0_i32_0 : i32, i32
  }
  func.func @transform_8(%arg0: i32) -> (i32, i32) {
    %c0_i32 = arith.constant 0 : i32
    %c0_i32_0 = arith.constant 0 : i32
    %c0_i32_1 = arith.constant 0 : i32
    return %c0_i32, %c0_i32_0 : i32, i32
  }
  func.func @transform_9(%arg0: i32) -> (i32, i32) {
    %c0_i32 = arith.constant 0 : i32
    %c0_i32_0 = arith.constant 0 : i32
    %c0_i32_1 = arith.constant 0 : i32
    return %c0_i32, %c0_i32_0 : i32, i32
  }
}

</mosaic_0001>

<bundles_post_ra>
// kernel: gnn_forward_fold.1
= control target key start
LH: loop header
LB: loop body
LE: loop exit
PB: predicated region body
PF: predicated region fallthrough
CT: control target
= control target key end

     0   :  { %v5916_v0 = vmov 0.0   ;;  %vm5917_vm0 = vmmov 0   ;;  %vm110_vm1 = vcmask 261120   ;;  %vm625_vm2 = vcmask 1043456   ;;  %s5918_s28 = smov 32   ;;  %s5919_s29 = smov 64   ;;  %s7528_s5 = inlined_call_operand.vmem [shape: bf16[816,32], index: 5, kind: input, shape index: {}]   ;;  %s7529_s1 = inlined_call_operand.vmem [shape: f32[112,32], index: 1, kind: input, shape index: {}]   ;;  %s7530_s7 = inlined_call_operand.vmem [shape: f32[16,32], index: 7, kind: input, shape index: {}]   ;;  %s7531_s0 = inlined_call_operand.vmem [shape: f32[16,8], index: 0, kind: input, shape index: {}]   ;;  %s7532_s3 = inlined_call_operand.vmem [shape: bf16[16,112], index: 3, kind: input, shape index: {}]   ;;  %s7533_s6 = inlined_call_operand.vmem [shape: bf16[128,64], index: 6, kind: input, shape index: {}]   ;;  %s7534_s4 = inlined_call_operand.vmem [shape: f32[16,32], index: 4, kind: input, shape index: {}]   ;;  %s7535_s8 = inlined_call_operand.vmem [shape: f32[8,64], index: 8, kind: input, shape index: {}]   ;;  %s7536_s2 = inlined_call_operand.vmem [shape: bf16[2,112,16], index: 2, kind: input, shape index: {}]   ;;  %s7537_s9 = inlined_call_operand.vmem [shape: f32[16,4], index: 9, kind: output, shape index: {}]  }
   0x1   :  { %4664 = vmatprep.subr.bf16.mxu0 %v5916_v0  ;;  %v5310_v1 = vld [vmem:[%s7528_s5] sm:$0xff]   ;;  %4668 = vmatprep.mubr.msk.bf16.mxu0 %vm5917_vm0, %v5916_v0  ;;  %v5311_v2 = vld [vmem:[%s7528_s5 + $0x8] sm:$0xff]   ;;  %v37_v6 = vld [vmem:[%s7529_s1 + $0x10] sm:$0xff]  ;;  %vm621_vm3 = vcmask 64512   ;;  %vm567_vm4 = vcmask 916480   ;;  %vm790_vm5 = vcmask 523264  }
   0x2   :  { %4696 = vmatprep.subr.bf16.mxu1 %v5916_v0  ;;  %4700 = vmatprep.mubr.msk.bf16.mxu1 %vm5917_vm0, %v5916_v0  ;;  %v35_v3 = vld [vmem:[%s7529_s1] sm:$0xff]  ;;  %v36_v4 = vld [vmem:[%s7529_s1 + $0x8] sm:$0xff]  ;;  %v38_v7 = vld [vmem:[%s7529_s1 + $0x18] sm:$0xff]  ;;  %vm873_vm6 = vcmask 130048   ;;  %vm1273_vm7 = vcmask 785408   ;;  %vm4105_vm8 = vcmask 31744  }
   0x3   :  { %4665 = vmatpush3.bf16.msra.mxu0 %v5310_v1  ;;  %v86_v5 = vpack.c.bf16 %v36_v4, %v35_v3  ;;  %v87_v8 = vpack.c.bf16 %v38_v7, %v37_v6  ;;  %v39_v9 = vld [vmem:[%s7529_s1 + $0x20] sm:$0xff]  ;;  %v40_v10 = vld [vmem:[%s7529_s1 + $0x28] sm:$0xff]  ;;  %v41_v12 = vld [vmem:[%s7529_s1 + $0x30] sm:$0xff] }
   0x4   :  { %4666 = vmatprep.subr.bf16.mxu0 %v5916_v0  ;;  %v88_v11 = vpack.c.bf16 %v40_v10, %v39_v9  ;;  %v42_v13 = vld [vmem:[%s7529_s1 + $0x38] sm:$0xff]  ;;  %v43_v15 = vld [vmem:[%s7529_s1 + $0x40] sm:$0xff]  ;;  %v44_v16 = vld [vmem:[%s7529_s1 + $0x48] sm:$0xff] }
   0x5   :  { %v89_v14 = vpack.c.bf16 %v42_v13, %v41_v12  ;;  %v90_v17 = vpack.c.bf16 %v44_v16, %v43_v15  ;;  %v45_v18 = vld [vmem:[%s7529_s1 + $0x50] sm:$0xff]  ;;  %v46_v19 = vld [vmem:[%s7529_s1 + $0x58] sm:$0xff]  ;;  %v47_v21 = vld [vmem:[%s7529_s1 + $0x60] sm:$0xff] }
   0x6   :  { %v91_v20 = vpack.c.bf16 %v46_v19, %v45_v18  ;;  %v48_v22 = vld [vmem:[%s7529_s1 + $0x68] sm:$0xff]  ;;  %v5312_v24 = vld [vmem:[%s7528_s5 + $0x10] sm:$0xff]   ;;  %v5313_v25 = vld [vmem:[%s7528_s5 + $0x18] sm:$0xff]  }
   0x7   :  { %4667 = vmatpush3.bf16.msra.mxu0 %v5311_v2  ;;  %v92_v23 = vpack.c.bf16 %v48_v22, %v47_v21  ;;  %4697 = vmatpush3.bf16.msra.mxu1 %v5312_v24  ;;  %v6058_v26 = vld [vmem:[%s7530_s7] ss:$0 sm:$0xff] }
   0x8   :  { %4728 = vmatprep.subr.bf16.mxu0 %v5916_v0  ;;  %4698 = vmatprep.subr.bf16.mxu1 %v5916_v0 }
   0xa   :  { %4669 = vmatmul.mubr.msk.bf16.vlgmr.msra.gmra.mrb[0].mxu0 %vm110_vm1, %v86_v5 }
   0xb   :  { %4672 = vmatprep.mubr.msk.bf16.mxu0 %vm5917_vm0, %v5916_v0  ;;  %4699 = vmatpush3.bf16.msra.mxu1 %v5313_v25 }
   0xc   :  { %4746 = vmatprep.subr.bf16.mxu1 %v5916_v0 }
  0x12   :  { %4673 = vmatmul.mubr.msk.bf16.gmra.mrb[4].mxu0 %vm110_vm1, %v87_v8 }
  0x13   :  { %4676 = vmatprep.mubr.msk.bf16.mxu0 %vm5917_vm0, %v5916_v0 }
  0x1a   :  { %4677 = vmatmul.mubr.msk.bf16.gmra.mrb[8].mxu0 %vm110_vm1, %v88_v11 }
  0x1b   :  { %4680 = vmatprep.mubr.msk.bf16.mxu0 %vm5917_vm0, %v5916_v0 }
  0x22   :  { %4681 = vmatmul.mubr.msk.bf16.gmra.mrb[12].mxu0 %vm110_vm1, %v89_v14 }
  0x23   :  { %4684 = vmatprep.mubr.msk.bf16.mxu0 %vm5917_vm0, %v5916_v0 }
  0x2a   :  { %4685 = vmatmul.mubr.msk.bf16.gmra.mrb[16].mxu0 %vm110_vm1, %v90_v17 }
  0x2b   :  { %4688 = vmatprep.mubr.msk.bf16.mxu0 %vm5917_vm0, %v5916_v0 }
  0x32   :  { %4689 = vmatmul.mubr.msk.bf16.gmra.mrb[20].mxu0 %vm110_vm1, %v91_v20 }
  0x33   :  { %4692 = vmatprep.mubr.msk.bf16.mxu0 %vm5917_vm0, %v5916_v0 }
  0x3a   :  { %4693 = vmatmul.mubr.msk.bf16.gmra.mrb[24].mxu0 %vm110_vm1, %v92_v23 }
  0x3b   :  { %4742 = vmatprep.mubr.msk.bf16.mxu0 %vm5917_vm0, %v5916_v0 }
  0xdd   :  { %v166_v27 = vpop.f32.mrb[0].mxu0 }
  0xde   :  { %v167_v28 = vadd.f32 %v6058_v26, %v166_v27  ;;  %v4670_v29 = vpop.f32.mrb[1].mxu0 }
  0xdf   :  { %v169_v30 = vpop.f32.mrb[2].mxu0 }
  0xe0   :  { %v4136_v31 = vmul.f32 -1.442695, %v167_v28  ;;  %v170_v32 = vadd.f32 %v6058_v26, %v169_v30  ;;  %v4671_v33 = vpop.f32.mrb[3].mxu0 }
  0xe2   :  { %5383 = vpow2.f32 %v4136_v31  ;;  %v4137_v34 = vmul.f32 -1.442695, %v170_v32 }
  0xe4   :  { %5385 = vpow2.f32 %v4137_v34 }
  0xe5   :  { %v174_v35 = vpop.f32.mrb[4].mxu0 }
  0xe6   :  { %v6063_v36 = vadd.f32 %v6058_v26, %v174_v35  ;;  %v4674_v37 = vpop.f32.mrb[5].mxu0 }
  0xe7   :  { %v177_v38 = vpop.f32.mrb[6].mxu0 }
  0xe8   :  { %v4138_v39 = vmul.f32 -1.442695, %v6063_v36  ;;  %v6067_v40 = vadd.f32 %v6058_v26, %v177_v38  ;;  %v4675_v41 = vpop.f32.mrb[7].mxu0 }
  0xea   :  { %5387 = vpow2.f32 %v4138_v39  ;;  %v4139_v42 = vmul.f32 -1.442695, %v6067_v40 }
  0xec   :  { %v5384_v43 = vpop.eup %5383  ;;  %5389 = vpow2.f32 %v4139_v42 }
  0xed   :  { %v263_v44 = vadd.f32 1.0, %v5384_v43  ;;  %v182_v45 = vpop.f32.mrb[8].mxu0 }
  0xee   :  { %v5386_v46 = vpop.eup %5385  ;;  %v6071_v47 = vadd.f32 %v6058_v26, %v182_v45  ;;  %v4678_v48 = vpop.f32.mrb[9].mxu0 }
  0xef   :  { %5391 = vrcp.f32 %v263_v44  ;;  %v264_v49 = vadd.f32 1.0, %v5386_v46  ;;  %v185_v50 = vpop.f32.mrb[10].mxu0 }
  0xf0   :  { %v4140_v51 = vmul.f32 -1.442695, %v6071_v47  ;;  %v6075_v52 = vadd.f32 %v6058_v26, %v185_v50  ;;  %v4679_v53 = vpop.f32.mrb[11].mxu0 }
  0xf1   :  { %5393 = vrcp.f32 %v264_v49 }
  0xf2   :  { %5395 = vpow2.f32 %v4140_v51  ;;  %v4141_v54 = vmul.f32 -1.442695, %v6075_v52 }
  0xf4   :  { %v5388_v55 = vpop.eup %5387  ;;  %5397 = vpow2.f32 %v4141_v54 }
  0xf5   :  { %v265_v56 = vadd.f32 1.0, %v5388_v55  ;;  %v190_v57 = vpop.f32.mrb[12].mxu0 }
  0xf6   :  { %v5390_v58 = vpop.eup %5389  ;;  %v6079_v59 = vadd.f32 %v6058_v26, %v190_v57  ;;  %v4682_v60 = vpop.f32.mrb[13].mxu0 }
  0xf7   :  { %5399 = vrcp.f32 %v265_v56  ;;  %v266_v61 = vadd.f32 1.0, %v5390_v58  ;;  %v193_v62 = vpop.f32.mrb[14].mxu0 }
  0xf8   :  { %v4142_v63 = vmul.f32 -1.442695, %v6079_v59  ;;  %v6083_v1 = vadd.f32 %v6058_v26, %v193_v62  ;;  %v4683_v2 = vpop.f32.mrb[15].mxu0 }
  0xf9   :  { %v5392_v3 = vpop.eup %5391  ;;  %5401 = vrcp.f32 %v266_v61 }
  0xfa   :  { %5403 = vpow2.f32 %v4142_v63  ;;  %v4143_v4 = vmul.f32 -1.442695, %v6083_v1  ;;  %v305_v7 = vmul.f32 %v5392_v3, %v167_v28 }
  0xfb   :  { %v5394_v5 = vpop.eup %5393 }
  0xfc   :  { %v5396_v6 = vpop.eup %5395  ;;  %v306_v8 = vmul.f32 %v5394_v5, %v170_v32  ;;  %5405 = vpow2.f32 %v4143_v4 }
  0xfd   :  { %v267_v9 = vadd.f32 1.0, %v5396_v6  ;;  %v198_v10 = vpop.f32.mrb[16].mxu0 }
  0xfe   :  { %v5398_v11 = vpop.eup %5397  ;;  %v323_v12 = vpack.c.bf16 %v306_v8, %v305_v7  ;;  %v6087_v13 = vadd.f32 %v6058_v26, %v198_v10  ;;  %v4686_v14 = vpop.f32.mrb[17].mxu0 }
  0xff   :  { %5407 = vrcp.f32 %v267_v9  ;;  %v268_v15 = vadd.f32 1.0, %v5398_v11  ;;  %v201_v16 = vpop.f32.mrb[18].mxu0 }
 0x100   :  { %v4144_v17 = vmul.f32 -1.442695, %v6087_v13  ;;  %v6091_v18 = vadd.f32 %v6058_v26, %v201_v16  ;;  %v4687_v19 = vpop.f32.mrb[19].mxu0  ;;  %4701 = vmatmul.mubr.msk.bf16.vlgmr.msra.gmra.mrb[0].mxu1 %vm110_vm1, %v323_v12 }
 0x101   :  { %v5400_v20 = vpop.eup %5399  ;;  %5409 = vrcp.f32 %v268_v15  ;;  %4704 = vmatprep.mubr.msk.bf16.mxu1 %vm5917_vm0, %v5916_v0 }
 0x102   :  { %5411 = vpow2.f32 %v4144_v17  ;;  %v4145_v21 = vmul.f32 -1.442695, %v6091_v18  ;;  %v307_v24 = vmul.f32 %v5400_v20, %v6063_v36  ;;  %v614_v20 = vld [vmem:[%s7528_s5 + $0x190] sm:$0xf] }
 0x103   :  { %v5402_v22 = vpop.eup %5401 }
 0x104   :  { %v5404_v23 = vpop.eup %5403  ;;  %v308_v25 = vmul.f32 %v5402_v22, %v6067_v40  ;;  %5413 = vpow2.f32 %v4145_v21  ;;  %v627_v21 = vsel %vm625_vm2, %v614_v20, 0  ;;  %v33_v22 = vld [vmem:[%s7531_s0] sm:$0xff] }
 0x105   :  { %v269_v27 = vadd.f32 1.0, %v5404_v23  ;;  %v206_v28 = vpop.f32.mrb[20].mxu0  ;;  %4747 = vmatpush3.bf16.msra.mxu1 %v627_v21  ;;  %v34_v23 = vld [vmem:[%s7531_s0 + $0x8] sm:$0xff] }
 0x106   :  { %v5406_v29 = vpop.eup %5405  ;;  %v324_v30 = vpack.c.bf16 %v308_v25, %v307_v24  ;;  %v6100_v31 = vadd.f32 %v6058_v26, %v206_v28  ;;  %v4690_v32 = vpop.f32.mrb[21].mxu0  ;;  %4760 = vmatprep.subr.bf16.mxu1 %v5916_v0  ;;  %v615_v24 = vpack.c.bf16 %v34_v23, %v33_v22  ;;  %v6146_v25 = vld [vmem:[%s7530_s7 + $0x1] ss:$0 sm:$0xff] }
 0x107   :  { %5415 = vrcp.f32 %v269_v27  ;;  %v270_v33 = vadd.f32 1.0, %v5406_v29  ;;  %v209_v34 = vpop.f32.mrb[22].mxu0 }
 0x108   :  { %v4146_v35 = vmul.f32 -1.442695, %v6100_v31  ;;  %v210_v37 = vadd.f32 %v6058_v26, %v209_v34  ;;  %v4691_v38 = vpop.f32.mrb[23].mxu0  ;;  %4705 = vmatmul.mubr.msk.bf16.gmra.mrb[4].mxu1 %vm110_vm1, %v324_v30 }
 0x109   :  { %v5408_v36 = vpop.eup %5407  ;;  %5417 = vrcp.f32 %v270_v33  ;;  %4708 = vmatprep.mubr.msk.bf16.mxu1 %vm5917_vm0, %v5916_v0 }
 0x10a   :  { %5419 = vpow2.f32 %v4146_v35  ;;  %v4147_v39 = vmul.f32 -1.442695, %v210_v37  ;;  %v309_v42 = vmul.f32 %v5408_v36, %v6071_v47 }
 0x10b   :  { %v5410_v40 = vpop.eup %5409 }
 0x10c   :  { %v5412_v41 = vpop.eup %5411  ;;  %v310_v43 = vmul.f32 %v5410_v40, %v6075_v52  ;;  %5421 = vpow2.f32 %v4147_v39 }
 0x10d   :  { %v271_v44 = vadd.f32 1.0, %v5412_v41  ;;  %v214_v45 = vpop.f32.mrb[24].mxu0 }
 0x10e   :  { %v5414_v46 = vpop.eup %5413  ;;  %v325_v48 = vpack.c.bf16 %v310_v43, %v309_v42  ;;  %v215_v49 = vadd.f32 %v6058_v26, %v214_v45  ;;  %v4694_v50 = vpop.f32.mrb[25].mxu0 }
 0x10f   :  { %5423 = vrcp.f32 %v271_v44  ;;  %v272_v51 = vadd.f32 1.0, %v5414_v46  ;;  %v217_v53 = vpop.f32.mrb[26].mxu0 }
 0x110   :  { %v4148_v54 = vmul.f32 -1.442695, %v215_v49  ;;  %v218_v55 = vadd.f32 %v6058_v26, %v217_v53  ;;  %v4695_v56 = vpop.f32.mrb[27].mxu0  ;;  %4709 = vmatmul.mubr.msk.bf16.gmra.mrb[8].mxu1 %vm110_vm1, %v325_v48 }
 0x111   :  { %v5416_v47 = vpop.eup %5415  ;;  %5425 = vrcp.f32 %v272_v51  ;;  %4712 = vmatprep.mubr.msk.bf16.mxu1 %vm5917_vm0, %v5916_v0 }
 0x112   :  { %5427 = vpow2.f32 %v4148_v54  ;;  %v4149_v52 = vmul.f32 -1.442695, %v218_v55  ;;  %v311_v60 = vmul.f32 %v5416_v47, %v6079_v59 }
 0x113   :  { %v5418_v57 = vpop.eup %5417 }
 0x114   :  { %v5420_v58 = vpop.eup %5419  ;;  %v312_v61 = vmul.f32 %v5418_v57, %v6083_v1  ;;  %5429 = vpow2.f32 %v4149_v52 }
 0x115   :  { %v273_v62 = vadd.f32 1.0, %v5420_v58 }
 0x116   :  { %v5422_v63 = vpop.eup %5421  ;;  %v326_v26 = vpack.c.bf16 %v312_v61, %v311_v60 }
 0x117   :  { %5431 = vrcp.f32 %v273_v62  ;;  %v274_v2 = vadd.f32 1.0, %v5422_v63 }
 0x118   :  { %4713 = vmatmul.mubr.msk.bf16.gmra.mrb[12].mxu1 %vm110_vm1, %v326_v26 }
 0x119   :  { %v5424_v3 = vpop.eup %5423  ;;  %5433 = vrcp.f32 %v274_v2  ;;  %4716 = vmatprep.mubr.msk.bf16.mxu1 %vm5917_vm0, %v5916_v0 }
 0x11a   :  { %v313_v6 = vmul.f32 %v5424_v3, %v6087_v13 }
 0x11b   :  { %v5426_v4 = vpop.eup %5425 }
 0x11c   :  { %v5428_v5 = vpop.eup %5427  ;;  %v314_v59 = vmul.f32 %v5426_v4, %v6091_v18 }
 0x11d   :  { %v275_v1 = vadd.f32 1.0, %v5428_v5 }
 0x11e   :  { %v5430_v7 = vpop.eup %5429  ;;  %v327_v8 = vpack.c.bf16 %v314_v59, %v313_v6 }
 0x11f   :  { %5435 = vrcp.f32 %v275_v1  ;;  %v276_v9 = vadd.f32 1.0, %v5430_v7 }
 0x120   :  { %4717 = vmatmul.mubr.msk.bf16.gmra.mrb[16].mxu1 %vm110_vm1, %v327_v8 }
 0x121   :  { %v5432_v10 = vpop.eup %5431  ;;  %5437 = vrcp.f32 %v276_v9  ;;  %4720 = vmatprep.mubr.msk.bf16.mxu1 %vm5917_vm0, %v5916_v0 }
 0x122   :  { %v315_v12 = vmul.f32 %v5432_v10, %v6100_v31 }
 0x123   :  { %v5434_v11 = vpop.eup %5433 }
 0x124   :  { %v316_v14 = vmul.f32 %v5434_v11, %v210_v37 }
 0x126   :  { %v328_v15 = vpack.c.bf16 %v316_v14, %v315_v12 }
 0x128   :  { %4721 = vmatmul.mubr.msk.bf16.gmra.mrb[20].mxu1 %vm110_vm1, %v328_v15 }
 0x129   :  { %v5436_v13 = vpop.eup %5435  ;;  %4724 = vmatprep.mubr.msk.bf16.mxu1 %vm5917_vm0, %v5916_v0 }
 0x12a   :  { %v317_v17 = vmul.f32 %v5436_v13, %v215_v49 }
 0x12b   :  { %v5438_v16 = vpop.eup %5437 }
 0x12c   :  { %v318_v18 = vmul.f32 %v5438_v16, %v218_v55 }
 0x12e   :  { %v329_v19 = vpack.c.bf16 %v318_v18, %v317_v17 }
 0x130   :  { %4725 = vmatmul.mubr.msk.bf16.gmra.mrb[24].mxu1 %vm110_vm1, %v329_v19 }
 0x131   :  { %4748 = vmatprep.mubr.msk.bf16.mxu1 %vm5917_vm0, %v5916_v0 }
 0x138   :  { %4749 = vmatmul.mubr.msk.bf16.vlgmr.msra.gmra.mrb[28].mxu1 %vm621_vm3, %v615_v24 }
 0x139   :  { %4768 = vmatprep.mubr.msk.bf16.mxu1 %vm5917_vm0, %v5916_v0 }
 0x1d3   :  { %v402_v27 = vpop.f32.mrb[0].mxu1 }
 0x1d4   :  { %v403_v28 = vadd.f32 %v6146_v25, %v402_v27  ;;  %v4702_v29 = vpop.f32.mrb[1].mxu1 }
 0x1d5   :  { %v405_v30 = vpop.f32.mrb[2].mxu1 }
 0x1d6   :  { %v4160_v31 = vmul.f32 -1.442695, %v403_v28  ;;  %v406_v32 = vadd.f32 %v6146_v25, %v405_v30  ;;  %v4703_v33 = vpop.f32.mrb[3].mxu1 }
 0x1d8   :  { %5439 = vpow2.f32 %v4160_v31  ;;  %v4161_v34 = vmul.f32 -1.442695, %v406_v32 }
 0x1da   :  { %5441 = vpow2.f32 %v4161_v34 }
 0x1db   :  { %v410_v35 = vpop.f32.mrb[4].mxu1 }
 0x1dc   :  { %v6151_v37 = vadd.f32 %v6146_v25, %v410_v35  ;;  %v4706_v38 = vpop.f32.mrb[5].mxu1 }
 0x1dd   :  { %v413_v36 = vpop.f32.mrb[6].mxu1 }
 0x1de   :  { %v4162_v39 = vmul.f32 -1.442695, %v6151_v37  ;;  %v6155_v40 = vadd.f32 %v6146_v25, %v413_v36  ;;  %v4707_v41 = vpop.f32.mrb[7].mxu1 }
 0x1e0   :  { %5443 = vpow2.f32 %v4162_v39  ;;  %v4163_v42 = vmul.f32 -1.442695, %v6155_v40 }
 0x1e2   :  { %v5440_v43 = vpop.eup %5439  ;;  %5445 = vpow2.f32 %v4163_v42 }
 0x1e3   :  { %v499_v44 = vadd.f32 1.0, %v5440_v43  ;;  %v418_v45 = vpop.f32.mrb[8].mxu1 }
 0x1e4   :  { %v5442_v46 = vpop.eup %5441  ;;  %v6159_v48 = vadd.f32 %v6146_v25, %v418_v45  ;;  %v4710_v49 = vpop.f32.mrb[9].mxu1 }
 0x1e5   :  { %5447 = vrcp.f32 %v499_v44  ;;  %v500_v50 = vadd.f32 1.0, %v5442_v46  ;;  %v421_v51 = vpop.f32.mrb[10].mxu1 }
 0x1e6   :  { %v4164_v53 = vmul.f32 -1.442695, %v6159_v48  ;;  %v6163_v54 = vadd.f32 %v6146_v25, %v421_v51  ;;  %v4711_v55 = vpop.f32.mrb[11].mxu1 }
 0x1e7   :  { %5449 = vrcp.f32 %v500_v50 }
 0x1e8   :  { %5451 = vpow2.f32 %v4164_v53  ;;  %v4165_v56 = vmul.f32 -1.442695, %v6163_v54 }
 0x1ea   :  { %v5444_v47 = vpop.eup %5443  ;;  %5453 = vpow2.f32 %v4165_v56 }
 0x1eb   :  { %v501_v52 = vadd.f32 1.0, %v5444_v47  ;;  %v426_v57 = vpop.f32.mrb[12].mxu1 }
 0x1ec   :  { %v5446_v58 = vpop.eup %5445  ;;  %v6167_v60 = vadd.f32 %v6146_v25, %v426_v57  ;;  %v4714_v61 = vpop.f32.mrb[13].mxu1 }
 0x1ed   :  { %5455 = vrcp.f32 %v501_v52  ;;  %v502_v62 = vadd.f32 1.0, %v5446_v58  ;;  %v429_v63 = vpop.f32.mrb[14].mxu1 }
 0x1ee   :  { %v4166_v26 = vmul.f32 -1.442695, %v6167_v60  ;;  %v6171_v2 = vadd.f32 %v6146_v25, %v429_v63  ;;  %v4715_v3 = vpop.f32.mrb[15].mxu1 }
 0x1ef   :  { %v5448_v4 = vpop.eup %5447  ;;  %5457 = vrcp.f32 %v502_v62 }
 0x1f0   :  { %5459 = vpow2.f32 %v4166_v26  ;;  %v4167_v5 = vmul.f32 -1.442695, %v6171_v2  ;;  %v541_v1 = vmul.f32 %v5448_v4, %v403_v28 }
 0x1f1   :  { %v5450_v6 = vpop.eup %5449 }
 0x1f2   :  { %v5452_v59 = vpop.eup %5451  ;;  %v542_v7 = vmul.f32 %v5450_v6, %v406_v32  ;;  %5461 = vpow2.f32 %v4167_v5 }
 0x1f3   :  { %v503_v8 = vadd.f32 1.0, %v5452_v59  ;;  %v434_v9 = vpop.f32.mrb[16].mxu1 }
 0x1f4   :  { %v5454_v10 = vpop.eup %5453  ;;  %v6174_v11 = vpack.c.bf16 %v542_v7, %v541_v1  ;;  %v6177_v12 = vadd.f32 %v6146_v25, %v434_v9  ;;  %v4718_v14 = vpop.f32.mrb[17].mxu1 }
 0x1f5   :  { %5463 = vrcp.f32 %v503_v8  ;;  %v504_v15 = vadd.f32 1.0, %v5454_v10  ;;  %v437_v13 = vpop.f32.mrb[18].mxu1 }
 0x1f6   :  { %v4168_v16 = vmul.f32 -1.442695, %v6177_v12  ;;  %v6181_v17 = vadd.f32 %v6146_v25, %v437_v13  ;;  %v4719_v18 = vpop.f32.mrb[19].mxu1  ;;  %4729 = vmatpush3.bf16.msra.mxu0 %v6174_v11 }
 0x1f7   :  { %v5456_v19 = vpop.eup %5455  ;;  %5465 = vrcp.f32 %v504_v15  ;;  %4730 = vmatprep.subr.bf16.mxu0 %v5916_v0 }
 0x1f8   :  { %5467 = vpow2.f32 %v4168_v16  ;;  %v4169_v20 = vmul.f32 -1.442695, %v6181_v17  ;;  %v543_v23 = vmul.f32 %v5456_v19, %v6151_v37 }
 0x1f9   :  { %v5458_v21 = vpop.eup %5457 }
 0x1fa   :  { %v5460_v22 = vpop.eup %5459  ;;  %v544_v24 = vmul.f32 %v5458_v21, %v6155_v40  ;;  %5469 = vpow2.f32 %v4169_v20  ;;  %v5314_v20 = vld [vmem:[%s7532_s3] sm:$0xff]  }
 0x1fb   :  { %v505_v27 = vadd.f32 1.0, %v5460_v22  ;;  %v442_v28 = vpop.f32.mrb[20].mxu1 }
 0x1fc   :  { %v5462_v29 = vpop.eup %5461  ;;  %v6188_v30 = vpack.c.bf16 %v544_v24, %v543_v23  ;;  %v6191_v31 = vadd.f32 %v6146_v25, %v442_v28  ;;  %v4722_v32 = vpop.f32.mrb[21].mxu1  ;;  %v5316_v28 = vld [vmem:[%s7533_s6 + $0x8] sm:$0xff]  }
 0x1fd   :  { %5471 = vrcp.f32 %v505_v27  ;;  %v506_v33 = vadd.f32 1.0, %v5462_v29  ;;  %v445_v34 = vpop.f32.mrb[22].mxu1  ;;  %v5315_v27 = vld [vmem:[%s7533_s6] sm:$0xff]  }
 0x1fe   :  { %v4170_v35 = vmul.f32 -1.442695, %v6191_v31  ;;  %v446_v38 = vadd.f32 %v6146_v25, %v445_v34  ;;  %v4723_v37 = vpop.f32.mrb[23].mxu1  ;;  %4731 = vmatpush3.bf16.msra.mxu0 %v6188_v30  ;;  %v4176_v29 = vld [vmem:[%s7530_s7 + $0x3] ss:$0 sm:$0xff]  ;;  %v81_v34 = vld [vmem:[%s7534_s4 + $0x8] sm:$0xff] }
 0x1ff   :  { %v5464_v36 = vpop.eup %5463  ;;  %5473 = vrcp.f32 %v506_v33  ;;  %4732 = vmatprep.subr.bf16.mxu0 %v5916_v0 }
 0x200   :  { %5475 = vpow2.f32 %v4170_v35  ;;  %v4171_v39 = vmul.f32 -1.442695, %v446_v38  ;;  %v545_v42 = vmul.f32 %v5464_v36, %v6159_v48 }
 0x201   :  { %v5466_v40 = vpop.eup %5465 }
 0x202   :  { %v5468_v41 = vpop.eup %5467  ;;  %v546_v43 = vmul.f32 %v5466_v40, %v6163_v54  ;;  %5477 = vpow2.f32 %v4171_v39 }
 0x203   :  { %v507_v44 = vadd.f32 1.0, %v5468_v41  ;;  %v450_v45 = vpop.f32.mrb[24].mxu1 }
 0x204   :  { %v5470_v46 = vpop.eup %5469  ;;  %v6199_v49 = vpack.c.bf16 %v546_v43, %v545_v42  ;;  %v451_v50 = vadd.f32 %v6146_v25, %v450_v45  ;;  %v4726_v51 = vpop.f32.mrb[25].mxu1  ;;  %v5318_v45 = vld [vmem:[%s7528_s5 + $0x28] sm:$0xff]  }
 0x205   :  { %5479 = vrcp.f32 %v507_v44  ;;  %v508_v53 = vadd.f32 1.0, %v5470_v46  ;;  %v453_v55 = vpop.f32.mrb[26].mxu1  ;;  %v5317_v44 = vld [vmem:[%s7528_s5 + $0x20] sm:$0xff]   ;;  %v5319_v46 = vld [vmem:[%s7528_s5 + $0x30] sm:$0xff]  }
 0x206   :  { %v4172_v56 = vmul.f32 -1.442695, %v451_v50  ;;  %v454_v47 = vadd.f32 %v6146_v25, %v453_v55  ;;  %v4727_v52 = vpop.f32.mrb[27].mxu1  ;;  %4733 = vmatpush3.bf16.msra.mxu0 %v6199_v49  ;;  %4761 = vmatpush3.bf16.msra.mxu1 %v5317_v44  ;;  %v4178_v51 = vld [vmem:[%s7535_s8] ss:$0 sm:$0xff] }
 0x207   :  { %v5472_v48 = vpop.eup %5471  ;;  %5481 = vrcp.f32 %v508_v53  ;;  %4734 = vmatprep.subr.bf16.mxu0 %v5916_v0  ;;  %4762 = vmatprep.subr.bf16.mxu1 %v5916_v0 }
 0x208   :  { %5483 = vpow2.f32 %v4172_v56  ;;  %v4173_v54 = vmul.f32 -1.442695, %v454_v47  ;;  %v547_v61 = vmul.f32 %v5472_v48, %v6167_v60 }
 0x209   :  { %v5474_v57 = vpop.eup %5473 }
 0x20a   :  { %v5476_v58 = vpop.eup %5475  ;;  %v548_v62 = vmul.f32 %v5474_v57, %v6171_v2  ;;  %5485 = vpow2.f32 %v4173_v54  ;;  %4763 = vmatpush3.bf16.msra.mxu1 %v5318_v45 }
 0x20b   :  { %v509_v63 = vadd.f32 1.0, %v5476_v58  ;;  %v663_v21 = vpop.f32.mrb[28].mxu1  ;;  %4764 = vmatprep.subr.bf16.mxu1 %v5916_v0 }
 0x20c   :  { %v5478_v26 = vpop.eup %5477  ;;  %v6207_v3 = vpack.c.bf16 %v548_v62, %v547_v61  ;;  %v4750_v22 = vpop.f32.mrb[29].mxu1  ;;  %v664_v32 = vadd.f32 %v4176_v29, %v663_v21  ;;  %v5323_v21 = vld [vmem:[%s7536_s2 + $0x48] sm:$0xff]  }
 0x20d   :  { %5487 = vrcp.f32 %v509_v63  ;;  %v510_v25 = vadd.f32 1.0, %v5478_v26  ;;  %v666_v23 = vpop.f32.mrb[30].mxu1  ;;  %v5330_v22 = vld [vmem:[%s7536_s2 + $0x10] sm:$0xff]  }
 0x20e   :  { %4735 = vmatpush3.bf16.msra.mxu0 %v6207_v3  ;;  %v4751_v24 = vpop.f32.mrb[31].mxu1  ;;  %v667_v36 = vadd.f32 %v4176_v29, %v666_v23  ;;  %4765 = vmatpush3.bf16.msra.mxu1 %v5319_v46  ;;  %v5324_v23 = vld [vmem:[%s7536_s2 + $0x50] sm:$0xff]   ;;  %v5326_v29 = vld [vmem:[%s7536_s2 + $0x60] sm:$0xff]  }
 0x20f   :  { %v5480_v4 = vpop.eup %5479  ;;  %5489 = vrcp.f32 %v510_v25  ;;  %4736 = vmatprep.subr.bf16.mxu0 %v5916_v0  ;;  %4766 = vmatprep.subr.bf16.mxu1 %v5916_v0  ;;  %v5331_v24 = vld [vmem:[%s7536_s2 + $0x18] sm:$0xff]  }
 0x210   :  { %v549_v59 = vmul.f32 %v5480_v4, %v6177_v12 }
 0x211   :  { %v5482_v5 = vpop.eup %5481 }
 0x212   :  { %v5484_v6 = vpop.eup %5483  ;;  %v550_v60 = vmul.f32 %v5482_v5, %v6181_v17 }
 0x213   :  { %v511_v2 = vadd.f32 1.0, %v5484_v6 }
 0x214   :  { %v5486_v1 = vpop.eup %5485  ;;  %v6213_v7 = vpack.c.bf16 %v550_v60, %v549_v59  ;;  %v4184_v59 = vld [vmem:[%s7530_s7 + $0x2] ss:$0 sm:$0xff] }
 0x215   :  { %5491 = vrcp.f32 %v511_v2  ;;  %v512_v8 = vadd.f32 1.0, %v5486_v1 }
 0x216   :  { %4737 = vmatpush3.bf16.msra.mxu0 %v6213_v7 }
 0x217   :  { %v5488_v9 = vpop.eup %5487  ;;  %5493 = vrcp.f32 %v512_v8  ;;  %4738 = vmatprep.subr.bf16.mxu0 %v5916_v0 }
 0x218   :  { %v551_v14 = vmul.f32 %v5488_v9, %v6191_v31  ;;  %v80_v31 = vld [vmem:[%s7534_s4] sm:$0xff] }
 0x219   :  { %v5490_v10 = vpop.eup %5489 }
 0x21a   :  { %v552_v15 = vmul.f32 %v5490_v10, %v446_v38 }
 0x21c   :  { %v6218_v13 = vpack.c.bf16 %v552_v15, %v551_v14 }
 0x21e   :  { %4739 = vmatpush3.bf16.msra.mxu0 %v6218_v13 }
 0x21f   :  { %v5492_v12 = vpop.eup %5491  ;;  %4740 = vmatprep.subr.bf16.mxu0 %v5916_v0 }
 0x220   :  { %v553_v17 = vmul.f32 %v5492_v12, %v451_v50  ;;  %v5320_v50 = vld [vmem:[%s7528_s5 + $0x38] sm:$0xff]  }
 0x221   :  { %v5494_v16 = vpop.eup %5493  ;;  %4767 = vmatpush3.bf16.msra.mxu1 %v5320_v50 }
 0x222   :  { %v554_v18 = vmul.f32 %v5494_v16, %v454_v47  ;;  %4802 = vmatprep.subr.bf16.mxu1 %v5916_v0  ;;  %v5321_v16 = vld [vmem:[%s7536_s2 + $0x38] sm:$0xff]  }
 0x224   :  { %v6222_v19 = vpack.c.bf16 %v554_v18, %v553_v17  ;;  %v5328_v17 = vld [vmem:[%s7536_s2] sm:$0xff]  }
 0x225   :  { %v5322_v18 = vld [vmem:[%s7536_s2 + $0x40] sm:$0xff]  }
 0x226   :  { %4741 = vmatpush3.bf16.msra.mxu0 %v6222_v19 }
 0x227   :  { %4752 = vmatprep.subr.bf16.mxu0 %v5916_v0 }
 0x229   :  { %4743 = vmatmul.mubr.msk.bf16.vlgmr.msra.gmra.mrb[28].mxu0 %vm567_vm4, %v5314_v20  ;;  %v5329_v20 = vld [vmem:[%s7536_s2 + $0x8] sm:$0xff]  }
 0x22a   :  { %4756 = vmatprep.mubr.msk.bf16.mxu0 %vm5917_vm0, %v5916_v0  ;;  %4753 = vmatpush3.bf16.msra.mxu0 %v5315_v27  ;;  %v5325_v27 = vld [vmem:[%s7536_s2 + $0x58] sm:$0xff]  }
 0x22b   :  { %4754 = vmatprep.subr.bf16.mxu0 %v5916_v0 }
 0x22e   :  { %4755 = vmatpush3.bf16.msra.mxu0 %v5316_v28  ;;  %v5332_v28 = vld [vmem:[%s7536_s2 + $0x20] sm:$0xff]  }
 0x22f   :  { %4772 = vmatprep.subr.bf16.mxu0 %v5916_v0 }
 0x2fc   :  { %v605_v33 = vpop.f32.mrb[28].mxu0 }
 0x2fd   :  { %v612_v35 = vmul.f32 %v605_v33, %v80_v31  ;;  %v4744_v38 = vpop.f32.mrb[29].mxu0  ;;  %v5333_v31 = vld [vmem:[%s7536_s2 + $0x28] sm:$0xff]   ;;  %v5334_v33 = vld [vmem:[%s7536_s2 + $0x30] sm:$0xff]  }
 0x2fe   :  { %v608_v37 = vpop.f32.mrb[30].mxu0  ;;  %v5337_v38 = vld [vmem:[%s7528_s5 + $0x50] sm:$0xff]  }
 0x2ff   :  { %v670_v39 = vadd.f32 %v664_v32, %v612_v35  ;;  %v613_v40 = vmul.f32 %v608_v37, %v81_v34  ;;  %v4745_v41 = vpop.f32.mrb[31].mxu0  ;;  %v5327_v32 = vld [vmem:[%s7536_s2 + $0x68] sm:$0xff]   ;;  %v5335_v34 = vld [vmem:[%s7528_s5 + $0x40] sm:$0xff]   ;;  %v5338_v37 = vld [vmem:[%s7528_s5 + $0x58] sm:$0xff]  }
 0x300   :  { %v5336_v35 = vld [vmem:[%s7528_s5 + $0x48] sm:$0xff]  }
 0x301   :  { %v671_v42 = vadd.f32 %v667_v36, %v613_v40  ;;  %v5339_v36 = vld [vmem:[%s7528_s5 + $0x60] sm:$0xff]  }
 0x303   :  { %v676_v43 = vpack.c.bf16 %v671_v42, %v670_v39 }
 0x305   :  { %4757 = vmatmul.mubr.msk.bf16.vlgmr.msra.gmra.mrb[32].mxu0 %vm110_vm1, %v676_v43 }
 0x306   :  { %4774 = vmatprep.mubr.msk.bf16.mxu0 %vm5917_vm0, %v5916_v0 }
 0x3d8   :  { %v731_v53 = vpop.f32.mrb[32].mxu0 }
 0x3d9   :  { %v732_v55 = vadd.f32 %v4178_v51, %v731_v53  ;;  %v4758_v56 = vpop.f32.mrb[33].mxu0 }
 0x3da   :  { %v734_v47 = vpop.f32.mrb[34].mxu0 }
 0x3db   :  { %v4182_v52 = vmul.f32 -1.442695, %v732_v55  ;;  %v735_v48 = vadd.f32 %v4178_v51, %v734_v47  ;;  %v4759_v54 = vpop.f32.mrb[35].mxu0 }
 0x3dd   :  { %5495 = vpow2.f32 %v4182_v52  ;;  %v4183_v57 = vmul.f32 -1.442695, %v735_v48 }
 0x3df   :  { %5497 = vpow2.f32 %v4183_v57 }
 0x3e7   :  { %v5496_v58 = vpop.eup %5495 }
 0x3e8   :  { %v744_v61 = vadd.f32 1.0, %v5496_v58 }
 0x3e9   :  { %v5498_v62 = vpop.eup %5497 }
 0x3ea   :  { %5499 = vrcp.f32 %v744_v61  ;;  %v745_v63 = vadd.f32 1.0, %v5498_v62 }
 0x3ec   :  { %5501 = vrcp.f32 %v745_v63 }
 0x3f4   :  { %v5500_v26 = vpop.eup %5499 }
 0x3f5   :  { %v750_v4 = vmul.f32 %v5500_v26, %v732_v55 }
 0x3f6   :  { %v5502_v25 = vpop.eup %5501 }
 0x3f7   :  { %v751_v5 = vmul.f32 %v5502_v25, %v735_v48 }
 0x3f9   :  { %v760_v6 = vpack.c.bf16 %v751_v5, %v750_v4 }
 0x3fb   :  { %4769 = vmatmul.mubr.msk.bf16.vlgmr.msra.gmra.mrb[32].mxu1 %vm790_vm5, %v760_v6 }
 0x3fc   :  { %4804 = vmatprep.mubr.msk.bf16.mxu1 %vm5917_vm0, %v5916_v0 }
 0x4ce   :  { %v828_v60 = vpop.f32.mrb[32].mxu1 }
 0x4cf   :  { %v829_v2 = vadd.f32 %v4184_v59, %v828_v60  ;;  %v4770_v1 = vpop.f32.mrb[33].mxu1 }
 0x4d0   :  { %v831_v8 = vpop.f32.mrb[34].mxu1 }
 0x4d1   :  { %v832_v9 = vadd.f32 %v4184_v59, %v831_v8  ;;  %v4771_v10 = vpop.f32.mrb[35].mxu1  ;;  %v6277_v14 = vadd.f32 %v829_v2, %v670_v39  ;;  %v5340_v39 = vld [vmem:[%s7528_s5 + $0x68] sm:$0xff]  }
 0x4d3   :  { %v6279_v15 = vadd.f32 %v832_v9, %v671_v42 }
 0x4d5   :  { %v837_v12 = vpack.c.bf16 %v6279_v15, %v6277_v14 }
 0x4d7   :  { %4773 = vmatpush3.bf16.msra.mxu0 %v837_v12  ;;  %4803 = vmatpush3.bf16.msra.mxu1 %v837_v12 }
 0x4d8   :  { %4832 = vmatprep.subr.bf16.mxu0 %v5916_v0  ;;  %4872 = vmatprep.subr.bf16.mxu1 %v5916_v0 }
 0x4da   :  { %4805 = vmatmul.mubr.msk.bf16.vlgmr.msra.gmra.mrb[36].mxu1 %vm873_vm6, %v5321_v16  ;;  %4775 = vmatmul.mubr.msk.bf16.vlgmr.msra.gmra.mrb[36].mxu0 %vm873_vm6, %v5328_v17 }
 0x4db   :  { %4808 = vmatprep.mubr.msk.bf16.mxu1 %vm5917_vm0, %v5916_v0  ;;  %4778 = vmatprep.mubr.msk.bf16.mxu0 %vm5917_vm0, %v5916_v0 }
 0x4dc   :  { %4833 = vmatpush3.bf16.msra.mxu0 %v5335_v34 }
 0x4dd   :  { %4834 = vmatprep.subr.bf16.mxu0 %v5916_v0 }
 0x4e0   :  { %4835 = vmatpush3.bf16.msra.mxu0 %v5336_v35 }
 0x4e1   :  { %4836 = vmatprep.subr.bf16.mxu0 %v5916_v0 }
 0x4e2   :  { %4809 = vmatmul.mubr.msk.bf16.gmra.mrb[40].mxu1 %vm873_vm6, %v5322_v18  ;;  %4779 = vmatmul.mubr.msk.bf16.gmra.mrb[40].mxu0 %vm873_vm6, %v5329_v20 }
 0x4e3   :  { %4812 = vmatprep.mubr.msk.bf16.mxu1 %vm5917_vm0, %v5916_v0  ;;  %4782 = vmatprep.mubr.msk.bf16.mxu0 %vm5917_vm0, %v5916_v0 }
 0x4e4   :  { %4837 = vmatpush3.bf16.msra.mxu0 %v5337_v38 }
 0x4e5   :  { %4838 = vmatprep.subr.bf16.mxu0 %v5916_v0 }
 0x4e8   :  { %4839 = vmatpush3.bf16.msra.mxu0 %v5338_v37 }
 0x4e9   :  { %4840 = vmatprep.subr.bf16.mxu0 %v5916_v0 }
 0x4ea   :  { %4813 = vmatmul.mubr.msk.bf16.gmra.mrb[44].mxu1 %vm873_vm6, %v5323_v21  ;;  %4783 = vmatmul.mubr.msk.bf16.gmra.mrb[44].mxu0 %vm873_vm6, %v5330_v22 }
 0x4eb   :  { %4816 = vmatprep.mubr.msk.bf16.mxu1 %vm5917_vm0, %v5916_v0  ;;  %4786 = vmatprep.mubr.msk.bf16.mxu0 %vm5917_vm0, %v5916_v0 }
 0x4ec   :  { %4841 = vmatpush3.bf16.msra.mxu0 %v5339_v36 }
 0x4ed   :  { %4842 = vmatprep.subr.bf16.mxu0 %v5916_v0 }
 0x4f0   :  { %4843 = vmatpush3.bf16.msra.mxu0 %v5340_v39 }
 0x4f1   :  { %4904 = vmatprep.subr.bf16.mxu0 %v5916_v0 }
 0x4f2   :  { %4817 = vmatmul.mubr.msk.bf16.gmra.mrb[48].mxu1 %vm873_vm6, %v5324_v23  ;;  %4787 = vmatmul.mubr.msk.bf16.gmra.mrb[48].mxu0 %vm873_vm6, %v5331_v24 }
 0x4f3   :  { %4820 = vmatprep.mubr.msk.bf16.mxu1 %vm5917_vm0, %v5916_v0  ;;  %4790 = vmatprep.mubr.msk.bf16.mxu0 %vm5917_vm0, %v5916_v0 }
 0x4fa   :  { %4821 = vmatmul.mubr.msk.bf16.gmra.mrb[52].mxu1 %vm873_vm6, %v5325_v27  ;;  %4791 = vmatmul.mubr.msk.bf16.gmra.mrb[52].mxu0 %vm873_vm6, %v5332_v28 }
 0x4fb   :  { %4824 = vmatprep.mubr.msk.bf16.mxu1 %vm5917_vm0, %v5916_v0  ;;  %4794 = vmatprep.mubr.msk.bf16.mxu0 %vm5917_vm0, %v5916_v0 }
 0x502   :  { %4825 = vmatmul.mubr.msk.bf16.gmra.mrb[56].mxu1 %vm873_vm6, %v5326_v29  ;;  %4795 = vmatmul.mubr.msk.bf16.gmra.mrb[56].mxu0 %vm873_vm6, %v5333_v31 }
 0x503   :  { %4828 = vmatprep.mubr.msk.bf16.mxu1 %vm5917_vm0, %v5916_v0  ;;  %4798 = vmatprep.mubr.msk.bf16.mxu0 %vm5917_vm0, %v5916_v0 }
 0x50a   :  { %4829 = vmatmul.mubr.msk.bf16.gmra.mrb[60].mxu1 %vm873_vm6, %v5327_v32  ;;  %4799 = vmatmul.mubr.msk.bf16.gmra.mrb[60].mxu0 %vm873_vm6, %v5334_v33 }
 0x50b   :  { %4844 = vmatprep.mubr.msk.bf16.mxu0 %vm5917_vm0, %v5916_v0  ;;  %4876 = vmatprep.mubr.msk.bf16.mxu1 %vm5917_vm0, %v5916_v0 }
 0x5ad   :  { %v1074_v40 = vpop.f32.mrb[36].mxu1  ;;  %v6393_v41 = vpop.f32.mrb[36].mxu0 }
 0x5ae   :  { %v4806_v42 = vpop.f32.mrb[37].mxu1  ;;  %v4776_v43 = vpop.f32.mrb[37].mxu0 }
 0x5af   :  { %v1077_v44 = vpop.f32.mrb[38].mxu1  ;;  %v6395_v45 = vpop.f32.mrb[38].mxu0 }
 0x5b0   :  { %v1136_v46 = vpack.c.bf16 %v1077_v44, %v1074_v40  ;;  %v4807_v50 = vpop.f32.mrb[39].mxu1  ;;  %v1129_v51 = vpack.c.bf16 %v6395_v45, %v6393_v41  ;;  %v4777_v53 = vpop.f32.mrb[39].mxu0  ;;  %v5341_v40 = vld [vmem:[%s7528_s5 + $0x70] sm:$0xff]  }
 0x5b1   :  { %4873 = vmatpush3.bf16.msra.mxu1 %v5341_v40 }
 0x5b2   :  { %1150 = vrot.lane.b32.xlu0 %v1136_v46, %s5918_s28  ;;  %4874 = vmatprep.subr.bf16.mxu1 %v5916_v0 }
 0x5b5   :  { %v1082_v55 = vpop.f32.mrb[40].mxu1  ;;  %v6400_v56 = vpop.f32.mrb[40].mxu0 }
 0x5b6   :  { %1171 = vrot.lane.b32.xlu0 %v6174_v11, %s5919_s29  ;;  %v4810_v47 = vpop.f32.mrb[41].mxu1  ;;  %v4780_v52 = vpop.f32.mrb[41].mxu0 }
 0x5b7   :  { %v1085_v48 = vpop.f32.mrb[42].mxu1  ;;  %v6404_v54 = vpop.f32.mrb[42].mxu0 }
 0x5b8   :  { %v1137_v57 = vpack.c.bf16 %v1085_v48, %v1082_v55  ;;  %v4811_v58 = vpop.f32.mrb[43].mxu1  ;;  %v1130_v61 = vpack.c.bf16 %v6404_v54, %v6400_v56  ;;  %v4781_v62 = vpop.f32.mrb[43].mxu0 }
 0x5ba   :  { %1152 = vrot.lane.b32.xlu1 %v1137_v57, %s5918_s28 }
 0x5bd   :  { %v1090_v63 = vpop.f32.mrb[44].mxu1  ;;  %v6409_v26 = vpop.f32.mrb[44].mxu0 }
 0x5be   :  { %1173 = vrot.lane.b32.xlu1 %v6188_v30, %s5919_s29  ;;  %v4814_v11 = vpop.f32.mrb[45].mxu1  ;;  %v4784_v25 = vpop.f32.mrb[45].mxu0 }
 0x5bf   :  { %v1093_v4 = vpop.f32.mrb[46].mxu1  ;;  %v6413_v5 = vpop.f32.mrb[46].mxu0 }
 0x5c0   :  { %v1138_v6 = vpack.c.bf16 %v1093_v4, %v1090_v63  ;;  %v4815_v59 = vpop.f32.mrb[47].mxu1  ;;  %v1131_v60 = vpack.c.bf16 %v6413_v5, %v6409_v26  ;;  %v4785_v2 = vpop.f32.mrb[47].mxu0 }
 0x5c2   :  { %1175 = vrot.lane.b32.xlu1 %v6199_v49, %s5919_s29  ;;  %1154 = vrot.lane.b32.xlu0 %v1138_v6, %s5918_s28 }
 0x5c5   :  { %v1098_v1 = vpop.f32.mrb[48].mxu1  ;;  %v6420_v8 = vpop.f32.mrb[48].mxu0 }
 0x5c6   :  { %1177 = vrot.lane.b32.xlu1 %v6207_v3, %s5919_s29  ;;  %v4818_v30 = vpop.f32.mrb[49].mxu1  ;;  %v4788_v9 = vpop.f32.mrb[49].mxu0 }
 0x5c7   :  { %v1101_v10 = vpop.f32.mrb[50].mxu1  ;;  %v6424_v12 = vpop.f32.mrb[50].mxu0 }
 0x5c8   :  { %v1139_v16 = vpack.c.bf16 %v1101_v10, %v1098_v1  ;;  %v4819_v17 = vpop.f32.mrb[51].mxu1  ;;  %v1132_v18 = vpack.c.bf16 %v6424_v12, %v6420_v8  ;;  %v4789_v20 = vpop.f32.mrb[51].mxu0 }
 0x5c9   :  { %v6499_v20 = vld [vmem:[%s7530_s7 + $0x4] ss:$0 sm:$0xff] }
 0x5ca   :  { %1179 = vrot.lane.b32.xlu1 %v6213_v7, %s5919_s29  ;;  %1156 = vrot.lane.b32.xlu0 %v1139_v16, %s5918_s28 }
 0x5cd   :  { %v1106_v49 = vpop.f32.mrb[52].mxu1  ;;  %v6431_v21 = vpop.f32.mrb[52].mxu0 }
 0x5ce   :  { %1181 = vrot.lane.b32.xlu1 %v6218_v13, %s5919_s29  ;;  %v4822_v3 = vpop.f32.mrb[53].mxu1  ;;  %v4792_v22 = vpop.f32.mrb[53].mxu0 }
 0x5cf   :  { %v1109_v23 = vpop.f32.mrb[54].mxu1  ;;  %v964_v24 = vpop.f32.mrb[54].mxu0 }
 0x5d0   :  { %v1140_v27 = vpack.c.bf16 %v1109_v23, %v1106_v49  ;;  %v4823_v28 = vpop.f32.mrb[55].mxu1  ;;  %v1133_v29 = vpack.c.bf16 %v964_v24, %v6431_v21  ;;  %v4793_v31 = vpop.f32.mrb[55].mxu0 }
 0x5d2   :  { %1183 = vrot.lane.b32.xlu1 %v6222_v19, %s5919_s29  ;;  %1158 = vrot.lane.b32.xlu0 %v1140_v27, %s5918_s28 }
 0x5d5   :  { %v1114_v7 = vpop.f32.mrb[56].mxu1  ;;  %v969_v32 = vpop.f32.mrb[56].mxu0 }
 0x5d6   :  { %v4826_v33 = vpop.f32.mrb[57].mxu1  ;;  %v4796_v34 = vpop.f32.mrb[57].mxu0 }
 0x5d7   :  { %v1117_v35 = vpop.f32.mrb[58].mxu1  ;;  %v972_v13 = vpop.f32.mrb[58].mxu0 }
 0x5d8   :  { %v1141_v38 = vpack.c.bf16 %v1117_v35, %v1114_v7  ;;  %v4827_v37 = vpop.f32.mrb[59].mxu1  ;;  %v1134_v36 = vpack.c.bf16 %v972_v13, %v969_v32  ;;  %v4797_v39 = vpop.f32.mrb[59].mxu0 }
 0x5da   :  { %1160 = vrot.lane.b32.xlu0 %v1141_v38, %s5918_s28 }
 0x5dd   :  { %v1122_v19 = vpop.f32.mrb[60].mxu1  ;;  %v977_v42 = vpop.f32.mrb[60].mxu0 }
 0x5de   :  { %v4830_v43 = vpop.f32.mrb[61].mxu1  ;;  %v4800_v44 = vpop.f32.mrb[61].mxu0 }
 0x5df   :  { %v1125_v46 = vpop.f32.mrb[62].mxu1  ;;  %v980_v50 = vpop.f32.mrb[62].mxu0 }
 0x5e0   :  { %v1142_v53 = vpack.c.bf16 %v1125_v46, %v1122_v19  ;;  %v4831_v55 = vpop.f32.mrb[63].mxu1  ;;  %v1135_v47 = vpack.c.bf16 %v980_v50, %v977_v42  ;;  %v4801_v52 = vpop.f32.mrb[63].mxu0 }
 0x5e2   :  { %1162 = vrot.lane.b32.xlu0 %v1142_v53, %s5918_s28 }
 0x624   :  { %v1151_v48 = vpop.permute.xlu0 %1150 }
 0x625   :  { %v1187_v57 = vsel %vm110_vm1, %v1129_v51, %v1151_v48 }
 0x628   :  { %v1172_v58 = vpop.permute.xlu0 %1171 }
 0x629   :  { %v1207_v62 = vsel %vm790_vm5, %v1187_v57, %v1172_v58 }
 0x62a   :  { %4845 = vmatmul.mubr.msk.bf16.vlgmr.msra.gmra.mrb[64].mxu0 %vm1273_vm7, %v1207_v62 }
 0x62b   :  { %4848 = vmatprep.mubr.msk.bf16.mxu0 %vm5917_vm0, %v5916_v0 }
 0x62c   :  { %v1153_v63 = vpop.permute.xlu1 %1152 }
 0x62d   :  { %v1190_v11 = vsel %vm110_vm1, %v1130_v61, %v1153_v63 }
 0x630   :  { %v1174_v25 = vpop.permute.xlu1 %1173 }
 0x631   :  { %v1209_v4 = vsel %vm790_vm5, %v1190_v11, %v1174_v25 }
 0x632   :  { %4849 = vmatmul.mubr.msk.bf16.gmra.mrb[68].mxu0 %vm1273_vm7, %v1209_v4 }
 0x633   :  { %4852 = vmatprep.mubr.msk.bf16.mxu0 %vm5917_vm0, %v5916_v0 }
 0x634   :  { %v1155_v41 = vpop.permute.xlu0 %1154  ;;  %v1176_v45 = vpop.permute.xlu1 %1175 }
 0x635   :  { %v1193_v51 = vsel %vm110_vm1, %v1131_v60, %v1155_v41 }
 0x636   :  { %v1211_v6 = vsel %vm790_vm5, %v1193_v51, %v1176_v45 }
 0x638   :  { %v1178_v61 = vpop.permute.xlu1 %1177 }
 0x63a   :  { %4853 = vmatmul.mubr.msk.bf16.gmra.mrb[72].mxu0 %vm1273_vm7, %v1211_v6 }
 0x63b   :  { %4856 = vmatprep.mubr.msk.bf16.mxu0 %vm5917_vm0, %v5916_v0 }
 0x63c   :  { %v1157_v56 = vpop.permute.xlu0 %1156  ;;  %v1180_v60 = vpop.permute.xlu1 %1179 }
 0x63d   :  { %v1196_v54 = vsel %vm110_vm1, %v1132_v18, %v1157_v56  ;;  %v5342_v18 = vld [vmem:[%s7528_s5 + $0x78] sm:$0xff]  }
 0x63e   :  { %v1213_v59 = vsel %vm790_vm5, %v1196_v54, %v1178_v61  ;;  %4875 = vmatpush3.bf16.msra.mxu1 %v5342_v18 }
 0x63f   :  { %4930 = vmatprep.subr.bf16.mxu1 %v5916_v0 }
 0x640   :  { %v1182_v30 = vpop.permute.xlu1 %1181 }
 0x642   :  { %4857 = vmatmul.mubr.msk.bf16.gmra.mrb[76].mxu0 %vm1273_vm7, %v1213_v59 }
 0x643   :  { %4860 = vmatprep.mubr.msk.bf16.mxu0 %vm5917_vm0, %v5916_v0 }
 0x644   :  { %v1159_v26 = vpop.permute.xlu0 %1158  ;;  %v1184_v16 = vpop.permute.xlu1 %1183 }
 0x645   :  { %v1199_v5 = vsel %vm110_vm1, %v1133_v29, %v1159_v26 }
 0x646   :  { %v1215_v2 = vsel %vm790_vm5, %v1199_v5, %v1180_v60 }
 0x64a   :  { %4861 = vmatmul.mubr.msk.bf16.gmra.mrb[80].mxu0 %vm1273_vm7, %v1215_v2 }
 0x64b   :  { %4864 = vmatprep.mubr.msk.bf16.mxu0 %vm5917_vm0, %v5916_v0 }
 0x64c   :  { %v1161_v1 = vpop.permute.xlu0 %1160 }
 0x64d   :  { %v1202_v8 = vsel %vm110_vm1, %v1134_v36, %v1161_v1 }
 0x64e   :  { %v1217_v9 = vsel %vm790_vm5, %v1202_v8, %v1182_v30 }
 0x652   :  { %4865 = vmatmul.mubr.msk.bf16.gmra.mrb[84].mxu0 %vm1273_vm7, %v1217_v9 }
 0x653   :  { %4868 = vmatprep.mubr.msk.bf16.mxu0 %vm5917_vm0, %v5916_v0 }
 0x654   :  { %v1163_v10 = vpop.permute.xlu0 %1162 }
 0x655   :  { %v1205_v12 = vsel %vm110_vm1, %v1135_v47, %v1163_v10 }
 0x656   :  { %v1219_v17 = vsel %vm790_vm5, %v1205_v12, %v1184_v16 }
 0x65a   :  { %4869 = vmatmul.mubr.msk.bf16.gmra.mrb[88].mxu0 %vm1273_vm7, %v1219_v17 }
 0x65b   :  { %4918 = vmatprep.mubr.msk.bf16.mxu0 %vm5917_vm0, %v5916_v0 }
 0x6fd   :  { %v1322_v49 = vpop.f32.mrb[64].mxu0 }
 0x6fe   :  { %v1323_v21 = vadd.f32 %v6499_v20, %v1322_v49  ;;  %v4846_v3 = vpop.f32.mrb[65].mxu0 }
 0x6ff   :  { %v1325_v22 = vpop.f32.mrb[66].mxu0 }
 0x700   :  { %v4232_v23 = vmul.f32 -1.442695, %v1323_v21  ;;  %v1326_v24 = vadd.f32 %v6499_v20, %v1325_v22  ;;  %v4847_v27 = vpop.f32.mrb[67].mxu0 }
 0x702   :  { %5503 = vpow2.f32 %v4232_v23  ;;  %v4233_v28 = vmul.f32 -1.442695, %v1326_v24 }
 0x704   :  { %5505 = vpow2.f32 %v4233_v28 }
 0x705   :  { %v1330_v29 = vpop.f32.mrb[68].mxu0 }
 0x706   :  { %v6504_v31 = vadd.f32 %v6499_v20, %v1330_v29  ;;  %v4850_v7 = vpop.f32.mrb[69].mxu0 }
 0x707   :  { %v1333_v32 = vpop.f32.mrb[70].mxu0 }
 0x708   :  { %v4234_v33 = vmul.f32 -1.442695, %v6504_v31  ;;  %v6508_v34 = vadd.f32 %v6499_v20, %v1333_v32  ;;  %v4851_v35 = vpop.f32.mrb[71].mxu0 }
 0x70a   :  { %5507 = vpow2.f32 %v4234_v33  ;;  %v4235_v13 = vmul.f32 -1.442695, %v6508_v34 }
 0x70c   :  { %v5504_v38 = vpop.eup %5503  ;;  %5509 = vpow2.f32 %v4235_v13 }
 0x70d   :  { %v1419_v37 = vadd.f32 1.0, %v5504_v38  ;;  %v1338_v36 = vpop.f32.mrb[72].mxu0 }
 0x70e   :  { %v5506_v39 = vpop.eup %5505  ;;  %v6512_v40 = vadd.f32 %v6499_v20, %v1338_v36  ;;  %v4854_v19 = vpop.f32.mrb[73].mxu0 }
 0x70f   :  { %5511 = vrcp.f32 %v1419_v37  ;;  %v1420_v42 = vadd.f32 1.0, %v5506_v39  ;;  %v1341_v43 = vpop.f32.mrb[74].mxu0 }
 0x710   :  { %v4236_v44 = vmul.f32 -1.442695, %v6512_v40  ;;  %v6516_v46 = vadd.f32 %v6499_v20, %v1341_v43  ;;  %v4855_v50 = vpop.f32.mrb[75].mxu0 }
 0x711   :  { %5513 = vrcp.f32 %v1420_v42 }
 0x712   :  { %5515 = vpow2.f32 %v4236_v44  ;;  %v4237_v53 = vmul.f32 -1.442695, %v6516_v46 }
 0x714   :  { %v5508_v55 = vpop.eup %5507  ;;  %5517 = vpow2.f32 %v4237_v53 }
 0x715   :  { %v1421_v47 = vadd.f32 1.0, %v5508_v55  ;;  %v1346_v52 = vpop.f32.mrb[76].mxu0 }
 0x716   :  { %v5510_v48 = vpop.eup %5509  ;;  %v6520_v57 = vadd.f32 %v6499_v20, %v1346_v52  ;;  %v4858_v58 = vpop.f32.mrb[77].mxu0 }
 0x717   :  { %5519 = vrcp.f32 %v1421_v47  ;;  %v1422_v62 = vadd.f32 1.0, %v5510_v48  ;;  %v1349_v63 = vpop.f32.mrb[78].mxu0 }
 0x718   :  { %v4238_v11 = vmul.f32 -1.442695, %v6520_v57  ;;  %v6524_v25 = vadd.f32 %v6499_v20, %v1349_v63  ;;  %v4859_v4 = vpop.f32.mrb[79].mxu0 }
 0x719   :  { %v5512_v41 = vpop.eup %5511  ;;  %5521 = vrcp.f32 %v1422_v62 }
 0x71a   :  { %5523 = vpow2.f32 %v4238_v11  ;;  %v4239_v45 = vmul.f32 -1.442695, %v6524_v25  ;;  %v1461_v56 = vmul.f32 %v5512_v41, %v1323_v21 }
 0x71b   :  { %v5514_v51 = vpop.eup %5513 }
 0x71c   :  { %v5516_v6 = vpop.eup %5515  ;;  %v1462_v54 = vmul.f32 %v5514_v51, %v1326_v24  ;;  %5525 = vpow2.f32 %v4239_v45 }
 0x71d   :  { %v1423_v61 = vadd.f32 1.0, %v5516_v6  ;;  %v1354_v59 = vpop.f32.mrb[80].mxu0 }
 0x71e   :  { %v5518_v26 = vpop.eup %5517  ;;  %v1479_v5 = vpack.c.bf16 %v1462_v54, %v1461_v56  ;;  %v6528_v60 = vadd.f32 %v6499_v20, %v1354_v59  ;;  %v4862_v2 = vpop.f32.mrb[81].mxu0 }
 0x71f   :  { %5527 = vrcp.f32 %v1423_v61  ;;  %v1424_v1 = vadd.f32 1.0, %v5518_v26  ;;  %v1357_v8 = vpop.f32.mrb[82].mxu0 }
 0x720   :  { %v4240_v30 = vmul.f32 -1.442695, %v6528_v60  ;;  %v6532_v9 = vadd.f32 %v6499_v20, %v1357_v8  ;;  %v4863_v10 = vpop.f32.mrb[83].mxu0  ;;  %4877 = vmatmul.mubr.msk.bf16.vlgmr.msra.gmra.mrb[64].mxu1 %vm110_vm1, %v1479_v5 }
 0x721   :  { %v5520_v12 = vpop.eup %5519  ;;  %5529 = vrcp.f32 %v1424_v1  ;;  %4880 = vmatprep.mubr.msk.bf16.mxu1 %vm5917_vm0, %v5916_v0 }
 0x722   :  { %5531 = vpow2.f32 %v4240_v30  ;;  %v4241_v16 = vmul.f32 -1.442695, %v6532_v9  ;;  %v1463_v49 = vmul.f32 %v5520_v12, %v6504_v31 }
 0x723   :  { %v5522_v17 = vpop.eup %5521 }
 0x724   :  { %v5524_v18 = vpop.eup %5523  ;;  %v1464_v21 = vmul.f32 %v5522_v17, %v6508_v34  ;;  %5533 = vpow2.f32 %v4241_v16  ;;  %v6575_v17 = vld [vmem:[%s7530_s7 + $0x5] ss:$0 sm:$0xff] }
 0x725   :  { %v1425_v3 = vadd.f32 1.0, %v5524_v18  ;;  %v1362_v22 = vpop.f32.mrb[84].mxu0 }
 0x726   :  { %v5526_v23 = vpop.eup %5525  ;;  %v1480_v24 = vpack.c.bf16 %v1464_v21, %v1463_v49  ;;  %v6541_v27 = vadd.f32 %v6499_v20, %v1362_v22  ;;  %v4866_v28 = vpop.f32.mrb[85].mxu0 }
 0x727   :  { %5535 = vrcp.f32 %v1425_v3  ;;  %v1426_v29 = vadd.f32 1.0, %v5526_v23  ;;  %v1365_v7 = vpop.f32.mrb[86].mxu0 }
 0x728   :  { %v4242_v32 = vmul.f32 -1.442695, %v6541_v27  ;;  %v1366_v33 = vadd.f32 %v6499_v20, %v1365_v7  ;;  %v4867_v35 = vpop.f32.mrb[87].mxu0  ;;  %4881 = vmatmul.mubr.msk.bf16.gmra.mrb[68].mxu1 %vm110_vm1, %v1480_v24 }
 0x729   :  { %v5528_v31 = vpop.eup %5527  ;;  %5537 = vrcp.f32 %v1426_v29  ;;  %4884 = vmatprep.mubr.msk.bf16.mxu1 %vm5917_vm0, %v5916_v0 }
 0x72a   :  { %5539 = vpow2.f32 %v4242_v32  ;;  %v4243_v34 = vmul.f32 -1.442695, %v1366_v33  ;;  %v1465_v37 = vmul.f32 %v5528_v31, %v6512_v40 }
 0x72b   :  { %v5530_v13 = vpop.eup %5529 }
 0x72c   :  { %v5532_v38 = vpop.eup %5531  ;;  %v1466_v36 = vmul.f32 %v5530_v13, %v6516_v46  ;;  %5541 = vpow2.f32 %v4243_v34 }
 0x72d   :  { %v1427_v39 = vadd.f32 1.0, %v5532_v38  ;;  %v1370_v19 = vpop.f32.mrb[88].mxu0 }
 0x72e   :  { %v5534_v42 = vpop.eup %5533  ;;  %v1481_v43 = vpack.c.bf16 %v1466_v36, %v1465_v37  ;;  %v1371_v44 = vadd.f32 %v6499_v20, %v1370_v19  ;;  %v4870_v50 = vpop.f32.mrb[89].mxu0 }
 0x72f   :  { %5543 = vrcp.f32 %v1427_v39  ;;  %v1428_v53 = vadd.f32 1.0, %v5534_v42  ;;  %v1373_v55 = vpop.f32.mrb[90].mxu0 }
 0x730   :  { %v4244_v47 = vmul.f32 -1.442695, %v1371_v44  ;;  %v1374_v52 = vadd.f32 %v6499_v20, %v1373_v55  ;;  %v4871_v48 = vpop.f32.mrb[91].mxu0  ;;  %4885 = vmatmul.mubr.msk.bf16.gmra.mrb[72].mxu1 %vm110_vm1, %v1481_v43 }
 0x731   :  { %v5536_v40 = vpop.eup %5535  ;;  %5545 = vrcp.f32 %v1428_v53  ;;  %4888 = vmatprep.mubr.msk.bf16.mxu1 %vm5917_vm0, %v5916_v0 }
 0x732   :  { %5547 = vpow2.f32 %v4244_v47  ;;  %v4245_v46 = vmul.f32 -1.442695, %v1374_v52  ;;  %v1467_v63 = vmul.f32 %v5536_v40, %v6520_v57 }
 0x733   :  { %v5538_v58 = vpop.eup %5537 }
 0x734   :  { %v5540_v62 = vpop.eup %5539  ;;  %v1468_v11 = vmul.f32 %v5538_v58, %v6524_v25  ;;  %5549 = vpow2.f32 %v4245_v46 }
 0x735   :  { %v1429_v4 = vadd.f32 1.0, %v5540_v62 }
 0x736   :  { %v5542_v41 = vpop.eup %5541  ;;  %v1482_v20 = vpack.c.bf16 %v1468_v11, %v1467_v63 }
 0x737   :  { %5551 = vrcp.f32 %v1429_v4  ;;  %v1430_v45 = vadd.f32 1.0, %v5542_v41 }
 0x738   :  { %4889 = vmatmul.mubr.msk.bf16.gmra.mrb[76].mxu1 %vm110_vm1, %v1482_v20 }
 0x739   :  { %v5544_v51 = vpop.eup %5543  ;;  %5553 = vrcp.f32 %v1430_v45  ;;  %4892 = vmatprep.mubr.msk.bf16.mxu1 %vm5917_vm0, %v5916_v0 }
 0x73a   :  { %v1469_v54 = vmul.f32 %v5544_v51, %v6528_v60 }
 0x73b   :  { %v5546_v6 = vpop.eup %5545 }
 0x73c   :  { %v5548_v56 = vpop.eup %5547  ;;  %v1470_v57 = vmul.f32 %v5546_v6, %v6532_v9 }
 0x73d   :  { %v1431_v25 = vadd.f32 1.0, %v5548_v56 }
 0x73e   :  { %v5550_v61 = vpop.eup %5549  ;;  %v1483_v59 = vpack.c.bf16 %v1470_v57, %v1469_v54 }
 0x73f   :  { %5555 = vrcp.f32 %v1431_v25  ;;  %v1432_v26 = vadd.f32 1.0, %v5550_v61 }
 0x740   :  { %4893 = vmatmul.mubr.msk.bf16.gmra.mrb[80].mxu1 %vm110_vm1, %v1483_v59 }
 0x741   :  { %v5552_v5 = vpop.eup %5551  ;;  %5557 = vrcp.f32 %v1432_v26  ;;  %4896 = vmatprep.mubr.msk.bf16.mxu1 %vm5917_vm0, %v5916_v0 }
 0x742   :  { %v1471_v1 = vmul.f32 %v5552_v5, %v6541_v27 }
 0x743   :  { %v5554_v2 = vpop.eup %5553 }
 0x744   :  { %v1472_v8 = vmul.f32 %v5554_v2, %v1366_v33 }
 0x746   :  { %v1484_v30 = vpack.c.bf16 %v1472_v8, %v1471_v1 }
 0x748   :  { %4897 = vmatmul.mubr.msk.bf16.gmra.mrb[84].mxu1 %vm110_vm1, %v1484_v30 }
 0x749   :  { %v5556_v60 = vpop.eup %5555  ;;  %4900 = vmatprep.mubr.msk.bf16.mxu1 %vm5917_vm0, %v5916_v0 }
 0x74a   :  { %v1473_v10 = vmul.f32 %v5556_v60, %v1371_v44 }
 0x74b   :  { %v5558_v9 = vpop.eup %5557 }
 0x74c   :  { %v1474_v12 = vmul.f32 %v5558_v9, %v1374_v52 }
 0x74e   :  { %v1485_v16 = vpack.c.bf16 %v1474_v12, %v1473_v10 }
 0x750   :  { %4901 = vmatmul.mubr.msk.bf16.gmra.mrb[88].mxu1 %vm110_vm1, %v1485_v16 }
 0x751   :  { %4938 = vmatprep.mubr.msk.bf16.mxu1 %vm5917_vm0, %v5916_v0 }
 0x7f3   :  { %v1558_v18 = vpop.f32.mrb[64].mxu1 }
 0x7f4   :  { %v1559_v49 = vadd.f32 %v6575_v17, %v1558_v18  ;;  %v4878_v21 = vpop.f32.mrb[65].mxu1 }
 0x7f5   :  { %v1561_v3 = vpop.f32.mrb[66].mxu1 }
 0x7f6   :  { %v4256_v22 = vmul.f32 -1.442695, %v1559_v49  ;;  %v1562_v23 = vadd.f32 %v6575_v17, %v1561_v3  ;;  %v4879_v24 = vpop.f32.mrb[67].mxu1 }
 0x7f8   :  { %5559 = vpow2.f32 %v4256_v22  ;;  %v4257_v27 = vmul.f32 -1.442695, %v1562_v23 }
 0x7fa   :  { %5561 = vpow2.f32 %v4257_v27 }
 0x7fb   :  { %v1566_v28 = vpop.f32.mrb[68].mxu1 }
 0x7fc   :  { %v6580_v29 = vadd.f32 %v6575_v17, %v1566_v28  ;;  %v4882_v7 = vpop.f32.mrb[69].mxu1 }
 0x7fd   :  { %v1569_v32 = vpop.f32.mrb[70].mxu1 }
 0x7fe   :  { %v4258_v33 = vmul.f32 -1.442695, %v6580_v29  ;;  %v6584_v35 = vadd.f32 %v6575_v17, %v1569_v32  ;;  %v4883_v31 = vpop.f32.mrb[71].mxu1 }
 0x800   :  { %5563 = vpow2.f32 %v4258_v33  ;;  %v4259_v34 = vmul.f32 -1.442695, %v6584_v35 }
 0x802   :  { %v5560_v13 = vpop.eup %5559  ;;  %5565 = vpow2.f32 %v4259_v34 }
 0x803   :  { %v1655_v38 = vadd.f32 1.0, %v5560_v13  ;;  %v1574_v37 = vpop.f32.mrb[72].mxu1 }
 0x804   :  { %v5562_v36 = vpop.eup %5561  ;;  %v6588_v39 = vadd.f32 %v6575_v17, %v1574_v37  ;;  %v4886_v19 = vpop.f32.mrb[73].mxu1 }
 0x805   :  { %5567 = vrcp.f32 %v1655_v38  ;;  %v1656_v42 = vadd.f32 1.0, %v5562_v36  ;;  %v1577_v43 = vpop.f32.mrb[74].mxu1 }
 0x806   :  { %v4260_v44 = vmul.f32 -1.442695, %v6588_v39  ;;  %v6592_v50 = vadd.f32 %v6575_v17, %v1577_v43  ;;  %v4887_v53 = vpop.f32.mrb[75].mxu1 }
 0x807   :  { %5569 = vrcp.f32 %v1656_v42 }
 0x808   :  { %5571 = vpow2.f32 %v4260_v44  ;;  %v4261_v55 = vmul.f32 -1.442695, %v6592_v50 }
 0x80a   :  { %v5564_v47 = vpop.eup %5563  ;;  %5573 = vpow2.f32 %v4261_v55 }
 0x80b   :  { %v1657_v52 = vadd.f32 1.0, %v5564_v47  ;;  %v1582_v48 = vpop.f32.mrb[76].mxu1 }
 0x80c   :  { %v5566_v40 = vpop.eup %5565  ;;  %v6596_v46 = vadd.f32 %v6575_v17, %v1582_v48  ;;  %v4890_v58 = vpop.f32.mrb[77].mxu1 }
 0x80d   :  { %5575 = vrcp.f32 %v1657_v52  ;;  %v1658_v62 = vadd.f32 1.0, %v5566_v40  ;;  %v1585_v63 = vpop.f32.mrb[78].mxu1 }
 0x80e   :  { %v4262_v11 = vmul.f32 -1.442695, %v6596_v46  ;;  %v6600_v4 = vadd.f32 %v6575_v17, %v1585_v63  ;;  %v4891_v41 = vpop.f32.mrb[79].mxu1 }
 0x80f   :  { %v5568_v20 = vpop.eup %5567  ;;  %5577 = vrcp.f32 %v1658_v62 }
 0x810   :  { %5579 = vpow2.f32 %v4262_v11  ;;  %v4263_v45 = vmul.f32 -1.442695, %v6600_v4  ;;  %v1697_v56 = vmul.f32 %v5568_v20, %v1559_v49 }
 0x811   :  { %v5570_v51 = vpop.eup %5569 }
 0x812   :  { %v5572_v6 = vpop.eup %5571  ;;  %v1698_v54 = vmul.f32 %v5570_v51, %v1562_v23  ;;  %5581 = vpow2.f32 %v4263_v45 }
 0x813   :  { %v1659_v57 = vadd.f32 1.0, %v5572_v6  ;;  %v1590_v25 = vpop.f32.mrb[80].mxu1 }
 0x814   :  { %v5574_v61 = vpop.eup %5573  ;;  %v6604_v59 = vadd.f32 %v6575_v17, %v1590_v25  ;;  %v4894_v26 = vpop.f32.mrb[81].mxu1  ;;  %v1711_v5 = vpack.c.bf16 %v1698_v54, %v1697_v56 }
 0x815   :  { %5583 = vrcp.f32 %v1659_v57  ;;  %v1660_v2 = vadd.f32 1.0, %v5574_v61  ;;  %v1593_v1 = vpop.f32.mrb[82].mxu1 }
 0x816   :  { %v4264_v8 = vmul.f32 -1.442695, %v6604_v59  ;;  %v6608_v30 = vadd.f32 %v6575_v17, %v1593_v1  ;;  %2148 = vrot.lane.b32.xlu1 %v1711_v5, %s5919_s29  ;;  %v4895_v60 = vpop.f32.mrb[83].mxu1  ;;  %4905 = vmatpush3.bf16.msra.mxu0 %v1711_v5 }
 0x817   :  { %v5576_v9 = vpop.eup %5575  ;;  %5585 = vrcp.f32 %v1660_v2  ;;  %4906 = vmatprep.subr.bf16.mxu0 %v5916_v0 }
 0x818   :  { %5587 = vpow2.f32 %v4264_v8  ;;  %v4265_v10 = vmul.f32 -1.442695, %v6608_v30  ;;  %v1699_v18 = vmul.f32 %v5576_v9, %v6580_v29 }
 0x819   :  { %v5578_v12 = vpop.eup %5577 }
 0x81a   :  { %v5580_v16 = vpop.eup %5579  ;;  %v1700_v49 = vmul.f32 %v5578_v12, %v6584_v35  ;;  %5589 = vpow2.f32 %v4265_v10  ;;  %v5879_v12 = vld [vmem:[%s7532_s3] sm:$0xff]  }
 0x81b   :  { %v1661_v21 = vadd.f32 1.0, %v5580_v16  ;;  %v1598_v3 = vpop.f32.mrb[84].mxu1  ;;  %v5343_v16 = vld [vmem:[%s7533_s6 + $0x10] sm:$0xff]  }
 0x81c   :  { %v5582_v22 = vpop.eup %5581  ;;  %v6616_v23 = vadd.f32 %v6575_v17, %v1598_v3  ;;  %v4898_v24 = vpop.f32.mrb[85].mxu1  ;;  %v1712_v27 = vpack.c.bf16 %v1700_v49, %v1699_v18  ;;  %v5344_v18 = vld [vmem:[%s7533_s6 + $0x18] sm:$0xff]   ;;  %v5345_v49 = vld [vmem:[%s7528_s5 + $0x80] sm:$0xff]  }
 0x81d   :  { %5591 = vrcp.f32 %v1661_v21  ;;  %v1662_v28 = vadd.f32 1.0, %v5582_v22  ;;  %v1601_v7 = vpop.f32.mrb[86].mxu1  ;;  %4931 = vmatpush3.bf16.msra.mxu1 %v5345_v49  ;;  %v5346_v21 = vld [vmem:[%s7528_s5 + $0x88] sm:$0xff]   ;;  %v5880_v22 = vld [vmem:[%s7534_s4] sm:$0xff] }
 0x81e   :  { %v4266_v32 = vmul.f32 -1.442695, %v6616_v23  ;;  %v6620_v33 = vadd.f32 %v6575_v17, %v1601_v7  ;;  %2150 = vrot.lane.b32.xlu1 %v1712_v27, %s5919_s29  ;;  %v4899_v29 = vpop.f32.mrb[87].mxu1  ;;  %4907 = vmatpush3.bf16.msra.mxu0 %v1712_v27 }
 0x81f   :  { %v5584_v35 = vpop.eup %5583  ;;  %5593 = vrcp.f32 %v1662_v28  ;;  %4908 = vmatprep.subr.bf16.mxu0 %v5916_v0  ;;  %4932 = vmatprep.subr.bf16.mxu1 %v5916_v0  ;;  %v5881_v28 = vld [vmem:[%s7534_s4 + $0x8] sm:$0xff] }
 0x820   :  { %5595 = vpow2.f32 %v4266_v32  ;;  %v4267_v31 = vmul.f32 -1.442695, %v6620_v33  ;;  %v1701_v38 = vmul.f32 %v5584_v35, %v6588_v39 }
 0x821   :  { %v5586_v34 = vpop.eup %5585  ;;  %4933 = vmatpush3.bf16.msra.mxu1 %v5346_v21 }
 0x822   :  { %v5588_v13 = vpop.eup %5587  ;;  %v1702_v37 = vmul.f32 %v5586_v34, %v6592_v50  ;;  %5597 = vpow2.f32 %v4267_v31  ;;  %4934 = vmatprep.subr.bf16.mxu1 %v5916_v0  ;;  %v5347_v31 = vld [vmem:[%s7528_s5 + $0x90] sm:$0xff]   ;;  %v5348_v34 = vld [vmem:[%s7528_s5 + $0x98] sm:$0xff]  }
 0x823   :  { %v1663_v36 = vadd.f32 1.0, %v5588_v13  ;;  %v1606_v19 = vpop.f32.mrb[88].mxu1 }
 0x824   :  { %v5590_v42 = vpop.eup %5589  ;;  %v1607_v43 = vadd.f32 %v6575_v17, %v1606_v19  ;;  %v4902_v44 = vpop.f32.mrb[89].mxu1  ;;  %v1713_v53 = vpack.c.bf16 %v1702_v37, %v1701_v38 }
 0x825   :  { %5599 = vrcp.f32 %v1663_v36  ;;  %v1664_v55 = vadd.f32 1.0, %v5590_v42  ;;  %v1609_v47 = vpop.f32.mrb[90].mxu1  ;;  %4935 = vmatpush3.bf16.msra.mxu1 %v5347_v31 }
 0x826   :  { %v4268_v52 = vmul.f32 -1.442695, %v1607_v43  ;;  %v1610_v48 = vadd.f32 %v6575_v17, %v1609_v47  ;;  %2152 = vrot.lane.b32.xlu1 %v1713_v53, %s5919_s29  ;;  %v4903_v40 = vpop.f32.mrb[91].mxu1  ;;  %4909 = vmatpush3.bf16.msra.mxu0 %v1713_v53 }
 0x827   :  { %v5592_v39 = vpop.eup %5591  ;;  %5601 = vrcp.f32 %v1664_v55  ;;  %4910 = vmatprep.subr.bf16.mxu0 %v5916_v0  ;;  %4936 = vmatprep.subr.bf16.mxu1 %v5916_v0 }
 0x828   :  { %5603 = vpow2.f32 %v4268_v52  ;;  %v4269_v50 = vmul.f32 -1.442695, %v1610_v48  ;;  %v1703_v63 = vmul.f32 %v5592_v39, %v6596_v46 }
 0x829   :  { %v5594_v58 = vpop.eup %5593  ;;  %4937 = vmatpush3.bf16.msra.mxu1 %v5348_v34 }
 0x82a   :  { %v5596_v62 = vpop.eup %5595  ;;  %v1704_v11 = vmul.f32 %v5594_v58, %v6600_v4  ;;  %5605 = vpow2.f32 %v4269_v50  ;;  %4972 = vmatprep.subr.bf16.mxu1 %v5916_v0  ;;  %v4277_v58 = vld [vmem:[%s7530_s7 + $0x6] ss:$0 sm:$0xff] }
 0x82b   :  { %v1665_v41 = vadd.f32 1.0, %v5596_v62 }
 0x82c   :  { %v5598_v20 = vpop.eup %5597  ;;  %v1714_v17 = vpack.c.bf16 %v1704_v11, %v1703_v63 }
 0x82d   :  { %5607 = vrcp.f32 %v1665_v41  ;;  %v1666_v45 = vadd.f32 1.0, %v5598_v20 }
 0x82e   :  { %2154 = vrot.lane.b32.xlu1 %v1714_v17, %s5919_s29  ;;  %4911 = vmatpush3.bf16.msra.mxu0 %v1714_v17 }
 0x82f   :  { %v5600_v51 = vpop.eup %5599  ;;  %5609 = vrcp.f32 %v1666_v45  ;;  %4912 = vmatprep.subr.bf16.mxu0 %v5916_v0 }
 0x830   :  { %v1705_v54 = vmul.f32 %v5600_v51, %v6604_v59 }
 0x831   :  { %v5602_v6 = vpop.eup %5601 }
 0x832   :  { %v5604_v56 = vpop.eup %5603  ;;  %v1706_v46 = vmul.f32 %v5602_v6, %v6608_v30 }
 0x833   :  { %v1667_v4 = vadd.f32 1.0, %v5604_v56  ;;  %v5882_v56 = vld [vmem:[%s7536_s2 + $0x38] sm:$0xff]  }
 0x834   :  { %v5606_v57 = vpop.eup %5605  ;;  %v1715_v25 = vpack.c.bf16 %v1706_v46, %v1705_v54  ;;  %v5883_v54 = vld [vmem:[%s7536_s2] sm:$0xff]  }
 0x835   :  { %5611 = vrcp.f32 %v1667_v4  ;;  %v1668_v61 = vadd.f32 1.0, %v5606_v57  ;;  %v5884_v46 = vld [vmem:[%s7536_s2 + $0x40] sm:$0xff]   ;;  %v5885_v4 = vld [vmem:[%s7536_s2 + $0x8] sm:$0xff]  }
 0x836   :  { %2156 = vrot.lane.b32.xlu1 %v1715_v25, %s5919_s29  ;;  %4913 = vmatpush3.bf16.msra.mxu0 %v1715_v25  ;;  %v5886_v57 = vld [vmem:[%s7536_s2 + $0x48] sm:$0xff]   ;;  %v5887_v25 = vld [vmem:[%s7536_s2 + $0x10] sm:$0xff]  }
 0x837   :  { %v5608_v26 = vpop.eup %5607  ;;  %5613 = vrcp.f32 %v1668_v61  ;;  %4914 = vmatprep.subr.bf16.mxu0 %v5916_v0  ;;  %v5888_v61 = vld [vmem:[%s7536_s2 + $0x50] sm:$0xff]  }
 0x838   :  { %v1707_v2 = vmul.f32 %v5608_v26, %v6616_v23  ;;  %v5889_v26 = vld [vmem:[%s7536_s2 + $0x18] sm:$0xff]  }
 0x839   :  { %v5610_v5 = vpop.eup %5609 }
 0x83a   :  { %v1708_v1 = vmul.f32 %v5610_v5, %v6620_v33  ;;  %v5890_v5 = vld [vmem:[%s7536_s2 + $0x58] sm:$0xff]  }
 0x83c   :  { %v1716_v59 = vpack.c.bf16 %v1708_v1, %v1707_v2  ;;  %v5891_v2 = vld [vmem:[%s7536_s2 + $0x20] sm:$0xff]  }
 0x83d   :  { %v5892_v1 = vld [vmem:[%s7536_s2 + $0x60] sm:$0xff]  }
 0x83e   :  { %2158 = vrot.lane.b32.xlu1 %v1716_v59, %s5919_s29  ;;  %4915 = vmatpush3.bf16.msra.mxu0 %v1716_v59  ;;  %v5893_v59 = vld [vmem:[%s7536_s2 + $0x28] sm:$0xff]  }
 0x83f   :  { %v5612_v8 = vpop.eup %5611  ;;  %4916 = vmatprep.subr.bf16.mxu0 %v5916_v0 }
 0x840   :  { %v1709_v60 = vmul.f32 %v5612_v8, %v1607_v43  ;;  %v5894_v8 = vld [vmem:[%s7536_s2 + $0x68] sm:$0xff]  }
 0x841   :  { %v5614_v30 = vpop.eup %5613 }
 0x842   :  { %v1710_v9 = vmul.f32 %v5614_v30, %v1610_v48  ;;  %v5895_v30 = vld [vmem:[%s7536_s2 + $0x30] sm:$0xff]  }
 0x844   :  { %v1717_v10 = vpack.c.bf16 %v1710_v9, %v1709_v60  ;;  %v5349_v60 = vld [vmem:[%s7528_s5 + $0xa0] sm:$0xff]   ;;  %v5350_v9 = vld [vmem:[%s7528_s5 + $0xa8] sm:$0xff]  }
 0x846   :  { %2160 = vrot.lane.b32.xlu1 %v1717_v10, %s5919_s29  ;;  %4917 = vmatpush3.bf16.msra.mxu0 %v1717_v10  ;;  %v5351_v10 = vld [vmem:[%s7528_s5 + $0xb0] sm:$0xff]  }
 0x847   :  { %4922 = vmatprep.subr.bf16.mxu0 %v5916_v0 }
 0x849   :  { %4919 = vmatmul.mubr.msk.bf16.vlgmr.msra.gmra.mrb[92].mxu0 %vm567_vm4, %v5879_v12  ;;  %v5352_v12 = vld [vmem:[%s7528_s5 + $0xb8] sm:$0xff]  }
 0x84a   :  { %4926 = vmatprep.mubr.msk.bf16.mxu0 %vm5917_vm0, %v5916_v0  ;;  %4923 = vmatpush3.bf16.msra.mxu0 %v5343_v16  ;;  %v5353_v16 = vld [vmem:[%s7528_s5 + $0xc0] sm:$0xff]  }
 0x84b   :  { %4924 = vmatprep.subr.bf16.mxu0 %v5916_v0 }
 0x84e   :  { %4925 = vmatpush3.bf16.msra.mxu0 %v5344_v18  ;;  %v5354_v18 = vld [vmem:[%s7528_s5 + $0xc8] sm:$0xff]  }
 0x84f   :  { %4942 = vmatprep.subr.bf16.mxu0 %v5916_v0 }
 0x91c   :  { %v1752_v3 = vpop.f32.mrb[92].mxu0 }
 0x91d   :  { %v1759_v23 = vmul.f32 %v5880_v22, %v1752_v3  ;;  %v4920_v24 = vpop.f32.mrb[93].mxu0 }
 0x91e   :  { %v1755_v27 = vpop.f32.mrb[94].mxu0 }
 0x91f   :  { %v1760_v7 = vmul.f32 %v5881_v28, %v1755_v27  ;;  %v4921_v32 = vpop.f32.mrb[95].mxu0  ;;  %v1761_v33 = vadd.f32 %v1759_v23, %v6277_v14  ;;  %v4271_v14 = vld [vmem:[%s7535_s8 + $0x1] ss:$0 sm:$0xff] }
 0x921   :  { %v1762_v29 = vadd.f32 %v1760_v7, %v6279_v15 }
 0x923   :  { %v1767_v35 = vpack.c.bf16 %v1762_v29, %v1761_v33 }
 0x925   :  { %4927 = vmatmul.mubr.msk.bf16.vlgmr.msra.gmra.mrb[96].mxu0 %vm110_vm1, %v1767_v35 }
 0x926   :  { %4944 = vmatprep.mubr.msk.bf16.mxu0 %vm5917_vm0, %v5916_v0 }
 0x9f8   :  { %v1822_v15 = vpop.f32.mrb[96].mxu0 }
 0x9f9   :  { %v1823_v13 = vadd.f32 %v4271_v14, %v1822_v15  ;;  %v4928_v38 = vpop.f32.mrb[97].mxu0 }
 0x9fa   :  { %v1825_v37 = vpop.f32.mrb[98].mxu0 }
 0x9fb   :  { %v4275_v36 = vmul.f32 -1.442695, %v1823_v13  ;;  %v1826_v19 = vadd.f32 %v4271_v14, %v1825_v37  ;;  %v4929_v42 = vpop.f32.mrb[99].mxu0 }
 0x9fd   :  { %5615 = vpow2.f32 %v4275_v36  ;;  %v4276_v43 = vmul.f32 -1.442695, %v1826_v19 }
 0x9ff   :  { %5617 = vpow2.f32 %v4276_v43 }
 0xa07   :  { %v5616_v44 = vpop.eup %5615 }
 0xa08   :  { %v1835_v53 = vadd.f32 1.0, %v5616_v44 }
 0xa09   :  { %v5618_v55 = vpop.eup %5617 }
 0xa0a   :  { %5619 = vrcp.f32 %v1835_v53  ;;  %v1836_v47 = vadd.f32 1.0, %v5618_v55 }
 0xa0c   :  { %5621 = vrcp.f32 %v1836_v47 }
 0xa14   :  { %v5620_v52 = vpop.eup %5619 }
 0xa15   :  { %v1841_v40 = vmul.f32 %v5620_v52, %v1823_v13 }
 0xa16   :  { %v5622_v48 = vpop.eup %5621 }
 0xa17   :  { %v1842_v39 = vmul.f32 %v5622_v48, %v1826_v19 }
 0xa19   :  { %v1851_v50 = vpack.c.bf16 %v1842_v39, %v1841_v40 }
 0xa1b   :  { %4939 = vmatmul.mubr.msk.bf16.vlgmr.msra.gmra.mrb[92].mxu1 %vm790_vm5, %v1851_v50 }
 0xa1c   :  { %4974 = vmatprep.mubr.msk.bf16.mxu1 %vm5917_vm0, %v5916_v0 }
 0xaee   :  { %v1918_v62 = vpop.f32.mrb[92].mxu1 }
 0xaef   :  { %v1919_v63 = vadd.f32 %v4277_v58, %v1918_v62  ;;  %v4940_v11 = vpop.f32.mrb[93].mxu1 }
 0xaf0   :  { %v1921_v41 = vpop.f32.mrb[94].mxu1 }
 0xaf1   :  { %v1922_v20 = vadd.f32 %v4277_v58, %v1921_v41  ;;  %v4941_v17 = vpop.f32.mrb[95].mxu1  ;;  %v6695_v45 = vadd.f32 %v1919_v63, %v1761_v33 }
 0xaf3   :  { %v6697_v51 = vadd.f32 %v1922_v20, %v1762_v29 }
 0xaf5   :  { %v1927_v6 = vpack.c.bf16 %v6697_v51, %v6695_v45 }
 0xaf7   :  { %4943 = vmatpush3.bf16.msra.mxu0 %v1927_v6  ;;  %4973 = vmatpush3.bf16.msra.mxu1 %v1927_v6 }
 0xaf8   :  { %5002 = vmatprep.subr.bf16.mxu0 %v5916_v0  ;;  %5042 = vmatprep.subr.bf16.mxu1 %v5916_v0 }
 0xafa   :  { %4975 = vmatmul.mubr.msk.bf16.vlgmr.msra.gmra.mrb[96].mxu1 %vm873_vm6, %v5882_v56  ;;  %4945 = vmatmul.mubr.msk.bf16.vlgmr.msra.gmra.mrb[100].mxu0 %vm873_vm6, %v5883_v54 }
 0xafb   :  { %4978 = vmatprep.mubr.msk.bf16.mxu1 %vm5917_vm0, %v5916_v0  ;;  %4948 = vmatprep.mubr.msk.bf16.mxu0 %vm5917_vm0, %v5916_v0 }
 0xafc   :  { %5003 = vmatpush3.bf16.msra.mxu0 %v5349_v60 }
 0xafd   :  { %5004 = vmatprep.subr.bf16.mxu0 %v5916_v0 }
 0xb00   :  { %5005 = vmatpush3.bf16.msra.mxu0 %v5350_v9  ;;  %v5355_v9 = vld [vmem:[%s7528_s5 + $0xd0] sm:$0xff]  }
 0xb01   :  { %5006 = vmatprep.subr.bf16.mxu0 %v5916_v0  ;;  %5043 = vmatpush3.bf16.msra.mxu1 %v5355_v9 }
 0xb02   :  { %4979 = vmatmul.mubr.msk.bf16.gmra.mrb[100].mxu1 %vm873_vm6, %v5884_v46  ;;  %4949 = vmatmul.mubr.msk.bf16.gmra.mrb[104].mxu0 %vm873_vm6, %v5885_v4 }
 0xb03   :  { %4982 = vmatprep.mubr.msk.bf16.mxu1 %vm5917_vm0, %v5916_v0  ;;  %4952 = vmatprep.mubr.msk.bf16.mxu0 %vm5917_vm0, %v5916_v0 }
 0xb04   :  { %5007 = vmatpush3.bf16.msra.mxu0 %v5351_v10  ;;  %5044 = vmatprep.subr.bf16.mxu1 %v5916_v0 }
 0xb05   :  { %5008 = vmatprep.subr.bf16.mxu0 %v5916_v0 }
 0xb08   :  { %5009 = vmatpush3.bf16.msra.mxu0 %v5352_v12 }
 0xb09   :  { %5010 = vmatprep.subr.bf16.mxu0 %v5916_v0 }
 0xb0a   :  { %4983 = vmatmul.mubr.msk.bf16.gmra.mrb[104].mxu1 %vm873_vm6, %v5886_v57  ;;  %4953 = vmatmul.mubr.msk.bf16.gmra.mrb[108].mxu0 %vm873_vm6, %v5887_v25 }
 0xb0b   :  { %4986 = vmatprep.mubr.msk.bf16.mxu1 %vm5917_vm0, %v5916_v0  ;;  %4956 = vmatprep.mubr.msk.bf16.mxu0 %vm5917_vm0, %v5916_v0 }
 0xb0c   :  { %5011 = vmatpush3.bf16.msra.mxu0 %v5353_v16 }
 0xb0d   :  { %5012 = vmatprep.subr.bf16.mxu0 %v5916_v0 }
 0xb10   :  { %5013 = vmatpush3.bf16.msra.mxu0 %v5354_v18 }
 0xb11   :  { %5074 = vmatprep.subr.bf16.mxu0 %v5916_v0 }
 0xb12   :  { %4987 = vmatmul.mubr.msk.bf16.gmra.mrb[108].mxu1 %vm873_vm6, %v5888_v61  ;;  %4957 = vmatmul.mubr.msk.bf16.gmra.mrb[112].mxu0 %vm873_vm6, %v5889_v26 }
 0xb13   :  { %4990 = vmatprep.mubr.msk.bf16.mxu1 %vm5917_vm0, %v5916_v0  ;;  %4960 = vmatprep.mubr.msk.bf16.mxu0 %vm5917_vm0, %v5916_v0 }
 0xb1a   :  { %4991 = vmatmul.mubr.msk.bf16.gmra.mrb[112].mxu1 %vm873_vm6, %v5890_v5  ;;  %4961 = vmatmul.mubr.msk.bf16.gmra.mrb[116].mxu0 %vm873_vm6, %v5891_v2 }
 0xb1b   :  { %4994 = vmatprep.mubr.msk.bf16.mxu1 %vm5917_vm0, %v5916_v0  ;;  %4964 = vmatprep.mubr.msk.bf16.mxu0 %vm5917_vm0, %v5916_v0 }
 0xb22   :  { %4995 = vmatmul.mubr.msk.bf16.gmra.mrb[116].mxu1 %vm873_vm6, %v5892_v1  ;;  %4965 = vmatmul.mubr.msk.bf16.gmra.mrb[120].mxu0 %vm873_vm6, %v5893_v59 }
 0xb23   :  { %4998 = vmatprep.mubr.msk.bf16.mxu1 %vm5917_vm0, %v5916_v0  ;;  %4968 = vmatprep.mubr.msk.bf16.mxu0 %vm5917_vm0, %v5916_v0 }
 0xb2a   :  { %4999 = vmatmul.mubr.msk.bf16.gmra.mrb[120].mxu1 %vm873_vm6, %v5894_v8  ;;  %4969 = vmatmul.mubr.msk.bf16.gmra.mrb[124].mxu0 %vm873_vm6, %v5895_v30 }
 0xb2b   :  { %5014 = vmatprep.mubr.msk.bf16.mxu0 %vm5917_vm0, %v5916_v0  ;;  %5046 = vmatprep.mubr.msk.bf16.mxu1 %vm5917_vm0, %v5916_v0 }
 0xbcd   :  { %v2051_v49 = vpop.f32.mrb[96].mxu1  ;;  %v6811_v21 = vpop.f32.mrb[100].mxu0 }
 0xbce   :  { %v4976_v3 = vpop.f32.mrb[97].mxu1  ;;  %v4946_v22 = vpop.f32.mrb[101].mxu0 }
 0xbcf   :  { %v2054_v23 = vpop.f32.mrb[98].mxu1  ;;  %v6813_v24 = vpop.f32.mrb[102].mxu0 }
 0xbd0   :  { %v2113_v27 = vpack.c.bf16 %v2054_v23, %v2051_v49  ;;  %v4977_v28 = vpop.f32.mrb[99].mxu1  ;;  %v2106_v7 = vpack.c.bf16 %v6813_v24, %v6811_v21  ;;  %v4947_v32 = vpop.f32.mrb[103].mxu0 }
 0xbd2   :  { %2127 = vrot.lane.b32.xlu0 %v2113_v27, %s5918_s28 }
 0xbd5   :  { %v2059_v33 = vpop.f32.mrb[100].mxu1  ;;  %v6818_v29 = vpop.f32.mrb[104].mxu0 }
 0xbd6   :  { %v4980_v35 = vpop.f32.mrb[101].mxu1  ;;  %v4950_v31 = vpop.f32.mrb[105].mxu0 }
 0xbd7   :  { %v2062_v34 = vpop.f32.mrb[102].mxu1  ;;  %v6820_v14 = vpop.f32.mrb[106].mxu0 }
 0xbd8   :  { %v2114_v15 = vpack.c.bf16 %v2062_v34, %v2059_v33  ;;  %v4981_v13 = vpop.f32.mrb[103].mxu1  ;;  %v2107_v38 = vpack.c.bf16 %v6820_v14, %v6818_v29  ;;  %v4951_v37 = vpop.f32.mrb[107].mxu0 }
 0xbda   :  { %2129 = vrot.lane.b32.xlu0 %v2114_v15, %s5918_s28  ;;  %v2149_v15 = vpop.permute.xlu1 %2148 }
 0xbdd   :  { %v2067_v36 = vpop.f32.mrb[104].mxu1  ;;  %v6825_v19 = vpop.f32.mrb[108].mxu0 }
 0xbde   :  { %v4984_v42 = vpop.f32.mrb[105].mxu1  ;;  %v4954_v43 = vpop.f32.mrb[109].mxu0 }
 0xbdf   :  { %v2070_v44 = vpop.f32.mrb[106].mxu1  ;;  %v6827_v53 = vpop.f32.mrb[110].mxu0 }
 0xbe0   :  { %v2115_v55 = vpack.c.bf16 %v2070_v44, %v2067_v36  ;;  %v4985_v47 = vpop.f32.mrb[107].mxu1  ;;  %v2108_v52 = vpack.c.bf16 %v6827_v53, %v6825_v19  ;;  %v4955_v48 = vpop.f32.mrb[111].mxu0 }
 0xbe1   :  { %v2151_v42 = vpop.permute.xlu1 %2150 }
 0xbe2   :  { %2131 = vrot.lane.b32.xlu0 %v2115_v55, %s5918_s28 }
 0xbe5   :  { %v2075_v40 = vpop.f32.mrb[108].mxu1  ;;  %v6832_v39 = vpop.f32.mrb[112].mxu0 }
 0xbe6   :  { %v4988_v50 = vpop.f32.mrb[109].mxu1  ;;  %v4958_v58 = vpop.f32.mrb[113].mxu0 }
 0xbe7   :  { %v2078_v62 = vpop.f32.mrb[110].mxu1  ;;  %v6834_v63 = vpop.f32.mrb[114].mxu0 }
 0xbe8   :  { %v2116_v11 = vpack.c.bf16 %v2078_v62, %v2075_v40  ;;  %v4989_v41 = vpop.f32.mrb[111].mxu1  ;;  %v2109_v20 = vpack.c.bf16 %v6834_v63, %v6832_v39  ;;  %v4959_v17 = vpop.f32.mrb[115].mxu0 }
 0xbe9   :  { %v2153_v24 = vpop.permute.xlu1 %2152  ;;  %v6900_v17 = vld [vmem:[%s7530_s7 + $0x7] ss:$0 sm:$0xff] }
 0xbea   :  { %2133 = vrot.lane.b32.xlu0 %v2116_v11, %s5918_s28 }
 0xbed   :  { %v2083_v6 = vpop.f32.mrb[112].mxu1  ;;  %v6839_v56 = vpop.f32.mrb[116].mxu0 }
 0xbee   :  { %v4992_v54 = vpop.f32.mrb[113].mxu1  ;;  %v4962_v46 = vpop.f32.mrb[117].mxu0 }
 0xbef   :  { %v2086_v4 = vpop.f32.mrb[114].mxu1  ;;  %v1997_v57 = vpop.f32.mrb[118].mxu0 }
 0xbf0   :  { %v2117_v25 = vpack.c.bf16 %v2086_v4, %v2083_v6  ;;  %v4993_v61 = vpop.f32.mrb[115].mxu1  ;;  %v2110_v26 = vpack.c.bf16 %v1997_v57, %v6839_v56  ;;  %v4963_v5 = vpop.f32.mrb[119].mxu0 }
 0xbf1   :  { %v2155_v14 = vpop.permute.xlu1 %2154 }
 0xbf2   :  { %2135 = vrot.lane.b32.xlu0 %v2117_v25, %s5918_s28 }
 0xbf5   :  { %v2091_v2 = vpop.f32.mrb[116].mxu1  ;;  %v2002_v1 = vpop.f32.mrb[120].mxu0 }
 0xbf6   :  { %v4996_v59 = vpop.f32.mrb[117].mxu1  ;;  %v4966_v8 = vpop.f32.mrb[121].mxu0 }
 0xbf7   :  { %v2094_v30 = vpop.f32.mrb[118].mxu1  ;;  %v2005_v60 = vpop.f32.mrb[122].mxu0 }
 0xbf8   :  { %v2118_v10 = vpack.c.bf16 %v2094_v30, %v2091_v2  ;;  %v4997_v12 = vpop.f32.mrb[119].mxu1  ;;  %v2111_v16 = vpack.c.bf16 %v2005_v60, %v2002_v1  ;;  %v4967_v18 = vpop.f32.mrb[123].mxu0 }
 0xbf9   :  { %v2157_v53 = vpop.permute.xlu1 %2156 }
 0xbfa   :  { %2137 = vrot.lane.b32.xlu0 %v2118_v10, %s5918_s28 }
 0xbfd   :  { %v2099_v49 = vpop.f32.mrb[120].mxu1  ;;  %v2010_v3 = vpop.f32.mrb[124].mxu0 }
 0xbfe   :  { %v5000_v22 = vpop.f32.mrb[121].mxu1  ;;  %v4970_v23 = vpop.f32.mrb[125].mxu0 }
 0xbff   :  { %v2102_v27 = vpop.f32.mrb[122].mxu1  ;;  %v2013_v28 = vpop.f32.mrb[126].mxu0 }
 0xc00   :  { %v2119_v32 = vpack.c.bf16 %v2102_v27, %v2099_v49  ;;  %v5001_v33 = vpop.f32.mrb[123].mxu1  ;;  %v2112_v35 = vpack.c.bf16 %v2013_v28, %v2010_v3  ;;  %v4971_v31 = vpop.f32.mrb[127].mxu0 }
 0xc01   :  { %v2159_v39 = vpop.permute.xlu1 %2158 }
 0xc02   :  { %2139 = vrot.lane.b32.xlu0 %v2119_v32, %s5918_s28 }
 0xc05   :  { %v2161_v63 = vpop.permute.xlu1 %2160 }
 0xc44   :  { %v2128_v34 = vpop.permute.xlu0 %2127 }
 0xc45   :  { %v2164_v13 = vsel %vm110_vm1, %v2106_v7, %v2128_v34 }
 0xc46   :  { %v2184_v37 = vsel %vm790_vm5, %v2164_v13, %v2149_v15 }
 0xc47   :  { %5015 = vmatmul.mubr.msk.bf16.vlgmr.msra.gmra.mrb[128].mxu0 %vm1273_vm7, %v2184_v37 }
 0xc48   :  { %5018 = vmatprep.mubr.msk.bf16.mxu0 %vm5917_vm0, %v5916_v0 }
 0xc4c   :  { %v2130_v36 = vpop.permute.xlu0 %2129 }
 0xc4d   :  { %v2167_v43 = vsel %vm110_vm1, %v2107_v38, %v2130_v36 }
 0xc4e   :  { %v2186_v44 = vsel %vm790_vm5, %v2167_v43, %v2151_v42 }
 0xc4f   :  { %5019 = vmatmul.mubr.msk.bf16.gmra.mrb[132].mxu0 %vm1273_vm7, %v2186_v44 }
 0xc50   :  { %5022 = vmatprep.mubr.msk.bf16.mxu0 %vm5917_vm0, %v5916_v0 }
 0xc54   :  { %v2132_v21 = vpop.permute.xlu0 %2131 }
 0xc55   :  { %v2170_v7 = vsel %vm110_vm1, %v2108_v52, %v2132_v21 }
 0xc56   :  { %v2188_v55 = vsel %vm790_vm5, %v2170_v7, %v2153_v24 }
 0xc57   :  { %5023 = vmatmul.mubr.msk.bf16.gmra.mrb[136].mxu0 %vm1273_vm7, %v2188_v55 }
 0xc58   :  { %5026 = vmatprep.mubr.msk.bf16.mxu0 %vm5917_vm0, %v5916_v0 }
 0xc5c   :  { %v2134_v29 = vpop.permute.xlu0 %2133 }
 0xc5d   :  { %v2173_v38 = vsel %vm110_vm1, %v2109_v20, %v2134_v29  ;;  %v5356_v20 = vld [vmem:[%s7528_s5 + $0xd8] sm:$0xff]  }
 0xc5e   :  { %v2190_v47 = vsel %vm790_vm5, %v2173_v38, %v2155_v14  ;;  %5045 = vmatpush3.bf16.msra.mxu1 %v5356_v20 }
 0xc5f   :  { %5027 = vmatmul.mubr.msk.bf16.gmra.mrb[140].mxu0 %vm1273_vm7, %v2190_v47  ;;  %5092 = vmatprep.subr.bf16.mxu1 %v5916_v0 }
 0xc60   :  { %5030 = vmatprep.mubr.msk.bf16.mxu0 %vm5917_vm0, %v5916_v0 }
 0xc64   :  { %v2136_v19 = vpop.permute.xlu0 %2135 }
 0xc65   :  { %v2176_v52 = vsel %vm110_vm1, %v2110_v26, %v2136_v19 }
 0xc66   :  { %v2192_v48 = vsel %vm790_vm5, %v2176_v52, %v2157_v53 }
 0xc67   :  { %5031 = vmatmul.mubr.msk.bf16.gmra.mrb[144].mxu0 %vm1273_vm7, %v2192_v48 }
 0xc68   :  { %5034 = vmatprep.mubr.msk.bf16.mxu0 %vm5917_vm0, %v5916_v0 }
 0xc6c   :  { %v2138_v40 = vpop.permute.xlu0 %2137 }
 0xc6d   :  { %v2179_v50 = vsel %vm110_vm1, %v2111_v16, %v2138_v40 }
 0xc6e   :  { %v2194_v58 = vsel %vm790_vm5, %v2179_v50, %v2159_v39 }
 0xc6f   :  { %5035 = vmatmul.mubr.msk.bf16.gmra.mrb[148].mxu0 %vm1273_vm7, %v2194_v58 }
 0xc70   :  { %5038 = vmatprep.mubr.msk.bf16.mxu0 %vm5917_vm0, %v5916_v0 }
 0xc74   :  { %v2140_v62 = vpop.permute.xlu0 %2139 }
 0xc75   :  { %v2182_v11 = vsel %vm110_vm1, %v2112_v35, %v2140_v62 }
 0xc76   :  { %v2196_v41 = vsel %vm790_vm5, %v2182_v11, %v2161_v63 }
 0xc77   :  { %5039 = vmatmul.mubr.msk.bf16.gmra.mrb[152].mxu0 %vm1273_vm7, %v2196_v41 }
 0xc78   :  { %5088 = vmatprep.mubr.msk.bf16.mxu0 %vm5917_vm0, %v5916_v0 }
 0xd1a   :  { %v2298_v6 = vpop.f32.mrb[128].mxu0 }
 0xd1b   :  { %v2299_v56 = vadd.f32 %v6900_v17, %v2298_v6  ;;  %v5016_v54 = vpop.f32.mrb[129].mxu0 }
 0xd1c   :  { %v2301_v46 = vpop.f32.mrb[130].mxu0 }
 0xd1d   :  { %v4311_v4 = vmul.f32 -1.442695, %v2299_v56  ;;  %v2302_v57 = vadd.f32 %v6900_v17, %v2301_v46  ;;  %v5017_v25 = vpop.f32.mrb[131].mxu0 }
 0xd1f   :  { %5623 = vpow2.f32 %v4311_v4  ;;  %v4312_v61 = vmul.f32 -1.442695, %v2302_v57 }
 0xd21   :  { %5625 = vpow2.f32 %v4312_v61 }
 0xd22   :  { %v2306_v26 = vpop.f32.mrb[132].mxu0 }
 0xd23   :  { %v6905_v5 = vadd.f32 %v6900_v17, %v2306_v26  ;;  %v5020_v2 = vpop.f32.mrb[133].mxu0 }
 0xd24   :  { %v2309_v1 = vpop.f32.mrb[134].mxu0 }
 0xd25   :  { %v4313_v59 = vmul.f32 -1.442695, %v6905_v5  ;;  %v6909_v8 = vadd.f32 %v6900_v17, %v2309_v1  ;;  %v5021_v30 = vpop.f32.mrb[135].mxu0 }
 0xd27   :  { %5627 = vpow2.f32 %v4313_v59  ;;  %v4314_v60 = vmul.f32 -1.442695, %v6909_v8 }
 0xd29   :  { %v5624_v9 = vpop.eup %5623  ;;  %5629 = vpow2.f32 %v4314_v60 }
 0xd2a   :  { %v2395_v10 = vadd.f32 1.0, %v5624_v9  ;;  %v2314_v12 = vpop.f32.mrb[136].mxu0 }
 0xd2b   :  { %v5626_v16 = vpop.eup %5625  ;;  %v6913_v18 = vadd.f32 %v6900_v17, %v2314_v12  ;;  %v5024_v49 = vpop.f32.mrb[137].mxu0 }
 0xd2c   :  { %5631 = vrcp.f32 %v2395_v10  ;;  %v2396_v3 = vadd.f32 1.0, %v5626_v16  ;;  %v2317_v22 = vpop.f32.mrb[138].mxu0 }
 0xd2d   :  { %v4315_v23 = vmul.f32 -1.442695, %v6913_v18  ;;  %v6917_v27 = vadd.f32 %v6900_v17, %v2317_v22  ;;  %v5025_v28 = vpop.f32.mrb[139].mxu0 }
 0xd2e   :  { %5633 = vrcp.f32 %v2396_v3 }
 0xd2f   :  { %5635 = vpow2.f32 %v4315_v23  ;;  %v4316_v32 = vmul.f32 -1.442695, %v6917_v27 }
 0xd31   :  { %v5628_v33 = vpop.eup %5627  ;;  %5637 = vpow2.f32 %v4316_v32 }
 0xd32   :  { %v2397_v35 = vadd.f32 1.0, %v5628_v33  ;;  %v2322_v31 = vpop.f32.mrb[140].mxu0 }
 0xd33   :  { %v5630_v34 = vpop.eup %5629  ;;  %v6921_v15 = vadd.f32 %v6900_v17, %v2322_v31  ;;  %v5028_v13 = vpop.f32.mrb[141].mxu0 }
 0xd34   :  { %5639 = vrcp.f32 %v2397_v35  ;;  %v2398_v37 = vadd.f32 1.0, %v5630_v34  ;;  %v2325_v36 = vpop.f32.mrb[142].mxu0 }
 0xd35   :  { %v4317_v42 = vmul.f32 -1.442695, %v6921_v15  ;;  %v6925_v43 = vadd.f32 %v6900_v17, %v2325_v36  ;;  %v5029_v44 = vpop.f32.mrb[143].mxu0 }
 0xd36   :  { %v5632_v21 = vpop.eup %5631  ;;  %5641 = vrcp.f32 %v2398_v37 }
 0xd37   :  { %5643 = vpow2.f32 %v4317_v42  ;;  %v4318_v24 = vmul.f32 -1.442695, %v6925_v43  ;;  %v2437_v29 = vmul.f32 %v5632_v21, %v2299_v56 }
 0xd38   :  { %v5634_v7 = vpop.eup %5633 }
 0xd39   :  { %v5636_v55 = vpop.eup %5635  ;;  %v2438_v14 = vmul.f32 %v5634_v7, %v2302_v57  ;;  %5645 = vpow2.f32 %v4318_v24 }
 0xd3a   :  { %v2399_v38 = vadd.f32 1.0, %v5636_v55  ;;  %v2330_v47 = vpop.f32.mrb[144].mxu0 }
 0xd3b   :  { %v5638_v19 = vpop.eup %5637  ;;  %v2455_v53 = vpack.c.bf16 %v2438_v14, %v2437_v29  ;;  %v6929_v52 = vadd.f32 %v6900_v17, %v2330_v47  ;;  %v5032_v48 = vpop.f32.mrb[145].mxu0 }
 0xd3c   :  { %5647 = vrcp.f32 %v2399_v38  ;;  %v2400_v40 = vadd.f32 1.0, %v5638_v19  ;;  %v2333_v39 = vpop.f32.mrb[146].mxu0 }
 0xd3d   :  { %v4319_v50 = vmul.f32 -1.442695, %v6929_v52  ;;  %v6933_v58 = vadd.f32 %v6900_v17, %v2333_v39  ;;  %v5033_v62 = vpop.f32.mrb[147].mxu0  ;;  %5047 = vmatmul.mubr.msk.bf16.vlgmr.msra.gmra.mrb[124].mxu1 %vm110_vm1, %v2455_v53 }
 0xd3e   :  { %v5640_v63 = vpop.eup %5639  ;;  %5649 = vrcp.f32 %v2400_v40  ;;  %5050 = vmatprep.mubr.msk.bf16.mxu1 %vm5917_vm0, %v5916_v0 }
 0xd3f   :  { %5651 = vpow2.f32 %v4319_v50  ;;  %v4320_v11 = vmul.f32 -1.442695, %v6933_v58  ;;  %v2439_v6 = vmul.f32 %v5640_v63, %v6905_v5 }
 0xd40   :  { %v5642_v41 = vpop.eup %5641 }
 0xd41   :  { %v5644_v20 = vpop.eup %5643  ;;  %v2440_v56 = vmul.f32 %v5642_v41, %v6909_v8  ;;  %5653 = vpow2.f32 %v4320_v11  ;;  %v6976_v41 = vld [vmem:[%s7530_s7 + $0x8] ss:$0 sm:$0xff] }
 0xd42   :  { %v2401_v54 = vadd.f32 1.0, %v5644_v20  ;;  %v2338_v46 = vpop.f32.mrb[148].mxu0 }
 0xd43   :  { %v5646_v4 = vpop.eup %5645  ;;  %v2456_v57 = vpack.c.bf16 %v2440_v56, %v2439_v6  ;;  %v6942_v25 = vadd.f32 %v6900_v17, %v2338_v46  ;;  %v5036_v61 = vpop.f32.mrb[149].mxu0 }
 0xd44   :  { %5655 = vrcp.f32 %v2401_v54  ;;  %v2402_v26 = vadd.f32 1.0, %v5646_v4  ;;  %v2341_v2 = vpop.f32.mrb[150].mxu0 }
 0xd45   :  { %v4321_v1 = vmul.f32 -1.442695, %v6942_v25  ;;  %v2342_v59 = vadd.f32 %v6900_v17, %v2341_v2  ;;  %v5037_v30 = vpop.f32.mrb[151].mxu0  ;;  %5051 = vmatmul.mubr.msk.bf16.gmra.mrb[128].mxu1 %vm110_vm1, %v2456_v57 }
 0xd46   :  { %v5648_v5 = vpop.eup %5647  ;;  %5657 = vrcp.f32 %v2402_v26  ;;  %5054 = vmatprep.mubr.msk.bf16.mxu1 %vm5917_vm0, %v5916_v0 }
 0xd47   :  { %5659 = vpow2.f32 %v4321_v1  ;;  %v4322_v8 = vmul.f32 -1.442695, %v2342_v59  ;;  %v2441_v10 = vmul.f32 %v5648_v5, %v6913_v18 }
 0xd48   :  { %v5650_v60 = vpop.eup %5649 }
 0xd49   :  { %v5652_v9 = vpop.eup %5651  ;;  %v2442_v12 = vmul.f32 %v5650_v60, %v6917_v27  ;;  %5661 = vpow2.f32 %v4322_v8 }
 0xd4a   :  { %v2403_v16 = vadd.f32 1.0, %v5652_v9  ;;  %v2346_v49 = vpop.f32.mrb[152].mxu0 }
 0xd4b   :  { %v5654_v3 = vpop.eup %5653  ;;  %v2457_v22 = vpack.c.bf16 %v2442_v12, %v2441_v10  ;;  %v2347_v23 = vadd.f32 %v6900_v17, %v2346_v49  ;;  %v5040_v28 = vpop.f32.mrb[153].mxu0 }
 0xd4c   :  { %5663 = vrcp.f32 %v2403_v16  ;;  %v2404_v32 = vadd.f32 1.0, %v5654_v3  ;;  %v2349_v33 = vpop.f32.mrb[154].mxu0 }
 0xd4d   :  { %v4323_v35 = vmul.f32 -1.442695, %v2347_v23  ;;  %v2350_v31 = vadd.f32 %v6900_v17, %v2349_v33  ;;  %v5041_v34 = vpop.f32.mrb[155].mxu0  ;;  %5055 = vmatmul.mubr.msk.bf16.gmra.mrb[132].mxu1 %vm110_vm1, %v2457_v22 }
 0xd4e   :  { %v5656_v18 = vpop.eup %5655  ;;  %5665 = vrcp.f32 %v2404_v32  ;;  %5058 = vmatprep.mubr.msk.bf16.mxu1 %vm5917_vm0, %v5916_v0 }
 0xd4f   :  { %5667 = vpow2.f32 %v4323_v35  ;;  %v4324_v27 = vmul.f32 -1.442695, %v2350_v31  ;;  %v2443_v36 = vmul.f32 %v5656_v18, %v6921_v15 }
 0xd50   :  { %v5658_v13 = vpop.eup %5657 }
 0xd51   :  { %v5660_v37 = vpop.eup %5659  ;;  %v2444_v42 = vmul.f32 %v5658_v13, %v6925_v43  ;;  %5669 = vpow2.f32 %v4324_v27 }
 0xd52   :  { %v2405_v44 = vadd.f32 1.0, %v5660_v37 }
 0xd53   :  { %v5662_v21 = vpop.eup %5661  ;;  %v2458_v17 = vpack.c.bf16 %v2444_v42, %v2443_v36 }
 0xd54   :  { %5671 = vrcp.f32 %v2405_v44  ;;  %v2406_v24 = vadd.f32 1.0, %v5662_v21 }
 0xd55   :  { %5059 = vmatmul.mubr.msk.bf16.gmra.mrb[136].mxu1 %vm110_vm1, %v2458_v17 }
 0xd56   :  { %v5664_v7 = vpop.eup %5663  ;;  %5673 = vrcp.f32 %v2406_v24  ;;  %5062 = vmatprep.mubr.msk.bf16.mxu1 %vm5917_vm0, %v5916_v0 }
 0xd57   :  { %v2445_v14 = vmul.f32 %v5664_v7, %v6929_v52 }
 0xd58   :  { %v5666_v55 = vpop.eup %5665 }
 0xd59   :  { %v5668_v29 = vpop.eup %5667  ;;  %v2446_v15 = vmul.f32 %v5666_v55, %v6933_v58 }
 0xd5a   :  { %v2407_v43 = vadd.f32 1.0, %v5668_v29 }
 0xd5b   :  { %v5670_v38 = vpop.eup %5669  ;;  %v2459_v47 = vpack.c.bf16 %v2446_v15, %v2445_v14 }
 0xd5c   :  { %5675 = vrcp.f32 %v2407_v43  ;;  %v2408_v19 = vadd.f32 1.0, %v5670_v38 }
 0xd5d   :  { %5063 = vmatmul.mubr.msk.bf16.gmra.mrb[140].mxu1 %vm110_vm1, %v2459_v47 }
 0xd5e   :  { %v5672_v53 = vpop.eup %5671  ;;  %5677 = vrcp.f32 %v2408_v19  ;;  %5066 = vmatprep.mubr.msk.bf16.mxu1 %vm5917_vm0, %v5916_v0 }
 0xd5f   :  { %v2447_v40 = vmul.f32 %v5672_v53, %v6942_v25 }
 0xd60   :  { %v5674_v48 = vpop.eup %5673 }
 0xd61   :  { %v2448_v39 = vmul.f32 %v5674_v48, %v2342_v59 }
 0xd63   :  { %v2460_v50 = vpack.c.bf16 %v2448_v39, %v2447_v40 }
 0xd65   :  { %5067 = vmatmul.mubr.msk.bf16.gmra.mrb[144].mxu1 %vm110_vm1, %v2460_v50 }
 0xd66   :  { %v5676_v52 = vpop.eup %5675  ;;  %5070 = vmatprep.mubr.msk.bf16.mxu1 %vm5917_vm0, %v5916_v0 }
 0xd67   :  { %v2449_v62 = vmul.f32 %v5676_v52, %v2347_v23 }
 0xd68   :  { %v5678_v58 = vpop.eup %5677 }
 0xd69   :  { %v2450_v63 = vmul.f32 %v5678_v58, %v2350_v31 }
 0xd6b   :  { %v2461_v11 = vpack.c.bf16 %v2450_v63, %v2449_v62 }
 0xd6d   :  { %5071 = vmatmul.mubr.msk.bf16.gmra.mrb[148].mxu1 %vm110_vm1, %v2461_v11 }
 0xd6e   :  { %5096 = vmatprep.mubr.msk.bf16.mxu1 %vm5917_vm0, %v5916_v0 }
 0xe10   :  { %v2534_v20 = vpop.f32.mrb[124].mxu1 }
 0xe11   :  { %v2535_v6 = vadd.f32 %v6976_v41, %v2534_v20  ;;  %v5048_v56 = vpop.f32.mrb[125].mxu1 }
 0xe12   :  { %v2537_v54 = vpop.f32.mrb[126].mxu1 }
 0xe13   :  { %v4335_v46 = vmul.f32 -1.442695, %v2535_v6  ;;  %v2538_v4 = vadd.f32 %v6976_v41, %v2537_v54  ;;  %v5049_v57 = vpop.f32.mrb[127].mxu1 }
 0xe15   :  { %5679 = vpow2.f32 %v4335_v46  ;;  %v4336_v25 = vmul.f32 -1.442695, %v2538_v4 }
 0xe17   :  { %5681 = vpow2.f32 %v4336_v25 }
 0xe18   :  { %v2542_v61 = vpop.f32.mrb[128].mxu1 }
 0xe19   :  { %v6981_v26 = vadd.f32 %v6976_v41, %v2542_v61  ;;  %v5052_v2 = vpop.f32.mrb[129].mxu1 }
 0xe1a   :  { %v2545_v1 = vpop.f32.mrb[130].mxu1 }
 0xe1b   :  { %v4337_v59 = vmul.f32 -1.442695, %v6981_v26  ;;  %v6985_v30 = vadd.f32 %v6976_v41, %v2545_v1  ;;  %v5053_v5 = vpop.f32.mrb[131].mxu1 }
 0xe1d   :  { %5683 = vpow2.f32 %v4337_v59  ;;  %v4338_v8 = vmul.f32 -1.442695, %v6985_v30 }
 0xe1f   :  { %v5680_v60 = vpop.eup %5679  ;;  %5685 = vpow2.f32 %v4338_v8 }
 0xe20   :  { %v2631_v9 = vadd.f32 1.0, %v5680_v60  ;;  %v2550_v10 = vpop.f32.mrb[132].mxu1 }
 0xe21   :  { %v5682_v12 = vpop.eup %5681  ;;  %v6989_v16 = vadd.f32 %v6976_v41, %v2550_v10  ;;  %v5056_v49 = vpop.f32.mrb[133].mxu1 }
 0xe22   :  { %5687 = vrcp.f32 %v2631_v9  ;;  %v2632_v3 = vadd.f32 1.0, %v5682_v12  ;;  %v2553_v22 = vpop.f32.mrb[134].mxu1 }
 0xe23   :  { %v4339_v23 = vmul.f32 -1.442695, %v6989_v16  ;;  %v6993_v28 = vadd.f32 %v6976_v41, %v2553_v22  ;;  %v5057_v32 = vpop.f32.mrb[135].mxu1 }
 0xe24   :  { %5689 = vrcp.f32 %v2632_v3 }
 0xe25   :  { %5691 = vpow2.f32 %v4339_v23  ;;  %v4340_v33 = vmul.f32 -1.442695, %v6993_v28 }
 0xe27   :  { %v5684_v35 = vpop.eup %5683  ;;  %5693 = vpow2.f32 %v4340_v33 }
 0xe28   :  { %v2633_v31 = vadd.f32 1.0, %v5684_v35  ;;  %v2558_v34 = vpop.f32.mrb[136].mxu1 }
 0xe29   :  { %v5686_v18 = vpop.eup %5685  ;;  %v6997_v27 = vadd.f32 %v6976_v41, %v2558_v34  ;;  %v5060_v13 = vpop.f32.mrb[137].mxu1 }
 0xe2a   :  { %5695 = vrcp.f32 %v2633_v31  ;;  %v2634_v37 = vadd.f32 1.0, %v5686_v18  ;;  %v2561_v36 = vpop.f32.mrb[138].mxu1 }
 0xe2b   :  { %v4341_v42 = vmul.f32 -1.442695, %v6997_v27  ;;  %v7001_v44 = vadd.f32 %v6976_v41, %v2561_v36  ;;  %v5061_v21 = vpop.f32.mrb[139].mxu1 }
 0xe2c   :  { %v5688_v17 = vpop.eup %5687  ;;  %5697 = vrcp.f32 %v2634_v37 }
 0xe2d   :  { %5699 = vpow2.f32 %v4341_v42  ;;  %v4342_v24 = vmul.f32 -1.442695, %v7001_v44  ;;  %v2673_v29 = vmul.f32 %v5688_v17, %v2535_v6 }
 0xe2e   :  { %v5690_v7 = vpop.eup %5689 }
 0xe2f   :  { %v5692_v55 = vpop.eup %5691  ;;  %v2674_v14 = vmul.f32 %v5690_v7, %v2538_v4  ;;  %5701 = vpow2.f32 %v4342_v24 }
 0xe30   :  { %v2635_v15 = vadd.f32 1.0, %v5692_v55  ;;  %v2566_v43 = vpop.f32.mrb[140].mxu1 }
 0xe31   :  { %v5694_v38 = vpop.eup %5693  ;;  %v7005_v47 = vadd.f32 %v6976_v41, %v2566_v43  ;;  %v5064_v19 = vpop.f32.mrb[141].mxu1  ;;  %v2687_v53 = vpack.c.bf16 %v2674_v14, %v2673_v29 }
 0xe32   :  { %5703 = vrcp.f32 %v2635_v15  ;;  %v2636_v48 = vadd.f32 1.0, %v5694_v38  ;;  %v2569_v40 = vpop.f32.mrb[142].mxu1 }
 0xe33   :  { %v4343_v39 = vmul.f32 -1.442695, %v7005_v47  ;;  %v7009_v50 = vadd.f32 %v6976_v41, %v2569_v40  ;;  %3124 = vrot.lane.b32.xlu1 %v2687_v53, %s5919_s29  ;;  %v5065_v52 = vpop.f32.mrb[143].mxu1  ;;  %5075 = vmatpush3.bf16.msra.mxu0 %v2687_v53  ;;  %v5357_v53 = vld [vmem:[%s7533_s6 + $0x20] sm:$0xff]  }
 0xe34   :  { %v5696_v58 = vpop.eup %5695  ;;  %5705 = vrcp.f32 %v2636_v48  ;;  %5076 = vmatprep.subr.bf16.mxu0 %v5916_v0  ;;  %5093 = vmatpush3.bf16.msra.mxu1 %v5357_v53  ;;  %v5907_v53 = vld [vmem:[%s7536_s2 + $0x58] sm:$0xff]  }
 0xe35   :  { %5707 = vpow2.f32 %v4343_v39  ;;  %v4344_v62 = vmul.f32 -1.442695, %v7009_v50  ;;  %v2675_v20 = vmul.f32 %v5696_v58, %v6981_v26  ;;  %5094 = vmatprep.subr.bf16.mxu1 %v5916_v0  ;;  %v5358_v39 = vld [vmem:[%s7533_s6 + $0x28] sm:$0xff]  }
 0xe36   :  { %v5698_v63 = vpop.eup %5697 }
 0xe37   :  { %v5700_v11 = vpop.eup %5699  ;;  %v2676_v6 = vmul.f32 %v5698_v63, %v6985_v30  ;;  %5709 = vpow2.f32 %v4344_v62 }
 0xe38   :  { %v2637_v56 = vadd.f32 1.0, %v5700_v11  ;;  %v2574_v54 = vpop.f32.mrb[144].mxu1  ;;  %5095 = vmatpush3.bf16.msra.mxu1 %v5358_v39  ;;  %v5911_v39 = vld [vmem:[%s7536_s2 + $0x68] sm:$0xff]  }
 0xe39   :  { %v5702_v46 = vpop.eup %5701  ;;  %v7017_v4 = vadd.f32 %v6976_v41, %v2574_v54  ;;  %v5068_v57 = vpop.f32.mrb[145].mxu1  ;;  %v2688_v25 = vpack.c.bf16 %v2676_v6, %v2675_v20  ;;  %5112 = vmatprep.subr.bf16.mxu1 %v5916_v0  ;;  %v5896_v20 = vld [vmem:[%s7532_s3] sm:$0xff]  }
 0xe3a   :  { %5711 = vrcp.f32 %v2637_v56  ;;  %v2638_v61 = vadd.f32 1.0, %v5702_v46  ;;  %v2577_v2 = vpop.f32.mrb[146].mxu1  ;;  %v5897_v56 = vld [vmem:[%s7534_s4] sm:$0xff]  ;;  %v5898_v57 = vld [vmem:[%s7534_s4 + $0x8] sm:$0xff] }
 0xe3b   :  { %v4345_v1 = vmul.f32 -1.442695, %v7017_v4  ;;  %v7021_v59 = vadd.f32 %v6976_v41, %v2577_v2  ;;  %3126 = vrot.lane.b32.xlu1 %v2688_v25, %s5919_s29  ;;  %v5069_v26 = vpop.f32.mrb[147].mxu1  ;;  %5077 = vmatpush3.bf16.msra.mxu0 %v2688_v25 }
 0xe3c   :  { %v5704_v30 = vpop.eup %5703  ;;  %5713 = vrcp.f32 %v2638_v61  ;;  %5078 = vmatprep.subr.bf16.mxu0 %v5916_v0  ;;  %v5359_v26 = vld [vmem:[%s7528_s5 + $0xe0] sm:$0xff]  }
 0xe3d   :  { %5715 = vpow2.f32 %v4345_v1  ;;  %v4346_v5 = vmul.f32 -1.442695, %v7021_v59  ;;  %v2677_v9 = vmul.f32 %v5704_v30, %v6989_v16  ;;  %v5360_v30 = vld [vmem:[%s7528_s5 + $0xe8] sm:$0xff]  }
 0xe3e   :  { %v5706_v8 = vpop.eup %5705 }
 0xe3f   :  { %v5708_v60 = vpop.eup %5707  ;;  %v2678_v10 = vmul.f32 %v5706_v8, %v6993_v28  ;;  %5717 = vpow2.f32 %v4346_v5  ;;  %v4350_v5 = vld [vmem:[%s7535_s8 + $0x2] ss:$0 sm:$0xff] }
 0xe40   :  { %v2639_v12 = vadd.f32 1.0, %v5708_v60  ;;  %v2582_v49 = vpop.f32.mrb[148].mxu1 }
 0xe41   :  { %v5710_v3 = vpop.eup %5709  ;;  %v2583_v22 = vadd.f32 %v6976_v41, %v2582_v49  ;;  %v5072_v23 = vpop.f32.mrb[149].mxu1  ;;  %v2689_v32 = vpack.c.bf16 %v2678_v10, %v2677_v9 }
 0xe42   :  { %5719 = vrcp.f32 %v2639_v12  ;;  %v2640_v33 = vadd.f32 1.0, %v5710_v3  ;;  %v2585_v35 = vpop.f32.mrb[150].mxu1 }
 0xe43   :  { %v4347_v31 = vmul.f32 -1.442695, %v2583_v22  ;;  %v2586_v34 = vadd.f32 %v6976_v41, %v2585_v35  ;;  %3128 = vrot.lane.b32.xlu1 %v2689_v32, %s5919_s29  ;;  %v5073_v18 = vpop.f32.mrb[151].mxu1  ;;  %5079 = vmatpush3.bf16.msra.mxu0 %v2689_v32 }
 0xe44   :  { %v5712_v16 = vpop.eup %5711  ;;  %5721 = vrcp.f32 %v2640_v33  ;;  %5080 = vmatprep.subr.bf16.mxu0 %v5916_v0 }
 0xe45   :  { %5723 = vpow2.f32 %v4347_v31  ;;  %v4348_v28 = vmul.f32 -1.442695, %v2586_v34  ;;  %v2679_v36 = vmul.f32 %v5712_v16, %v6997_v27 }
 0xe46   :  { %v5714_v13 = vpop.eup %5713 }
 0xe47   :  { %v5716_v37 = vpop.eup %5715  ;;  %v2680_v42 = vmul.f32 %v5714_v13, %v7001_v44  ;;  %5725 = vpow2.f32 %v4348_v28  ;;  %v4356_v13 = vld [vmem:[%s7530_s7 + $0x9] ss:$0 sm:$0xff] }
 0xe48   :  { %v2641_v21 = vadd.f32 1.0, %v5716_v37 }
 0xe49   :  { %v5718_v17 = vpop.eup %5717  ;;  %v2690_v41 = vpack.c.bf16 %v2680_v42, %v2679_v36 }
 0xe4a   :  { %5727 = vrcp.f32 %v2641_v21  ;;  %v2642_v24 = vadd.f32 1.0, %v5718_v17 }
 0xe4b   :  { %3130 = vrot.lane.b32.xlu1 %v2690_v41, %s5919_s29  ;;  %5081 = vmatpush3.bf16.msra.mxu0 %v2690_v41 }
 0xe4c   :  { %v5720_v7 = vpop.eup %5719  ;;  %5729 = vrcp.f32 %v2642_v24  ;;  %5082 = vmatprep.subr.bf16.mxu0 %v5916_v0 }
 0xe4d   :  { %v2681_v14 = vmul.f32 %v5720_v7, %v7005_v47 }
 0xe4e   :  { %v5722_v55 = vpop.eup %5721 }
 0xe4f   :  { %v5724_v29 = vpop.eup %5723  ;;  %v2682_v27 = vmul.f32 %v5722_v55, %v7009_v50 }
 0xe50   :  { %v2643_v44 = vadd.f32 1.0, %v5724_v29  ;;  %v5899_v29 = vld [vmem:[%s7536_s2 + $0x38] sm:$0xff]  }
 0xe51   :  { %v5726_v15 = vpop.eup %5725  ;;  %v2691_v43 = vpack.c.bf16 %v2682_v27, %v2681_v14  ;;  %v5900_v14 = vld [vmem:[%s7536_s2] sm:$0xff]  }
 0xe52   :  { %5731 = vrcp.f32 %v2643_v44  ;;  %v2644_v38 = vadd.f32 1.0, %v5726_v15  ;;  %v5901_v27 = vld [vmem:[%s7536_s2 + $0x40] sm:$0xff]   ;;  %v5902_v44 = vld [vmem:[%s7536_s2 + $0x8] sm:$0xff]  }
 0xe53   :  { %3132 = vrot.lane.b32.xlu1 %v2691_v43, %s5919_s29  ;;  %5083 = vmatpush3.bf16.msra.mxu0 %v2691_v43  ;;  %v5903_v15 = vld [vmem:[%s7536_s2 + $0x48] sm:$0xff]   ;;  %v5904_v43 = vld [vmem:[%s7536_s2 + $0x10] sm:$0xff]  }
 0xe54   :  { %v5728_v19 = vpop.eup %5727  ;;  %5733 = vrcp.f32 %v2644_v38  ;;  %5084 = vmatprep.subr.bf16.mxu0 %v5916_v0  ;;  %v5905_v38 = vld [vmem:[%s7536_s2 + $0x50] sm:$0xff]  }
 0xe55   :  { %v2683_v47 = vmul.f32 %v5728_v19, %v7017_v4  ;;  %v5906_v19 = vld [vmem:[%s7536_s2 + $0x18] sm:$0xff]  }
 0xe56   :  { %v5730_v48 = vpop.eup %5729 }
 0xe57   :  { %v2684_v40 = vmul.f32 %v5730_v48, %v7021_v59  ;;  %v5908_v48 = vld [vmem:[%s7536_s2 + $0x20] sm:$0xff]  }
 0xe59   :  { %v2692_v50 = vpack.c.bf16 %v2684_v40, %v2683_v47  ;;  %v5909_v47 = vld [vmem:[%s7536_s2 + $0x60] sm:$0xff]   ;;  %v5910_v40 = vld [vmem:[%s7536_s2 + $0x28] sm:$0xff]  }
 0xe5b   :  { %3134 = vrot.lane.b32.xlu1 %v2692_v50, %s5919_s29  ;;  %5085 = vmatpush3.bf16.msra.mxu0 %v2692_v50  ;;  %v5912_v50 = vld [vmem:[%s7536_s2 + $0x30] sm:$0xff]  }
 0xe5c   :  { %v5732_v52 = vpop.eup %5731  ;;  %5086 = vmatprep.subr.bf16.mxu0 %v5916_v0 }
 0xe5d   :  { %v2685_v62 = vmul.f32 %v5732_v52, %v2583_v22  ;;  %v5363_v52 = vld [vmem:[%s7528_s5 + $0x100] sm:$0xff]  }
 0xe5e   :  { %v5734_v58 = vpop.eup %5733 }
 0xe5f   :  { %v2686_v63 = vmul.f32 %v5734_v58, %v2586_v34  ;;  %v5364_v58 = vld [vmem:[%s7528_s5 + $0x108] sm:$0xff]  }
 0xe61   :  { %v2693_v11 = vpack.c.bf16 %v2686_v63, %v2685_v62  ;;  %v5365_v62 = vld [vmem:[%s7528_s5 + $0x110] sm:$0xff]   ;;  %v5366_v63 = vld [vmem:[%s7528_s5 + $0x118] sm:$0xff]  }
 0xe63   :  { %3136 = vrot.lane.b32.xlu1 %v2693_v11, %s5919_s29  ;;  %5087 = vmatpush3.bf16.msra.mxu0 %v2693_v11  ;;  %v5367_v11 = vld [vmem:[%s7528_s5 + $0x120] sm:$0xff]  }
 0xe64   :  { %5100 = vmatprep.subr.bf16.mxu0 %v5916_v0 }
 0xe66   :  { %5089 = vmatmul.mubr.msk.bf16.vlgmr.msra.gmra.mrb[156].mxu0 %vm567_vm4, %v5896_v20  ;;  %v5368_v20 = vld [vmem:[%s7528_s5 + $0x128] sm:$0xff]  }
 0xe67   :  { %5108 = vmatprep.mubr.msk.bf16.mxu0 %vm5917_vm0, %v5916_v0  ;;  %5101 = vmatpush3.bf16.msra.mxu0 %v5359_v26 }
 0xe68   :  { %5102 = vmatprep.subr.bf16.mxu0 %v5916_v0 }
 0xe6b   :  { %5103 = vmatpush3.bf16.msra.mxu0 %v5360_v30 }
 0xe6c   :  { %5104 = vmatprep.subr.bf16.mxu0 %v5916_v0 }
 0xf39   :  { %v2728_v6 = vpop.f32.mrb[156].mxu0 }
 0xf3a   :  { %v2735_v54 = vmul.f32 %v5897_v56, %v2728_v6  ;;  %v5090_v46 = vpop.f32.mrb[157].mxu0 }
 0xf3b   :  { %v2731_v4 = vpop.f32.mrb[158].mxu0 }
 0xf3c   :  { %v2736_v25 = vmul.f32 %v5898_v57, %v2731_v4  ;;  %v5091_v61 = vpop.f32.mrb[159].mxu0  ;;  %v2737_v2 = vadd.f32 %v2735_v54, %v6695_v45  ;;  %v5361_v45 = vld [vmem:[%s7528_s5 + $0xf0] sm:$0xff]  }
 0xf3d   :  { %5105 = vmatpush3.bf16.msra.mxu0 %v5361_v45 }
 0xf3e   :  { %v2738_v1 = vadd.f32 %v2736_v25, %v6697_v51  ;;  %5106 = vmatprep.subr.bf16.mxu0 %v5916_v0  ;;  %v5362_v51 = vld [vmem:[%s7528_s5 + $0xf8] sm:$0xff]  }
 0xf40   :  { %v2743_v59 = vpack.c.bf16 %v2738_v1, %v2737_v2 }
 0xf41   :  { %5107 = vmatpush3.bf16.msra.mxu0 %v5362_v51 }
 0xf42   :  { %5097 = vmatmul.mubr.msk.bf16.vlgmr.msra.gmra.mrb[152].mxu1 %vm110_vm1, %v2743_v59  ;;  %5142 = vmatprep.subr.bf16.mxu0 %v5916_v0 }
 0xf43   :  { %5114 = vmatprep.mubr.msk.bf16.mxu1 %vm5917_vm0, %v5916_v0 }
0x1015   :  { %v2798_v8 = vpop.f32.mrb[152].mxu1 }
0x1016   :  { %v2799_v60 = vadd.f32 %v4350_v5, %v2798_v8  ;;  %v5098_v9 = vpop.f32.mrb[153].mxu1 }
0x1017   :  { %v2801_v10 = vpop.f32.mrb[154].mxu1 }
0x1018   :  { %v4354_v12 = vmul.f32 -1.442695, %v2799_v60  ;;  %v2802_v49 = vadd.f32 %v4350_v5, %v2801_v10  ;;  %v5099_v3 = vpop.f32.mrb[155].mxu1 }
0x101a   :  { %5735 = vpow2.f32 %v4354_v12  ;;  %v4355_v22 = vmul.f32 -1.442695, %v2802_v49 }
0x101c   :  { %5737 = vpow2.f32 %v4355_v22 }
0x1024   :  { %v5736_v23 = vpop.eup %5735 }
0x1025   :  { %v2811_v32 = vadd.f32 1.0, %v5736_v23 }
0x1026   :  { %v5738_v33 = vpop.eup %5737 }
0x1027   :  { %5739 = vrcp.f32 %v2811_v32  ;;  %v2812_v35 = vadd.f32 1.0, %v5738_v33 }
0x1029   :  { %5741 = vrcp.f32 %v2812_v35 }
0x1031   :  { %v5740_v31 = vpop.eup %5739 }
0x1032   :  { %v2817_v18 = vmul.f32 %v5740_v31, %v2799_v60 }
0x1033   :  { %v5742_v34 = vpop.eup %5741 }
0x1034   :  { %v2818_v16 = vmul.f32 %v5742_v34, %v2802_v49 }
0x1036   :  { %v2827_v28 = vpack.c.bf16 %v2818_v16, %v2817_v18 }
0x1038   :  { %5109 = vmatmul.mubr.msk.bf16.vlgmr.msra.gmra.mrb[160].mxu0 %vm790_vm5, %v2827_v28 }
0x1039   :  { %5144 = vmatprep.mubr.msk.bf16.mxu0 %vm5917_vm0, %v5916_v0 }
0x110b   :  { %v2894_v37 = vpop.f32.mrb[160].mxu0 }
0x110c   :  { %v2895_v36 = vadd.f32 %v4356_v13, %v2894_v37  ;;  %v5110_v42 = vpop.f32.mrb[161].mxu0 }
0x110d   :  { %v2897_v21 = vpop.f32.mrb[162].mxu0 }
0x110e   :  { %v2898_v17 = vadd.f32 %v4356_v13, %v2897_v21  ;;  %v5111_v41 = vpop.f32.mrb[163].mxu0  ;;  %v7096_v24 = vadd.f32 %v2895_v36, %v2737_v2 }
0x1110   :  { %v7098_v7 = vadd.f32 %v2898_v17, %v2738_v1 }
0x1112   :  { %v2903_v55 = vpack.c.bf16 %v7098_v7, %v7096_v24 }
0x1114   :  { %5113 = vmatpush3.bf16.msra.mxu1 %v2903_v55  ;;  %5143 = vmatpush3.bf16.msra.mxu0 %v2903_v55 }
0x1115   :  { %5172 = vmatprep.subr.bf16.mxu1 %v5916_v0  ;;  %5212 = vmatprep.subr.bf16.mxu0 %v5916_v0 }
0x1117   :  { %5145 = vmatmul.mubr.msk.bf16.vlgmr.msra.gmra.mrb[164].mxu0 %vm873_vm6, %v5899_v29  ;;  %5115 = vmatmul.mubr.msk.bf16.vlgmr.msra.gmra.mrb[156].mxu1 %vm873_vm6, %v5900_v14 }
0x1118   :  { %5148 = vmatprep.mubr.msk.bf16.mxu0 %vm5917_vm0, %v5916_v0  ;;  %5118 = vmatprep.mubr.msk.bf16.mxu1 %vm5917_vm0, %v5916_v0 }
0x1119   :  { %5173 = vmatpush3.bf16.msra.mxu1 %v5363_v52 }
0x111a   :  { %5174 = vmatprep.subr.bf16.mxu1 %v5916_v0 }
0x111d   :  { %5175 = vmatpush3.bf16.msra.mxu1 %v5364_v58  ;;  %v5369_v58 = vld [vmem:[%s7528_s5 + $0x130] sm:$0xff]  }
0x111e   :  { %5176 = vmatprep.subr.bf16.mxu1 %v5916_v0  ;;  %5213 = vmatpush3.bf16.msra.mxu0 %v5369_v58 }
0x111f   :  { %5149 = vmatmul.mubr.msk.bf16.gmra.mrb[168].mxu0 %vm873_vm6, %v5901_v27  ;;  %5119 = vmatmul.mubr.msk.bf16.gmra.mrb[160].mxu1 %vm873_vm6, %v5902_v44 }
0x1120   :  { %5152 = vmatprep.mubr.msk.bf16.mxu0 %vm5917_vm0, %v5916_v0  ;;  %5122 = vmatprep.mubr.msk.bf16.mxu1 %vm5917_vm0, %v5916_v0 }
0x1121   :  { %5177 = vmatpush3.bf16.msra.mxu1 %v5365_v62  ;;  %5214 = vmatprep.subr.bf16.mxu0 %v5916_v0 }
0x1122   :  { %5178 = vmatprep.subr.bf16.mxu1 %v5916_v0 }
0x1125   :  { %5179 = vmatpush3.bf16.msra.mxu1 %v5366_v63 }
0x1126   :  { %5180 = vmatprep.subr.bf16.mxu1 %v5916_v0 }
0x1127   :  { %5153 = vmatmul.mubr.msk.bf16.gmra.mrb[172].mxu0 %vm873_vm6, %v5903_v15  ;;  %5123 = vmatmul.mubr.msk.bf16.gmra.mrb[164].mxu1 %vm873_vm6, %v5904_v43 }
0x1128   :  { %5156 = vmatprep.mubr.msk.bf16.mxu0 %vm5917_vm0, %v5916_v0  ;;  %5126 = vmatprep.mubr.msk.bf16.mxu1 %vm5917_vm0, %v5916_v0 }
0x1129   :  { %5181 = vmatpush3.bf16.msra.mxu1 %v5367_v11 }
0x112a   :  { %5182 = vmatprep.subr.bf16.mxu1 %v5916_v0 }
0x112d   :  { %5183 = vmatpush3.bf16.msra.mxu1 %v5368_v20 }
0x112e   :  { %5244 = vmatprep.subr.bf16.mxu1 %v5916_v0 }
0x112f   :  { %5157 = vmatmul.mubr.msk.bf16.gmra.mrb[176].mxu0 %vm873_vm6, %v5905_v38  ;;  %5127 = vmatmul.mubr.msk.bf16.gmra.mrb[168].mxu1 %vm873_vm6, %v5906_v19 }
0x1130   :  { %5160 = vmatprep.mubr.msk.bf16.mxu0 %vm5917_vm0, %v5916_v0  ;;  %5130 = vmatprep.mubr.msk.bf16.mxu1 %vm5917_vm0, %v5916_v0 }
0x1137   :  { %5161 = vmatmul.mubr.msk.bf16.gmra.mrb[180].mxu0 %vm873_vm6, %v5907_v53  ;;  %5131 = vmatmul.mubr.msk.bf16.gmra.mrb[172].mxu1 %vm873_vm6, %v5908_v48 }
0x1138   :  { %5164 = vmatprep.mubr.msk.bf16.mxu0 %vm5917_vm0, %v5916_v0  ;;  %5134 = vmatprep.mubr.msk.bf16.mxu1 %vm5917_vm0, %v5916_v0 }
0x113f   :  { %5165 = vmatmul.mubr.msk.bf16.gmra.mrb[184].mxu0 %vm873_vm6, %v5909_v47  ;;  %5135 = vmatmul.mubr.msk.bf16.gmra.mrb[176].mxu1 %vm873_vm6, %v5910_v40 }
0x1140   :  { %5168 = vmatprep.mubr.msk.bf16.mxu0 %vm5917_vm0, %v5916_v0  ;;  %5138 = vmatprep.mubr.msk.bf16.mxu1 %vm5917_vm0, %v5916_v0 }
0x1147   :  { %5169 = vmatmul.mubr.msk.bf16.gmra.mrb[188].mxu0 %vm873_vm6, %v5911_v39  ;;  %5139 = vmatmul.mubr.msk.bf16.gmra.mrb[180].mxu1 %vm873_vm6, %v5912_v50 }
0x1148   :  { %5184 = vmatprep.mubr.msk.bf16.mxu1 %vm5917_vm0, %v5916_v0  ;;  %5216 = vmatprep.mubr.msk.bf16.mxu0 %vm5917_vm0, %v5916_v0 }
0x11ea   :  { %v3027_v6 = vpop.f32.mrb[164].mxu0  ;;  %v7212_v56 = vpop.f32.mrb[156].mxu1 }
0x11eb   :  { %v5146_v54 = vpop.f32.mrb[165].mxu0  ;;  %v5116_v46 = vpop.f32.mrb[157].mxu1 }
0x11ec   :  { %v3030_v4 = vpop.f32.mrb[166].mxu0  ;;  %v7214_v57 = vpop.f32.mrb[158].mxu1 }
0x11ed   :  { %v3089_v25 = vpack.c.bf16 %v3030_v4, %v3027_v6  ;;  %v5147_v61 = vpop.f32.mrb[167].mxu0  ;;  %v3082_v2 = vpack.c.bf16 %v7214_v57, %v7212_v56  ;;  %v5117_v1 = vpop.f32.mrb[159].mxu1 }
0x11ef   :  { %3103 = vrot.lane.b32.xlu0 %v3089_v25, %s5918_s28 }
0x11f2   :  { %v3035_v59 = vpop.f32.mrb[168].mxu0  ;;  %v7219_v26 = vpop.f32.mrb[160].mxu1 }
0x11f3   :  { %v5150_v30 = vpop.f32.mrb[169].mxu0  ;;  %v5120_v45 = vpop.f32.mrb[161].mxu1 }
0x11f4   :  { %v3038_v51 = vpop.f32.mrb[170].mxu0  ;;  %v7221_v5 = vpop.f32.mrb[162].mxu1 }
0x11f5   :  { %v3090_v8 = vpack.c.bf16 %v3038_v51, %v3035_v59  ;;  %v5151_v60 = vpop.f32.mrb[171].mxu0  ;;  %v3083_v9 = vpack.c.bf16 %v7221_v5, %v7219_v26  ;;  %v5121_v10 = vpop.f32.mrb[163].mxu1 }
0x11f7   :  { %3105 = vrot.lane.b32.xlu0 %v3090_v8, %s5918_s28  ;;  %v3125_v8 = vpop.permute.xlu1 %3124 }
0x11fa   :  { %v3043_v12 = vpop.f32.mrb[172].mxu0  ;;  %v7226_v49 = vpop.f32.mrb[164].mxu1 }
0x11fb   :  { %v5154_v3 = vpop.f32.mrb[173].mxu0  ;;  %v5124_v22 = vpop.f32.mrb[165].mxu1 }
0x11fc   :  { %v3046_v23 = vpop.f32.mrb[174].mxu0  ;;  %v7228_v32 = vpop.f32.mrb[166].mxu1 }
0x11fd   :  { %v3091_v33 = vpack.c.bf16 %v3046_v23, %v3043_v12  ;;  %v5155_v35 = vpop.f32.mrb[175].mxu0  ;;  %v3084_v31 = vpack.c.bf16 %v7228_v32, %v7226_v49  ;;  %v5125_v34 = vpop.f32.mrb[167].mxu1 }
0x11fe   :  { %v3127_v3 = vpop.permute.xlu1 %3126 }
0x11ff   :  { %3107 = vrot.lane.b32.xlu0 %v3091_v33, %s5918_s28 }
0x1202   :  { %v3051_v18 = vpop.f32.mrb[176].mxu0  ;;  %v7233_v16 = vpop.f32.mrb[168].mxu1 }
0x1203   :  { %v5158_v28 = vpop.f32.mrb[177].mxu0  ;;  %v5128_v13 = vpop.f32.mrb[169].mxu1 }
0x1204   :  { %v3054_v37 = vpop.f32.mrb[178].mxu0  ;;  %v7235_v36 = vpop.f32.mrb[170].mxu1 }
0x1205   :  { %v3092_v42 = vpack.c.bf16 %v3054_v37, %v3051_v18  ;;  %v5159_v21 = vpop.f32.mrb[179].mxu0  ;;  %v3085_v17 = vpack.c.bf16 %v7235_v36, %v7233_v16  ;;  %v5129_v41 = vpop.f32.mrb[171].mxu1 }
0x1206   :  { %v3129_v57 = vpop.permute.xlu1 %3128  ;;  %v7301_v41 = vld [vmem:[%s7530_s7 + $0xa] ss:$0 sm:$0xff] }
0x1207   :  { %3109 = vrot.lane.b32.xlu0 %v3092_v42, %s5918_s28 }
0x120a   :  { %v3059_v55 = vpop.f32.mrb[180].mxu0  ;;  %v7240_v29 = vpop.f32.mrb[172].mxu1 }
0x120b   :  { %v5162_v14 = vpop.f32.mrb[181].mxu0  ;;  %v5132_v27 = vpop.f32.mrb[173].mxu1 }
0x120c   :  { %v3062_v44 = vpop.f32.mrb[182].mxu0  ;;  %v2973_v15 = vpop.f32.mrb[174].mxu1 }
0x120d   :  { %v3093_v43 = vpack.c.bf16 %v3062_v44, %v3059_v55  ;;  %v5163_v38 = vpop.f32.mrb[183].mxu0  ;;  %v3086_v19 = vpack.c.bf16 %v2973_v15, %v7240_v29  ;;  %v5133_v53 = vpop.f32.mrb[175].mxu1 }
0x120e   :  { %v3131_v5 = vpop.permute.xlu1 %3130 }
0x120f   :  { %3111 = vrot.lane.b32.xlu0 %v3093_v43, %s5918_s28 }
0x1212   :  { %v3067_v48 = vpop.f32.mrb[184].mxu0  ;;  %v2978_v47 = vpop.f32.mrb[176].mxu1 }
0x1213   :  { %v5166_v40 = vpop.f32.mrb[185].mxu0  ;;  %v5136_v39 = vpop.f32.mrb[177].mxu1 }
0x1214   :  { %v3070_v50 = vpop.f32.mrb[186].mxu0  ;;  %v2981_v52 = vpop.f32.mrb[178].mxu1 }
0x1215   :  { %v3094_v62 = vpack.c.bf16 %v3070_v50, %v3067_v48  ;;  %v5167_v63 = vpop.f32.mrb[187].mxu0  ;;  %v3087_v11 = vpack.c.bf16 %v2981_v52, %v2978_v47  ;;  %v5137_v20 = vpop.f32.mrb[179].mxu1 }
0x1216   :  { %v3133_v32 = vpop.permute.xlu1 %3132 }
0x1217   :  { %3113 = vrot.lane.b32.xlu0 %v3094_v62, %s5918_s28 }
0x121a   :  { %v3075_v6 = vpop.f32.mrb[188].mxu0  ;;  %v2986_v54 = vpop.f32.mrb[180].mxu1 }
0x121b   :  { %v5170_v46 = vpop.f32.mrb[189].mxu0  ;;  %v5140_v4 = vpop.f32.mrb[181].mxu1 }
0x121c   :  { %v3078_v25 = vpop.f32.mrb[190].mxu0  ;;  %v2989_v61 = vpop.f32.mrb[182].mxu1 }
0x121d   :  { %v3095_v1 = vpack.c.bf16 %v3078_v25, %v3075_v6  ;;  %v5171_v59 = vpop.f32.mrb[191].mxu0  ;;  %v3088_v30 = vpack.c.bf16 %v2989_v61, %v2986_v54  ;;  %v5141_v45 = vpop.f32.mrb[183].mxu1 }
0x121e   :  { %v3135_v16 = vpop.permute.xlu1 %3134 }
0x121f   :  { %3115 = vrot.lane.b32.xlu0 %v3095_v1, %s5918_s28 }
0x1222   :  { %v3137_v36 = vpop.permute.xlu1 %3136 }
0x1261   :  { %v3104_v51 = vpop.permute.xlu0 %3103 }
0x1262   :  { %v3140_v60 = vsel %vm110_vm1, %v3082_v2, %v3104_v51 }
0x1263   :  { %v3160_v10 = vsel %vm790_vm5, %v3140_v60, %v3125_v8 }
0x1264   :  { %5185 = vmatmul.mubr.msk.bf16.vlgmr.msra.gmra.mrb[184].mxu1 %vm1273_vm7, %v3160_v10 }
0x1265   :  { %5188 = vmatprep.mubr.msk.bf16.mxu1 %vm5917_vm0, %v5916_v0 }
0x1269   :  { %v3106_v12 = vpop.permute.xlu0 %3105 }
0x126a   :  { %v3143_v22 = vsel %vm110_vm1, %v3083_v9, %v3106_v12 }
0x126b   :  { %v3162_v23 = vsel %vm790_vm5, %v3143_v22, %v3127_v3 }
0x126c   :  { %5189 = vmatmul.mubr.msk.bf16.gmra.mrb[188].mxu1 %vm1273_vm7, %v3162_v23 }
0x126d   :  { %5192 = vmatprep.mubr.msk.bf16.mxu1 %vm5917_vm0, %v5916_v0 }
0x1271   :  { %v3108_v56 = vpop.permute.xlu0 %3107 }
0x1272   :  { %v3146_v2 = vsel %vm110_vm1, %v3084_v31, %v3108_v56 }
0x1273   :  { %v3164_v33 = vsel %vm790_vm5, %v3146_v2, %v3129_v57 }
0x1274   :  { %5193 = vmatmul.mubr.msk.bf16.gmra.mrb[192].mxu1 %vm1273_vm7, %v3164_v33 }
0x1275   :  { %5196 = vmatprep.mubr.msk.bf16.mxu1 %vm5917_vm0, %v5916_v0 }
0x1279   :  { %v3110_v26 = vpop.permute.xlu0 %3109 }
0x127a   :  { %v3149_v9 = vsel %vm110_vm1, %v3085_v17, %v3110_v26  ;;  %v5370_v17 = vld [vmem:[%s7528_s5 + $0x138] sm:$0xff]  }
0x127b   :  { %v3166_v35 = vsel %vm790_vm5, %v3149_v9, %v3131_v5  ;;  %5215 = vmatpush3.bf16.msra.mxu0 %v5370_v17 }
0x127c   :  { %5197 = vmatmul.mubr.msk.bf16.gmra.mrb[196].mxu1 %vm1273_vm7, %v3166_v35  ;;  %5270 = vmatprep.subr.bf16.mxu0 %v5916_v0 }
0x127d   :  { %5200 = vmatprep.mubr.msk.bf16.mxu1 %vm5917_vm0, %v5916_v0 }
0x1281   :  { %v3112_v49 = vpop.permute.xlu0 %3111 }
0x1282   :  { %v3152_v31 = vsel %vm110_vm1, %v3086_v19, %v3112_v49 }
0x1283   :  { %v3168_v34 = vsel %vm790_vm5, %v3152_v31, %v3133_v32 }
0x1284   :  { %5201 = vmatmul.mubr.msk.bf16.gmra.mrb[200].mxu1 %vm1273_vm7, %v3168_v34 }
0x1285   :  { %5204 = vmatprep.mubr.msk.bf16.mxu1 %vm5917_vm0, %v5916_v0 }
0x1289   :  { %v3114_v18 = vpop.permute.xlu0 %3113 }
0x128a   :  { %v3155_v28 = vsel %vm110_vm1, %v3087_v11, %v3114_v18 }
0x128b   :  { %v3170_v13 = vsel %vm790_vm5, %v3155_v28, %v3135_v16 }
0x128c   :  { %5205 = vmatmul.mubr.msk.bf16.gmra.mrb[204].mxu1 %vm1273_vm7, %v3170_v13 }
0x128d   :  { %5208 = vmatprep.mubr.msk.bf16.mxu1 %vm5917_vm0, %v5916_v0 }
0x1291   :  { %v3116_v37 = vpop.permute.xlu0 %3115 }
0x1292   :  { %v3158_v42 = vsel %vm110_vm1, %v3088_v30, %v3116_v37 }
0x1293   :  { %v3172_v21 = vsel %vm790_vm5, %v3158_v42, %v3137_v36 }
0x1294   :  { %5209 = vmatmul.mubr.msk.bf16.gmra.mrb[208].mxu1 %vm1273_vm7, %v3172_v21 }
0x1295   :  { %5258 = vmatprep.mubr.msk.bf16.mxu1 %vm5917_vm0, %v5916_v0 }
0x1337   :  { %v3274_v55 = vpop.f32.mrb[184].mxu1 }
0x1338   :  { %v3275_v29 = vadd.f32 %v7301_v41, %v3274_v55  ;;  %v5186_v14 = vpop.f32.mrb[185].mxu1 }
0x1339   :  { %v3277_v27 = vpop.f32.mrb[186].mxu1 }
0x133a   :  { %v4390_v44 = vmul.f32 -1.442695, %v3275_v29  ;;  %v3278_v15 = vadd.f32 %v7301_v41, %v3277_v27  ;;  %v5187_v43 = vpop.f32.mrb[187].mxu1 }
0x133c   :  { %5743 = vpow2.f32 %v4390_v44  ;;  %v4391_v38 = vmul.f32 -1.442695, %v3278_v15 }
0x133e   :  { %5745 = vpow2.f32 %v4391_v38 }
0x133f   :  { %v3282_v19 = vpop.f32.mrb[188].mxu1 }
0x1340   :  { %v7306_v53 = vadd.f32 %v7301_v41, %v3282_v19  ;;  %v5190_v48 = vpop.f32.mrb[189].mxu1 }
0x1341   :  { %v3285_v47 = vpop.f32.mrb[190].mxu1 }
0x1342   :  { %v4392_v40 = vmul.f32 -1.442695, %v7306_v53  ;;  %v7310_v39 = vadd.f32 %v7301_v41, %v3285_v47  ;;  %v5191_v50 = vpop.f32.mrb[191].mxu1 }
0x1344   :  { %5747 = vpow2.f32 %v4392_v40  ;;  %v4393_v52 = vmul.f32 -1.442695, %v7310_v39 }
0x1346   :  { %v5744_v58 = vpop.eup %5743  ;;  %5749 = vpow2.f32 %v4393_v52 }
0x1347   :  { %v3371_v62 = vadd.f32 1.0, %v5744_v58  ;;  %v3290_v63 = vpop.f32.mrb[192].mxu1 }
0x1348   :  { %v5746_v11 = vpop.eup %5745  ;;  %v7314_v20 = vadd.f32 %v7301_v41, %v3290_v63  ;;  %v5194_v6 = vpop.f32.mrb[193].mxu1 }
0x1349   :  { %5751 = vrcp.f32 %v3371_v62  ;;  %v3372_v54 = vadd.f32 1.0, %v5746_v11  ;;  %v3293_v46 = vpop.f32.mrb[194].mxu1 }
0x134a   :  { %v4394_v4 = vmul.f32 -1.442695, %v7314_v20  ;;  %v7318_v25 = vadd.f32 %v7301_v41, %v3293_v46  ;;  %v5195_v61 = vpop.f32.mrb[195].mxu1 }
0x134b   :  { %5753 = vrcp.f32 %v3372_v54 }
0x134c   :  { %5755 = vpow2.f32 %v4394_v4  ;;  %v4395_v1 = vmul.f32 -1.442695, %v7318_v25 }
0x134e   :  { %v5748_v59 = vpop.eup %5747  ;;  %5757 = vpow2.f32 %v4395_v1 }
0x134f   :  { %v3373_v30 = vadd.f32 1.0, %v5748_v59  ;;  %v3298_v45 = vpop.f32.mrb[196].mxu1 }
0x1350   :  { %v5750_v51 = vpop.eup %5749  ;;  %v7322_v8 = vadd.f32 %v7301_v41, %v3298_v45  ;;  %v5198_v60 = vpop.f32.mrb[197].mxu1 }
0x1351   :  { %5759 = vrcp.f32 %v3373_v30  ;;  %v3374_v10 = vadd.f32 1.0, %v5750_v51  ;;  %v3301_v12 = vpop.f32.mrb[198].mxu1 }
0x1352   :  { %v4396_v3 = vmul.f32 -1.442695, %v7322_v8  ;;  %v7326_v22 = vadd.f32 %v7301_v41, %v3301_v12  ;;  %v5199_v23 = vpop.f32.mrb[199].mxu1 }
0x1353   :  { %v5752_v56 = vpop.eup %5751  ;;  %5761 = vrcp.f32 %v3374_v10 }
0x1354   :  { %5763 = vpow2.f32 %v4396_v3  ;;  %v4397_v57 = vmul.f32 -1.442695, %v7326_v22  ;;  %v3413_v26 = vmul.f32 %v5752_v56, %v3275_v29 }
0x1355   :  { %v5754_v2 = vpop.eup %5753 }
0x1356   :  { %v5756_v33 = vpop.eup %5755  ;;  %v3414_v5 = vmul.f32 %v5754_v2, %v3278_v15  ;;  %5765 = vpow2.f32 %v4397_v57 }
0x1357   :  { %v3375_v9 = vadd.f32 1.0, %v5756_v33  ;;  %v3306_v35 = vpop.f32.mrb[200].mxu1 }
0x1358   :  { %v5758_v49 = vpop.eup %5757  ;;  %v3431_v32 = vpack.c.bf16 %v3414_v5, %v3413_v26  ;;  %v7330_v31 = vadd.f32 %v7301_v41, %v3306_v35  ;;  %v5202_v34 = vpop.f32.mrb[201].mxu1 }
0x1359   :  { %5767 = vrcp.f32 %v3375_v9  ;;  %v3376_v18 = vadd.f32 1.0, %v5758_v49  ;;  %v3309_v16 = vpop.f32.mrb[202].mxu1 }
0x135a   :  { %v4398_v28 = vmul.f32 -1.442695, %v7330_v31  ;;  %v7334_v13 = vadd.f32 %v7301_v41, %v3309_v16  ;;  %v5203_v37 = vpop.f32.mrb[203].mxu1  ;;  %5217 = vmatmul.mubr.msk.bf16.vlgmr.msra.gmra.mrb[192].mxu0 %vm110_vm1, %v3431_v32 }
0x135b   :  { %v5760_v36 = vpop.eup %5759  ;;  %5769 = vrcp.f32 %v3376_v18  ;;  %5220 = vmatprep.mubr.msk.bf16.mxu0 %vm5917_vm0, %v5916_v0 }
0x135c   :  { %5771 = vpow2.f32 %v4398_v28  ;;  %v4399_v42 = vmul.f32 -1.442695, %v7334_v13  ;;  %v3415_v55 = vmul.f32 %v5760_v36, %v7306_v53 }
0x135d   :  { %v5762_v21 = vpop.eup %5761 }
0x135e   :  { %v5764_v17 = vpop.eup %5763  ;;  %v3416_v29 = vmul.f32 %v5762_v21, %v7310_v39  ;;  %5773 = vpow2.f32 %v4399_v42  ;;  %v7377_v21 = vld [vmem:[%s7530_s7 + $0xb] ss:$0 sm:$0xff] }
0x135f   :  { %v3377_v14 = vadd.f32 1.0, %v5764_v17  ;;  %v3314_v27 = vpop.f32.mrb[204].mxu1 }
0x1360   :  { %v5766_v44 = vpop.eup %5765  ;;  %v3432_v15 = vpack.c.bf16 %v3416_v29, %v3415_v55  ;;  %v7343_v43 = vadd.f32 %v7301_v41, %v3314_v27  ;;  %v5206_v38 = vpop.f32.mrb[205].mxu1 }
0x1361   :  { %5775 = vrcp.f32 %v3377_v14  ;;  %v3378_v19 = vadd.f32 1.0, %v5766_v44  ;;  %v3317_v48 = vpop.f32.mrb[206].mxu1 }
0x1362   :  { %v4400_v47 = vmul.f32 -1.442695, %v7343_v43  ;;  %v3318_v40 = vadd.f32 %v7301_v41, %v3317_v48  ;;  %v5207_v50 = vpop.f32.mrb[207].mxu1  ;;  %5221 = vmatmul.mubr.msk.bf16.gmra.mrb[196].mxu0 %vm110_vm1, %v3432_v15 }
0x1363   :  { %v5768_v53 = vpop.eup %5767  ;;  %5777 = vrcp.f32 %v3378_v19  ;;  %5224 = vmatprep.mubr.msk.bf16.mxu0 %vm5917_vm0, %v5916_v0 }
0x1364   :  { %5779 = vpow2.f32 %v4400_v47  ;;  %v4401_v39 = vmul.f32 -1.442695, %v3318_v40  ;;  %v3417_v62 = vmul.f32 %v5768_v53, %v7314_v20 }
0x1365   :  { %v5770_v52 = vpop.eup %5769 }
0x1366   :  { %v5772_v58 = vpop.eup %5771  ;;  %v3418_v63 = vmul.f32 %v5770_v52, %v7318_v25  ;;  %5781 = vpow2.f32 %v4401_v39 }
0x1367   :  { %v3379_v11 = vadd.f32 1.0, %v5772_v58  ;;  %v3322_v6 = vpop.f32.mrb[208].mxu1 }
0x1368   :  { %v5774_v54 = vpop.eup %5773  ;;  %v3433_v46 = vpack.c.bf16 %v3418_v63, %v3417_v62  ;;  %v3323_v4 = vadd.f32 %v7301_v41, %v3322_v6  ;;  %v5210_v61 = vpop.f32.mrb[209].mxu1 }
0x1369   :  { %5783 = vrcp.f32 %v3379_v11  ;;  %v3380_v1 = vadd.f32 1.0, %v5774_v54  ;;  %v3325_v59 = vpop.f32.mrb[210].mxu1 }
0x136a   :  { %v4402_v30 = vmul.f32 -1.442695, %v3323_v4  ;;  %v3326_v45 = vadd.f32 %v7301_v41, %v3325_v59  ;;  %v5211_v51 = vpop.f32.mrb[211].mxu1  ;;  %5225 = vmatmul.mubr.msk.bf16.gmra.mrb[200].mxu0 %vm110_vm1, %v3433_v46 }
0x136b   :  { %v5776_v20 = vpop.eup %5775  ;;  %5785 = vrcp.f32 %v3380_v1  ;;  %5228 = vmatprep.mubr.msk.bf16.mxu0 %vm5917_vm0, %v5916_v0 }
0x136c   :  { %5787 = vpow2.f32 %v4402_v30  ;;  %v4403_v25 = vmul.f32 -1.442695, %v3326_v45  ;;  %v3419_v12 = vmul.f32 %v5776_v20, %v7322_v8 }
0x136d   :  { %v5778_v60 = vpop.eup %5777 }
0x136e   :  { %v5780_v10 = vpop.eup %5779  ;;  %v3420_v3 = vmul.f32 %v5778_v60, %v7326_v22  ;;  %5789 = vpow2.f32 %v4403_v25 }
0x136f   :  { %v3381_v23 = vadd.f32 1.0, %v5780_v10 }
0x1370   :  { %v5782_v56 = vpop.eup %5781  ;;  %v3434_v41 = vpack.c.bf16 %v3420_v3, %v3419_v12 }
0x1371   :  { %5791 = vrcp.f32 %v3381_v23  ;;  %v3382_v57 = vadd.f32 1.0, %v5782_v56 }
0x1372   :  { %5229 = vmatmul.mubr.msk.bf16.gmra.mrb[204].mxu0 %vm110_vm1, %v3434_v41 }
0x1373   :  { %v5784_v2 = vpop.eup %5783  ;;  %5793 = vrcp.f32 %v3382_v57  ;;  %5232 = vmatprep.mubr.msk.bf16.mxu0 %vm5917_vm0, %v5916_v0 }
0x1374   :  { %v3421_v5 = vmul.f32 %v5784_v2, %v7330_v31 }
0x1375   :  { %v5786_v33 = vpop.eup %5785 }
0x1376   :  { %v5788_v26 = vpop.eup %5787  ;;  %v3422_v8 = vmul.f32 %v5786_v33, %v7334_v13 }
0x1377   :  { %v3383_v22 = vadd.f32 1.0, %v5788_v26 }
0x1378   :  { %v5790_v9 = vpop.eup %5789  ;;  %v3435_v35 = vpack.c.bf16 %v3422_v8, %v3421_v5 }
0x1379   :  { %5795 = vrcp.f32 %v3383_v22  ;;  %v3384_v49 = vadd.f32 1.0, %v5790_v9 }
0x137a   :  { %5233 = vmatmul.mubr.msk.bf16.gmra.mrb[208].mxu0 %vm110_vm1, %v3435_v35 }
0x137b   :  { %v5792_v32 = vpop.eup %5791  ;;  %5797 = vrcp.f32 %v3384_v49  ;;  %5236 = vmatprep.mubr.msk.bf16.mxu0 %vm5917_vm0, %v5916_v0 }
0x137c   :  { %v3423_v18 = vmul.f32 %v5792_v32, %v7343_v43 }
0x137d   :  { %v5794_v34 = vpop.eup %5793 }
0x137e   :  { %v3424_v16 = vmul.f32 %v5794_v34, %v3318_v40 }
0x1380   :  { %v3436_v28 = vpack.c.bf16 %v3424_v16, %v3423_v18 }
0x1382   :  { %5237 = vmatmul.mubr.msk.bf16.gmra.mrb[212].mxu0 %vm110_vm1, %v3436_v28 }
0x1383   :  { %v5796_v31 = vpop.eup %5795  ;;  %5240 = vmatprep.mubr.msk.bf16.mxu0 %vm5917_vm0, %v5916_v0 }
0x1384   :  { %v3425_v37 = vmul.f32 %v5796_v31, %v3323_v4 }
0x1385   :  { %v5798_v13 = vpop.eup %5797 }
0x1386   :  { %v3426_v36 = vmul.f32 %v5798_v13, %v3326_v45 }
0x1388   :  { %v3437_v42 = vpack.c.bf16 %v3426_v36, %v3425_v37 }
0x138a   :  { %5241 = vmatmul.mubr.msk.bf16.gmra.mrb[216].mxu0 %vm110_vm1, %v3437_v42 }
0x138b   :  { %5278 = vmatprep.mubr.msk.bf16.mxu0 %vm5917_vm0, %v5916_v0 }
0x142d   :  { %v3510_v17 = vpop.f32.mrb[192].mxu0 }
0x142e   :  { %v3511_v55 = vadd.f32 %v7377_v21, %v3510_v17  ;;  %v5218_v29 = vpop.f32.mrb[193].mxu0 }
0x142f   :  { %v3513_v14 = vpop.f32.mrb[194].mxu0 }
0x1430   :  { %v4414_v27 = vmul.f32 -1.442695, %v3511_v55  ;;  %v3514_v44 = vadd.f32 %v7377_v21, %v3513_v14  ;;  %v5219_v15 = vpop.f32.mrb[195].mxu0 }
0x1432   :  { %5799 = vpow2.f32 %v4414_v27  ;;  %v4415_v43 = vmul.f32 -1.442695, %v3514_v44 }
0x1434   :  { %5801 = vpow2.f32 %v4415_v43 }
0x1435   :  { %v3518_v38 = vpop.f32.mrb[196].mxu0 }
0x1436   :  { %v7382_v19 = vadd.f32 %v7377_v21, %v3518_v38  ;;  %v5222_v48 = vpop.f32.mrb[197].mxu0 }
0x1437   :  { %v3521_v47 = vpop.f32.mrb[198].mxu0 }
0x1438   :  { %v4416_v40 = vmul.f32 -1.442695, %v7382_v19  ;;  %v7386_v50 = vadd.f32 %v7377_v21, %v3521_v47  ;;  %v5223_v53 = vpop.f32.mrb[199].mxu0 }
0x143a   :  { %5803 = vpow2.f32 %v4416_v40  ;;  %v4417_v39 = vmul.f32 -1.442695, %v7386_v50 }
0x143c   :  { %v5800_v52 = vpop.eup %5799  ;;  %5805 = vpow2.f32 %v4417_v39 }
0x143d   :  { %v3607_v58 = vadd.f32 1.0, %v5800_v52  ;;  %v3526_v62 = vpop.f32.mrb[200].mxu0 }
0x143e   :  { %v5802_v63 = vpop.eup %5801  ;;  %v7390_v11 = vadd.f32 %v7377_v21, %v3526_v62  ;;  %v5226_v6 = vpop.f32.mrb[201].mxu0 }
0x143f   :  { %5807 = vrcp.f32 %v3607_v58  ;;  %v3608_v54 = vadd.f32 1.0, %v5802_v63  ;;  %v3529_v46 = vpop.f32.mrb[202].mxu0 }
0x1440   :  { %v4418_v4 = vmul.f32 -1.442695, %v7390_v11  ;;  %v7394_v61 = vadd.f32 %v7377_v21, %v3529_v46  ;;  %v5227_v1 = vpop.f32.mrb[203].mxu0 }
0x1441   :  { %5809 = vrcp.f32 %v3608_v54 }
0x1442   :  { %5811 = vpow2.f32 %v4418_v4  ;;  %v4419_v59 = vmul.f32 -1.442695, %v7394_v61 }
0x1444   :  { %v5804_v30 = vpop.eup %5803  ;;  %5813 = vpow2.f32 %v4419_v59 }
0x1445   :  { %v3609_v45 = vadd.f32 1.0, %v5804_v30  ;;  %v3534_v51 = vpop.f32.mrb[204].mxu0 }
0x1446   :  { %v5806_v20 = vpop.eup %5805  ;;  %v7398_v25 = vadd.f32 %v7377_v21, %v3534_v51  ;;  %v5230_v60 = vpop.f32.mrb[205].mxu0 }
0x1447   :  { %5815 = vrcp.f32 %v3609_v45  ;;  %v3610_v10 = vadd.f32 1.0, %v5806_v20  ;;  %v3537_v12 = vpop.f32.mrb[206].mxu0 }
0x1448   :  { %v4420_v3 = vmul.f32 -1.442695, %v7398_v25  ;;  %v7402_v23 = vadd.f32 %v7377_v21, %v3537_v12  ;;  %v5231_v56 = vpop.f32.mrb[207].mxu0 }
0x1449   :  { %v5808_v41 = vpop.eup %5807  ;;  %5817 = vrcp.f32 %v3610_v10 }
0x144a   :  { %5819 = vpow2.f32 %v4420_v3  ;;  %v4421_v57 = vmul.f32 -1.442695, %v7402_v23  ;;  %v3649_v26 = vmul.f32 %v5808_v41, %v3511_v55 }
0x144b   :  { %v5810_v2 = vpop.eup %5809 }
0x144c   :  { %v5812_v33 = vpop.eup %5811  ;;  %v3650_v5 = vmul.f32 %v5810_v2, %v3514_v44  ;;  %5821 = vpow2.f32 %v4421_v57 }
0x144d   :  { %v3611_v8 = vadd.f32 1.0, %v5812_v33  ;;  %v3542_v22 = vpop.f32.mrb[208].mxu0 }
0x144e   :  { %v5814_v9 = vpop.eup %5813  ;;  %v3663_v35 = vpack.c.bf16 %v3650_v5, %v3649_v26  ;;  %v7406_v49 = vadd.f32 %v7377_v21, %v3542_v22  ;;  %v5234_v32 = vpop.f32.mrb[209].mxu0 }
0x144f   :  { %5823 = vrcp.f32 %v3611_v8  ;;  %v3612_v34 = vadd.f32 1.0, %v5814_v9  ;;  %v3545_v18 = vpop.f32.mrb[210].mxu0 }
0x1450   :  { %v4422_v16 = vmul.f32 -1.442695, %v7406_v49  ;;  %v7410_v28 = vadd.f32 %v7377_v21, %v3545_v18  ;;  %v5235_v31 = vpop.f32.mrb[211].mxu0  ;;  %5245 = vmatpush3.bf16.msra.mxu1 %v3663_v35 }
0x1451   :  { %v5816_v13 = vpop.eup %5815  ;;  %5825 = vrcp.f32 %v3612_v34  ;;  %5246 = vmatprep.subr.bf16.mxu1 %v5916_v0 }
0x1452   :  { %5827 = vpow2.f32 %v4422_v16  ;;  %v4423_v37 = vmul.f32 -1.442695, %v7410_v28  ;;  %v3651_v17 = vmul.f32 %v5816_v13, %v7382_v19 }
0x1453   :  { %v5818_v36 = vpop.eup %5817 }
0x1454   :  { %v5820_v42 = vpop.eup %5819  ;;  %v3652_v55 = vmul.f32 %v5818_v36, %v7386_v50  ;;  %5829 = vpow2.f32 %v4423_v37  ;;  %v5913_v36 = vld [vmem:[%s7532_s3] sm:$0xff]  }
0x1455   :  { %v3613_v29 = vadd.f32 1.0, %v5820_v42  ;;  %v3550_v14 = vpop.f32.mrb[212].mxu0  ;;  %v5371_v42 = vld [vmem:[%s7533_s6 + $0x30] sm:$0xff]  }
0x1456   :  { %v5822_v27 = vpop.eup %5821  ;;  %v3664_v44 = vpack.c.bf16 %v3652_v55, %v3651_v17  ;;  %v7417_v15 = vadd.f32 %v7377_v21, %v3550_v14  ;;  %v5238_v43 = vpop.f32.mrb[213].mxu0  ;;  %v5372_v17 = vld [vmem:[%s7533_s6 + $0x38] sm:$0xff]   ;;  %v5373_v55 = vld [vmem:[%s7528_s5 + $0x140] sm:$0xff]  }
0x1457   :  { %5831 = vrcp.f32 %v3613_v29  ;;  %v3614_v38 = vadd.f32 1.0, %v5822_v27  ;;  %v3553_v48 = vpop.f32.mrb[214].mxu0  ;;  %5271 = vmatpush3.bf16.msra.mxu0 %v5373_v55  ;;  %v5374_v29 = vld [vmem:[%s7528_s5 + $0x148] sm:$0xff]   ;;  %v5914_v27 = vld [vmem:[%s7534_s4] sm:$0xff] }
0x1458   :  { %v4424_v47 = vmul.f32 -1.442695, %v7417_v15  ;;  %v3554_v40 = vadd.f32 %v7377_v21, %v3553_v48  ;;  %v5239_v53 = vpop.f32.mrb[215].mxu0  ;;  %5247 = vmatpush3.bf16.msra.mxu1 %v3664_v44  ;;  %5272 = vmatprep.subr.bf16.mxu0 %v5916_v0 }
0x1459   :  { %v5824_v19 = vpop.eup %5823  ;;  %5833 = vrcp.f32 %v3614_v38  ;;  %5248 = vmatprep.subr.bf16.mxu1 %v5916_v0  ;;  %v5915_v38 = vld [vmem:[%s7534_s4 + $0x8] sm:$0xff] }
0x145a   :  { %5835 = vpow2.f32 %v4424_v47  ;;  %v4425_v50 = vmul.f32 -1.442695, %v3554_v40  ;;  %v3653_v58 = vmul.f32 %v5824_v19, %v7390_v11 }
0x145b   :  { %v5826_v39 = vpop.eup %5825  ;;  %5273 = vmatpush3.bf16.msra.mxu0 %v5374_v29 }
0x145c   :  { %v5828_v52 = vpop.eup %5827  ;;  %v3654_v62 = vmul.f32 %v5826_v39, %v7394_v61  ;;  %5837 = vpow2.f32 %v4425_v50  ;;  %5274 = vmatprep.subr.bf16.mxu0 %v5916_v0  ;;  %v5375_v50 = vld [vmem:[%s7528_s5 + $0x150] sm:$0xff]   ;;  %v5376_v39 = vld [vmem:[%s7528_s5 + $0x158] sm:$0xff]  }
0x145d   :  { %v3615_v63 = vadd.f32 1.0, %v5828_v52  ;;  %v3558_v6 = vpop.f32.mrb[216].mxu0 }
0x145e   :  { %v5830_v54 = vpop.eup %5829  ;;  %v3665_v46 = vpack.c.bf16 %v3654_v62, %v3653_v58  ;;  %v3559_v4 = vadd.f32 %v7377_v21, %v3558_v6  ;;  %v5242_v1 = vpop.f32.mrb[217].mxu0 }
0x145f   :  { %5839 = vrcp.f32 %v3615_v63  ;;  %v3616_v59 = vadd.f32 1.0, %v5830_v54  ;;  %v3561_v30 = vpop.f32.mrb[218].mxu0  ;;  %5275 = vmatpush3.bf16.msra.mxu0 %v5375_v50 }
0x1460   :  { %v4426_v45 = vmul.f32 -1.442695, %v3559_v4  ;;  %v3562_v51 = vadd.f32 %v7377_v21, %v3561_v30  ;;  %v5243_v20 = vpop.f32.mrb[219].mxu0  ;;  %5249 = vmatpush3.bf16.msra.mxu1 %v3665_v46  ;;  %5276 = vmatprep.subr.bf16.mxu0 %v5916_v0 }
0x1461   :  { %v5832_v60 = vpop.eup %5831  ;;  %5841 = vrcp.f32 %v3616_v59  ;;  %5250 = vmatprep.subr.bf16.mxu1 %v5916_v0 }
0x1462   :  { %5843 = vpow2.f32 %v4426_v45  ;;  %v4427_v11 = vmul.f32 -1.442695, %v3562_v51  ;;  %v3655_v12 = vmul.f32 %v5832_v60, %v7398_v25 }
0x1463   :  { %v5834_v61 = vpop.eup %5833  ;;  %5277 = vmatpush3.bf16.msra.mxu0 %v5376_v39 }
0x1464   :  { %v5836_v10 = vpop.eup %5835  ;;  %v3656_v3 = vmul.f32 %v5834_v61, %v7402_v23  ;;  %5845 = vpow2.f32 %v4427_v11  ;;  %5290 = vmatprep.subr.bf16.mxu0 %v5916_v0  ;;  %v5377_v61 = vld [vmem:[%s7528_s5 + $0x160] sm:$0xff]  }
0x1465   :  { %v3617_v56 = vadd.f32 1.0, %v5836_v10  ;;  %v5378_v10 = vld [vmem:[%s7528_s5 + $0x168] sm:$0xff]  }
0x1466   :  { %v5838_v41 = vpop.eup %5837  ;;  %v3666_v57 = vpack.c.bf16 %v3656_v3, %v3655_v12  ;;  %v4435_v12 = vld [vmem:[%s7530_s7 + $0xc] ss:$0 sm:$0xff] }
0x1467   :  { %5847 = vrcp.f32 %v3617_v56  ;;  %v3618_v21 = vadd.f32 1.0, %v5838_v41 }
0x1468   :  { %5251 = vmatpush3.bf16.msra.mxu1 %v3666_v57 }
0x1469   :  { %v5840_v2 = vpop.eup %5839  ;;  %5849 = vrcp.f32 %v3618_v21  ;;  %5252 = vmatprep.subr.bf16.mxu1 %v5916_v0 }
0x146a   :  { %v3657_v5 = vmul.f32 %v5840_v2, %v7406_v49 }
0x146b   :  { %v5842_v33 = vpop.eup %5841 }
0x146c   :  { %v5844_v26 = vpop.eup %5843  ;;  %v3658_v8 = vmul.f32 %v5842_v33, %v7410_v28 }
0x146d   :  { %v3619_v25 = vadd.f32 1.0, %v5844_v26 }
0x146e   :  { %v5846_v22 = vpop.eup %5845  ;;  %v3667_v23 = vpack.c.bf16 %v3658_v8, %v3657_v5  ;;  %v5379_v8 = vld [vmem:[%s7528_s5 + $0x170] sm:$0xff]  }
0x146f   :  { %5851 = vrcp.f32 %v3619_v25  ;;  %v3620_v9 = vadd.f32 1.0, %v5846_v22  ;;  %v5380_v25 = vld [vmem:[%s7528_s5 + $0x178] sm:$0xff]   ;;  %v4441_v22 = vld [vmem:[%s7530_s7 + $0xd] ss:$0 sm:$0xff] }
0x1470   :  { %5253 = vmatpush3.bf16.msra.mxu1 %v3667_v23 }
0x1471   :  { %v5848_v35 = vpop.eup %5847  ;;  %5853 = vrcp.f32 %v3620_v9  ;;  %5254 = vmatprep.subr.bf16.mxu1 %v5916_v0 }
0x1472   :  { %v3659_v34 = vmul.f32 %v5848_v35, %v7417_v15 }
0x1473   :  { %v5850_v32 = vpop.eup %5849 }
0x1474   :  { %v3660_v18 = vmul.f32 %v5850_v32, %v3554_v40 }
0x1476   :  { %v3668_v16 = vpack.c.bf16 %v3660_v18, %v3659_v34 }
0x1478   :  { %5255 = vmatpush3.bf16.msra.mxu1 %v3668_v16 }
0x1479   :  { %v5852_v31 = vpop.eup %5851  ;;  %5256 = vmatprep.subr.bf16.mxu1 %v5916_v0 }
0x147a   :  { %v3661_v28 = vmul.f32 %v5852_v31, %v3559_v4 }
0x147b   :  { %v5854_v49 = vpop.eup %5853 }
0x147c   :  { %v3662_v13 = vmul.f32 %v5854_v49, %v3562_v51 }
0x147e   :  { %v3669_v37 = vpack.c.bf16 %v3662_v13, %v3661_v28 }
0x1480   :  { %5257 = vmatpush3.bf16.msra.mxu1 %v3669_v37 }
0x1481   :  { %5262 = vmatprep.subr.bf16.mxu1 %v5916_v0 }
0x1483   :  { %5259 = vmatmul.mubr.msk.bf16.vlgmr.msra.gmra.mrb[212].mxu1 %vm567_vm4, %v5913_v36 }
0x1484   :  { %5266 = vmatprep.mubr.msk.bf16.mxu1 %vm5917_vm0, %v5916_v0  ;;  %5263 = vmatpush3.bf16.msra.mxu1 %v5371_v42 }
0x1485   :  { %5264 = vmatprep.subr.bf16.mxu1 %v5916_v0 }
0x1488   :  { %5265 = vmatpush3.bf16.msra.mxu1 %v5372_v17 }
0x1489   :  { %5282 = vmatprep.subr.bf16.mxu1 %v5916_v0 }
0x1556   :  { %v3704_v14 = vpop.f32.mrb[212].mxu1 }
0x1557   :  { %v3711_v44 = vmul.f32 %v5914_v27, %v3704_v14  ;;  %v5260_v15 = vpop.f32.mrb[213].mxu1  ;;  %v5381_v14 = vld [vmem:[%s7528_s5 + $0x180] sm:$0xff]   ;;  %v5382_v27 = vld [vmem:[%s7528_s5 + $0x188] sm:$0xff]  }
0x1558   :  { %v3707_v43 = vpop.f32.mrb[214].mxu1 }
0x1559   :  { %v3712_v48 = vmul.f32 %v5915_v38, %v3707_v43  ;;  %v5261_v47 = vpop.f32.mrb[215].mxu1  ;;  %v3713_v40 = vadd.f32 %v3711_v44, %v7096_v24  ;;  %v4429_v24 = vld [vmem:[%s7535_s8 + $0x3] ss:$0 sm:$0xff]  ;;  %v4447_v44 = vld [vmem:[%s7530_s7 + $0xe] ss:$0 sm:$0xff] }
0x155b   :  { %v3714_v53 = vadd.f32 %v3712_v48, %v7098_v7 }
0x155d   :  { %v3719_v19 = vpack.c.bf16 %v3714_v53, %v3713_v40 }
0x155f   :  { %5267 = vmatmul.mubr.msk.bf16.vlgmr.msra.gmra.mrb[216].mxu1 %vm110_vm1, %v3719_v19 }
0x1560   :  { %5286 = vmatprep.mubr.msk.bf16.mxu1 %vm5917_vm0, %v5916_v0  ;;  %5283 = vmatpush3.bf16.msra.mxu1 %v5377_v61 }
0x1561   :  { %5284 = vmatprep.subr.bf16.mxu1 %v5916_v0 }
0x1564   :  { %5285 = vmatpush3.bf16.msra.mxu1 %v5378_v10 }
0x1565   :  { %5298 = vmatprep.subr.bf16.mxu1 %v5916_v0 }
0x1632   :  { %v3774_v7 = vpop.f32.mrb[216].mxu1 }
0x1633   :  { %v3775_v52 = vadd.f32 %v4429_v24, %v3774_v7  ;;  %v5268_v58 = vpop.f32.mrb[217].mxu1 }
0x1634   :  { %v3777_v62 = vpop.f32.mrb[218].mxu1 }
0x1635   :  { %v4433_v63 = vmul.f32 -1.442695, %v3775_v52  ;;  %v3778_v6 = vadd.f32 %v4429_v24, %v3777_v62  ;;  %v5269_v54 = vpop.f32.mrb[219].mxu1 }
0x1637   :  { %5855 = vpow2.f32 %v4433_v63  ;;  %v4434_v46 = vmul.f32 -1.442695, %v3778_v6 }
0x1639   :  { %5857 = vpow2.f32 %v4434_v46 }
0x1641   :  { %v5856_v4 = vpop.eup %5855 }
0x1642   :  { %v3787_v1 = vadd.f32 1.0, %v5856_v4 }
0x1643   :  { %v5858_v59 = vpop.eup %5857 }
0x1644   :  { %5859 = vrcp.f32 %v3787_v1  ;;  %v3788_v30 = vadd.f32 1.0, %v5858_v59 }
0x1646   :  { %5861 = vrcp.f32 %v3788_v30 }
0x164e   :  { %v5860_v45 = vpop.eup %5859 }
0x164f   :  { %v3793_v20 = vmul.f32 %v5860_v45, %v3775_v52 }
0x1650   :  { %v5862_v51 = vpop.eup %5861 }
0x1651   :  { %v3794_v60 = vmul.f32 %v5862_v51, %v3778_v6  ;;  %v4453_v6 = vld [vmem:[%s7530_s7 + $0xf] ss:$0 sm:$0xff] }
0x1653   :  { %v3803_v11 = vpack.c.bf16 %v3794_v60, %v3793_v20 }
0x1655   :  { %5279 = vmatmul.mubr.msk.bf16.vlgmr.msra.gmra.mrb[220].mxu0 %vm790_vm5, %v3803_v11 }
0x1656   :  { %5294 = vmatprep.mubr.msk.bf16.mxu0 %vm5917_vm0, %v5916_v0  ;;  %5291 = vmatpush3.bf16.msra.mxu0 %v5379_v8 }
0x1657   :  { %5292 = vmatprep.subr.bf16.mxu0 %v5916_v0 }
0x165a   :  { %5293 = vmatpush3.bf16.msra.mxu0 %v5380_v25 }
0x1728   :  { %v3870_v3 = vpop.f32.mrb[220].mxu0 }
0x1729   :  { %v3871_v56 = vadd.f32 %v4435_v12, %v3870_v3  ;;  %v5280_v41 = vpop.f32.mrb[221].mxu0 }
0x172a   :  { %v3873_v57 = vpop.f32.mrb[222].mxu0 }
0x172b   :  { %v3874_v21 = vadd.f32 %v4435_v12, %v3873_v57  ;;  %v5281_v2 = vpop.f32.mrb[223].mxu0  ;;  %v3877_v33 = vadd.f32 %v3871_v56, %v3713_v40 }
0x172d   :  { %v3878_v26 = vadd.f32 %v3874_v21, %v3714_v53 }
0x172f   :  { %v3883_v5 = vpack.c.bf16 %v3878_v26, %v3877_v33 }
0x1731   :  { %5287 = vmatmul.mubr.msk.bf16.vlgmr.msra.gmra.mrb[220].mxu1 %vm110_vm1, %v3883_v5 }
0x1732   :  { %5302 = vmatprep.mubr.msk.bf16.mxu1 %vm5917_vm0, %v5916_v0  ;;  %5299 = vmatpush3.bf16.msra.mxu1 %v5381_v14 }
0x1733   :  { %5300 = vmatprep.subr.bf16.mxu1 %v5916_v0 }
0x1736   :  { %5301 = vmatpush3.bf16.msra.mxu1 %v5382_v27 }
0x1804   :  { %v3938_v23 = vpop.f32.mrb[220].mxu1 }
0x1805   :  { %v3939_v9 = vadd.f32 %v4441_v22, %v3938_v23  ;;  %v5288_v35 = vpop.f32.mrb[221].mxu1 }
0x1806   :  { %v3941_v32 = vpop.f32.mrb[222].mxu1 }
0x1807   :  { %v4445_v34 = vmul.f32 -1.442695, %v3939_v9  ;;  %v3942_v18 = vadd.f32 %v4441_v22, %v3941_v32  ;;  %v5289_v16 = vpop.f32.mrb[223].mxu1 }
0x1809   :  { %5863 = vpow2.f32 %v4445_v34  ;;  %v4446_v31 = vmul.f32 -1.442695, %v3942_v18 }
0x180b   :  { %5865 = vpow2.f32 %v4446_v31 }
0x1813   :  { %v5864_v49 = vpop.eup %5863 }
0x1814   :  { %v3951_v28 = vadd.f32 1.0, %v5864_v49 }
0x1815   :  { %v5866_v13 = vpop.eup %5865 }
0x1816   :  { %5867 = vrcp.f32 %v3951_v28  ;;  %v3952_v37 = vadd.f32 1.0, %v5866_v13 }
0x1818   :  { %5869 = vrcp.f32 %v3952_v37 }
0x1820   :  { %v5868_v36 = vpop.eup %5867 }
0x1821   :  { %v3957_v17 = vmul.f32 %v5868_v36, %v3939_v9 }
0x1822   :  { %v5870_v42 = vpop.eup %5869 }
0x1823   :  { %v3958_v55 = vmul.f32 %v5870_v42, %v3942_v18 }
0x1825   :  { %v3963_v29 = vpack.c.bf16 %v3958_v55, %v3957_v17 }
0x1827   :  { %5295 = vmatmul.mubr.msk.bf16.vlgmr.msra.gmra.mrb[224].mxu0 %vm110_vm1, %v3963_v29 }
0x18fa   :  { %v4018_v15 = vpop.f32.mrb[224].mxu0 }
0x18fb   :  { %v4019_v43 = vadd.f32 %v4447_v44, %v4018_v15  ;;  %v5296_v38 = vpop.f32.mrb[225].mxu0 }
0x18fc   :  { %v4021_v48 = vpop.f32.mrb[226].mxu0 }
0x18fd   :  { %v4451_v47 = vmul.f32 -1.442695, %v4019_v43  ;;  %v4022_v40 = vadd.f32 %v4447_v44, %v4021_v48  ;;  %v5297_v53 = vpop.f32.mrb[227].mxu0 }
0x18ff   :  { %5871 = vpow2.f32 %v4451_v47  ;;  %v4452_v19 = vmul.f32 -1.442695, %v4022_v40 }
0x1901   :  { %5873 = vpow2.f32 %v4452_v19 }
0x1909   :  { %v5872_v0 = vpop.eup %5871 }
0x190a   :  { %v4031_v50 = vadd.f32 1.0, %v5872_v0 }
0x190b   :  { %v5874_v39 = vpop.eup %5873 }
0x190c   :  { %5875 = vrcp.f32 %v4031_v50  ;;  %v4032_v24 = vadd.f32 1.0, %v5874_v39 }
0x190e   :  { %5877 = vrcp.f32 %v4032_v24 }
0x1916   :  { %v5876_v7 = vpop.eup %5875 }
0x1917   :  { %v4037_v58 = vmul.f32 %v5876_v7, %v4019_v43 }
0x1918   :  { %v5878_v52 = vpop.eup %5877 }
0x1919   :  { %v4038_v62 = vmul.f32 %v5878_v52, %v4022_v40 }
0x191b   :  { %v4043_v63 = vpack.c.bf16 %v4038_v62, %v4037_v58 }
0x191d   :  { %5303 = vmatmul.mubr.msk.bf16.vlgmr.msra.gmra.mrb[224].mxu1 %vm110_vm1, %v4043_v63 }
0x19f0   :  { %v4098_v54 = vpop.f32.mrb[224].mxu1 }
0x19f1   :  { %v4099_v46 = vadd.f32 %v4453_v6, %v4098_v54  ;;  %v5304_v4 = vpop.f32.mrb[225].mxu1 }
0x19f2   :  { %v4101_v1 = vpop.f32.mrb[226].mxu1 }
0x19f3   :  { %4106 = vst.msk [vmem:[%s7537_s9] sm:$0xff] %vm4105_vm8, %v4099_v46  ;;  %v4102_v59 = vadd.f32 %v4453_v6, %v4101_v1  ;;  %v5305_v30 = vpop.f32.mrb[227].mxu1 }
0x19f5   :  { %4107 = vst.msk [vmem:[%s7537_s9 + $0x8] sm:$0xff] %vm4105_vm8, %v4102_v59 }

</bundles_post_ra>
